<compile_context>
chip_gen: v7x
topology: tpu7x:2x2x1
jax: 0.10.0
libtpu: 0.0.40
codegen_flags: <defaults>
</compile_context>

<pallas_src>
import jax
import jax.numpy as jnp
from jax.experimental import pallas as pl
from jax.experimental.pallas import tpu as pltpu

LRELU_SLOPE = 0.2
BN_EPS = 0.8            # BatchNorm1d(num_features, 0.8): 0.8 is the positional eps arg
HAS_BN = (False, True, True, True, True, False)


# ------------------------- in-kernel helpers ----------------------------------

def _iota_mod(x, m):
    """x % m for an int32 iota array and a static positive Python int m."""
    if m & (m - 1) == 0:                    # power of two -> bitwise AND (always lowers)
        return jnp.bitwise_and(x, m - 1)
    return jax.lax.rem(x, jnp.int32(m))


def _tap_selector(N, L_in, L_out, k):
    """(N*L_out, N*L_in) 0/1 matrix gathering tap k of a k=3, s=2, p=1 conv.

    Row r = b*L_out + j selects global input column 2*r - 1 + k (valid because
    L_in == 2*L_out, so batch-block offsets cancel).  Tap k=0 at j == 0 reads
    the zero left-pad, so that row is masked to all-zeros.
    """
    M, K = N * L_out, N * L_in
    r = jax.lax.broadcasted_iota(jnp.int32, (M, K), 0)
    c = jax.lax.broadcasted_iota(jnp.int32, (M, K), 1)
    hit = c == (2 * r - 1 + k)
    if k == 0:
        hit = jnp.logical_and(hit, _iota_mod(r, L_out) != 0)
    return jnp.where(hit, jnp.float32(1.0), jnp.float32(0.0))


# ------------------------- fused kernel ----------------------------------------

def _build_kernel(N, L0):
    # Static per-layer output lengths (Conv1d k=3, s=2, p=1: L -> L/2 for even L).
    Ls = []
    L = L0
    for i in range(6):
        assert L % 2 == 0, (
            "fused kernel assumes an even length at every conv layer "
            f"(layer {i}: L={L}); choose L0 divisible by 64")
        L //= 2
        Ls.append(L)

    def kernel(x_ref,
               w1, b1,
               w2, g2, be2,
               w3, g3, be3,
               w4, g4, be4,
               w5, g5, be5,
               w6, b6, fw, fb,
               out_ref):

        def conv(act, L_in, L_out, w_ref):
            # Conv1d(k=3, s=2, p=1): 3 tap gathers (constant 0/1 matmuls) followed by
            # per-tap (C_in, C_out) matmuls, accumulated in f32.
            y = None
            for k in range(3):
                sel = _tap_selector(N, L_in, L_out, k)                  # (N*Lo, N*Li)
                gk = jnp.dot(sel, act, preferred_element_type=jnp.float32)
                tk = jnp.dot(gk, w_ref[k], preferred_element_type=jnp.float32)
                y = tk if y is None else y + tk
            return y

        def bn(y, gamma_ref, beta_ref):
            # Training-mode batch stats over rows (= batch*length), biased variance.
            # Conv bias cancels exactly under the mean subtraction, so it is never added.
            mean = jnp.mean(y, axis=0, keepdims=True)
            var = jnp.mean(jnp.square(y - mean), axis=0, keepdims=True)
            return (y - mean) * jax.lax.rsqrt(var + BN_EPS) * gamma_ref[...] + beta_ref[...]

        def lrelu(y):
            return jnp.where(y > 0, y, LRELU_SLOPE * y)

        a = x_ref[...]                                                  # (N*L0, C_in)
        a = lrelu(conv(a, L0,    Ls[0], w1) + b1[...])                  # conv1 (+bias)
        a = lrelu(bn(conv(a, Ls[0], Ls[1], w2), g2, be2))               # conv2 + bn2
        a = lrelu(bn(conv(a, Ls[1], Ls[2], w3), g3, be3))               # conv3 + bn3
        a = lrelu(bn(conv(a, Ls[2], Ls[3], w4), g4, be4))               # conv4 + bn4
        a = lrelu(bn(conv(a, Ls[3], Ls[4], w5), g5, be5))               # conv5 + bn5

        # conv6: C_out == 1 -> broadcast-multiply + one cross-lane reduction
        # instead of three 1-lane MXU matmuls with a (3, 512, 1) weight.
        z = None
        for k in range(3):
            sel = _tap_selector(N, Ls[4], Ls[5], k)                     # (N*Lf, N*2Lf)
            gk = jnp.dot(sel, a, preferred_element_type=jnp.float32)    # (N*Lf, 512)
            tk = gk * w6[pl.ds(k, 1), :]                                # (1,512) broadcast
            z = tk if z is None else z + tk
        y6 = jnp.sum(z, axis=-1, keepdims=True) + b6[0]                 # (N*Lf, 1)
        y6 = lrelu(y6)

        # AdaptiveAvgPool1d(1), flatten, Linear(1, 1).
        Lf = Ls[5]
        if Lf == 1:
            pooled = y6                                                 # (N, 1)
        else:
            r = jax.lax.broadcasted_iota(jnp.int32, (N, N * Lf), 0)
            c = jax.lax.broadcasted_iota(jnp.int32, (N, N * Lf), 1)
            avg = jnp.where((c >= r * Lf) & (c < (r + 1) * Lf),
                            jnp.float32(1.0 / Lf), jnp.float32(0.0))
            pooled = jnp.dot(avg, y6, preferred_element_type=jnp.float32)
        out_ref[...] = pooled * fw[0] + fb[0]

    return kernel


# ------------------------- forward wrapper --------------------------------------

def discriminator_forward(params, x):
    """x: (N, C_in, L) float32 -> (N, 1) float32.  One fused pallas_call."""
    N, C_in, L0 = x.shape
    # One-time layout change: rows = batch*length, lanes = channels.
    x2d = jnp.transpose(x, (0, 2, 1)).reshape(N * L0, C_in)

    args = [
        x2d,
        params["w1"], params["b1"],
        # conv2..conv5 biases are omitted: they cancel exactly under training-mode BN.
        params["w2"], params["gamma2"], params["beta2"],
        params["w3"], params["gamma3"], params["beta3"],
        params["w4"], params["gamma4"], params["beta4"],
        params["w5"], params["gamma5"], params["beta5"],
        params["w6"],                       # (3, 512) per-tap row vectors (C_out == 1)
        params["b6"].reshape((1,)),         # scalar conv6 bias -> SMEM
        params["fcn_w"], params["fcn_b"],   # Linear(1,1) scalars -> SMEM
    ]
    n_vmem = len(args) - 3
    in_specs = ([pl.BlockSpec(memory_space=pltpu.MemorySpace.VMEM)] * n_vmem
                + [pl.BlockSpec(memory_space=pltpu.MemorySpace.SMEM)] * 3)

    return pl.pallas_call(
        _build_kernel(N, L0),
        out_shape=jax.ShapeDtypeStruct((N, 1), jnp.float32),
        in_specs=in_specs,
        out_specs=pl.BlockSpec(memory_space=pltpu.MemorySpace.VMEM),
        compiler_params=pltpu.CompilerParams(vmem_limit_bytes=32 * 1024 * 1024),
    )(*args)


# ------------------------- deterministic parameter init -------------------------

def _xavier_uniform(key, shape, fan_in, fan_out):
    bound = (6.0 / (fan_in + fan_out)) ** 0.5
    return jax.random.uniform(key, shape, jnp.float32, -bound, bound)


def init_params(key, in_channels):
    chans = [in_channels, 32, 64, 128, 256, 512, 1]
    params = {}
    for i in range(6):
        key, kw, kb = jax.random.split(key, 3)
        cin, cout = chans[i], chans[i + 1]
        fan_in, fan_out = cin * 3, cout * 3
        w = _xavier_uniform(kw, (cout, cin, 3), fan_in, fan_out)     # PyTorch layout
        w_taps = jnp.transpose(w, (2, 1, 0))                         # (3, C_in, C_out)
        if i == 5:
            params["w6"] = w_taps[:, :, 0]                           # (3, 512): C_out == 1
        else:
            params[f"w{i + 1}"] = w_taps
        bbound = 1.0 / (fan_in ** 0.5)                               # PyTorch Conv1d bias init
        # Biases for BN'd layers are created (parameter parity with PyTorch) but are
        # not used in the forward: they cancel exactly under training-mode BatchNorm.
        params[f"b{i + 1}"] = jax.random.uniform(kb, (1, cout), jnp.float32, -bbound, bbound)
        if HAS_BN[i]:
            params[f"gamma{i + 1}"] = jnp.ones((1, cout), jnp.float32)
            params[f"beta{i + 1}"] = jnp.zeros((1, cout), jnp.float32)
    key, kw, kb = jax.random.split(key, 3)
    params["fcn_w"] = _xavier_uniform(kw, (1,), 1, 1)                # Linear(1,1) weight
    params["fcn_b"] = jax.random.uniform(kb, (1,), jnp.float32, -1.0, 1.0)
    return params


# ------------------------- main --------------------------------------------------

if __name__ == "__main__":
    key = jax.random.PRNGKey(0)
    k_x, k_p = jax.random.split(key)

    N, C_IN, L = 2, 4, 64   # 64 -> 32 -> 16 -> 8 -> 4 -> 2 -> 1 through 6 stride-2 convs
    x = jax.random.normal(k_x, (N, C_IN, L), jnp.float32)
    params = init_params(k_p, C_IN)

    fwd = jax.jit(discriminator_forward)
    out = jax.block_until_ready(fwd(params, x))
    assert out.shape == (N, 1), out.shape
    print("KERNEL_OK")
</pallas_src>

<mosaic_0001>
module attributes {stable_mosaic.version = 11 : i64} {
  func.func @kernel(%arg0: memref<128x4xf32, #tpu.memory_space<vmem>>, %arg1: memref<3x4x32xf32, #tpu.memory_space<vmem>>, %arg2: memref<1x32xf32, #tpu.memory_space<vmem>>, %arg3: memref<3x32x64xf32, #tpu.memory_space<vmem>>, %arg4: memref<1x64xf32, #tpu.memory_space<vmem>>, %arg5: memref<1x64xf32, #tpu.memory_space<vmem>>, %arg6: memref<3x64x128xf32, #tpu.memory_space<vmem>>, %arg7: memref<1x128xf32, #tpu.memory_space<vmem>>, %arg8: memref<1x128xf32, #tpu.memory_space<vmem>>, %arg9: memref<3x128x256xf32, #tpu.memory_space<vmem>>, %arg10: memref<1x256xf32, #tpu.memory_space<vmem>>, %arg11: memref<1x256xf32, #tpu.memory_space<vmem>>, %arg12: memref<3x256x512xf32, #tpu.memory_space<vmem>>, %arg13: memref<1x512xf32, #tpu.memory_space<vmem>>, %arg14: memref<1x512xf32, #tpu.memory_space<vmem>>, %arg15: memref<3x512xf32, #tpu.memory_space<vmem>>, %arg16: memref<1xf32, #tpu.memory_space<smem>>, %arg17: memref<1xf32, #tpu.memory_space<smem>>, %arg18: memref<1xf32, #tpu.memory_space<smem>>, %arg19: memref<2x1xf32, #tpu.memory_space<vmem>>) attributes {dimension_semantics = [], scalar_prefetch = 0 : i64, scratch_operands = 0 : i64, tpu.core_type = #tpu.core_type<tc>} {
    %c0 = arith.constant 0 : index
    %c0_0 = arith.constant 0 : index
    %0 = vector.load %arg0[%c0, %c0_0] : memref<128x4xf32, #tpu.memory_space<vmem>>, vector<128x4xf32>
    %1 = tpu.iota {dimensions = array<i32: 0>} : vector<64x128xi32>
    %2 = tpu.iota {dimensions = array<i32: 1>} : vector<64x128xi32>
    %c2_i32 = arith.constant 2 : i32
    %3 = vector.broadcast %c2_i32 : i32 to vector<64x128xi32>
    %4 = arith.muli %3, %1 : vector<64x128xi32>
    %c1_i32 = arith.constant 1 : i32
    %5 = vector.broadcast %c1_i32 : i32 to vector<64x128xi32>
    %6 = arith.subi %4, %5 : vector<64x128xi32>
    %c0_i32 = arith.constant 0 : i32
    %7 = vector.broadcast %c0_i32 : i32 to vector<64x128xi32>
    %8 = arith.addi %6, %7 : vector<64x128xi32>
    %9 = arith.cmpi eq, %2, %8 : vector<64x128xi32>
    %c31_i32 = arith.constant 31 : i32
    %10 = vector.broadcast %c31_i32 : i32 to vector<64x128xi32>
    %11 = arith.andi %1, %10 : vector<64x128xi32>
    %c0_i32_1 = arith.constant 0 : i32
    %12 = vector.broadcast %c0_i32_1 : i32 to vector<64x128xi32>
    %13 = arith.cmpi ne, %11, %12 : vector<64x128xi32>
    %14 = arith.andi %9, %13 : vector<64x128xi1>
    %cst = arith.constant 1.000000e+00 : f32
    %cst_2 = arith.constant 0.000000e+00 : f32
    %15 = vector.broadcast %cst : f32 to vector<64x128xf32>
    %16 = vector.broadcast %cst_2 : f32 to vector<64x128xf32>
    %17 = arith.select %14, %15, %16 : vector<64x128xi1>, vector<64x128xf32>
    %cst_3 = arith.constant dense<0.000000e+00> : vector<64x4xf32>
    %18 = tpu.matmul %17, %0, %cst_3 {dimension_numbers = #tpu.dot_dimension_numbers<[1], [0], [0], [1], [0, 0, 1, 1], [], []>} : vector<64x128xf32>, vector<128x4xf32>, vector<64x4xf32> -> vector<64x4xf32>
    %c0_4 = arith.constant 0 : index
    %c0_5 = arith.constant 0 : index
    %c0_6 = arith.constant 0 : index
    %19 = vector.load %arg1[%c0_4, %c0_5, %c0_6] : memref<3x4x32xf32, #tpu.memory_space<vmem>>, vector<1x4x32xf32>
    %20 = vector.shape_cast %19 : vector<1x4x32xf32> to vector<4x32xf32>
    %cst_7 = arith.constant dense<0.000000e+00> : vector<64x32xf32>
    %21 = tpu.matmul %18, %20, %cst_7 {dimension_numbers = #tpu.dot_dimension_numbers<[1], [0], [0], [1], [0, 0, 1, 1], [], []>} : vector<64x4xf32>, vector<4x32xf32>, vector<64x32xf32> -> vector<64x32xf32>
    %22 = tpu.iota {dimensions = array<i32: 0>} : vector<64x128xi32>
    %23 = tpu.iota {dimensions = array<i32: 1>} : vector<64x128xi32>
    %c2_i32_8 = arith.constant 2 : i32
    %24 = vector.broadcast %c2_i32_8 : i32 to vector<64x128xi32>
    %25 = arith.muli %24, %22 : vector<64x128xi32>
    %c1_i32_9 = arith.constant 1 : i32
    %26 = vector.broadcast %c1_i32_9 : i32 to vector<64x128xi32>
    %27 = arith.subi %25, %26 : vector<64x128xi32>
    %c1_i32_10 = arith.constant 1 : i32
    %28 = vector.broadcast %c1_i32_10 : i32 to vector<64x128xi32>
    %29 = arith.addi %27, %28 : vector<64x128xi32>
    %30 = arith.cmpi eq, %23, %29 : vector<64x128xi32>
    %cst_11 = arith.constant 1.000000e+00 : f32
    %cst_12 = arith.constant 0.000000e+00 : f32
    %31 = vector.broadcast %cst_11 : f32 to vector<64x128xf32>
    %32 = vector.broadcast %cst_12 : f32 to vector<64x128xf32>
    %33 = arith.select %30, %31, %32 : vector<64x128xi1>, vector<64x128xf32>
    %cst_13 = arith.constant dense<0.000000e+00> : vector<64x4xf32>
    %34 = tpu.matmul %33, %0, %cst_13 {dimension_numbers = #tpu.dot_dimension_numbers<[1], [0], [0], [1], [0, 0, 1, 1], [], []>} : vector<64x128xf32>, vector<128x4xf32>, vector<64x4xf32> -> vector<64x4xf32>
    %c1 = arith.constant 1 : index
    %c0_14 = arith.constant 0 : index
    %c0_15 = arith.constant 0 : index
    %35 = vector.load %arg1[%c1, %c0_14, %c0_15] : memref<3x4x32xf32, #tpu.memory_space<vmem>>, vector<1x4x32xf32>
    %36 = vector.shape_cast %35 : vector<1x4x32xf32> to vector<4x32xf32>
    %cst_16 = arith.constant dense<0.000000e+00> : vector<64x32xf32>
    %37 = tpu.matmul %34, %36, %cst_16 {dimension_numbers = #tpu.dot_dimension_numbers<[1], [0], [0], [1], [0, 0, 1, 1], [], []>} : vector<64x4xf32>, vector<4x32xf32>, vector<64x32xf32> -> vector<64x32xf32>
    %38 = arith.addf %21, %37 : vector<64x32xf32>
    %39 = tpu.iota {dimensions = array<i32: 0>} : vector<64x128xi32>
    %40 = tpu.iota {dimensions = array<i32: 1>} : vector<64x128xi32>
    %c2_i32_17 = arith.constant 2 : i32
    %41 = vector.broadcast %c2_i32_17 : i32 to vector<64x128xi32>
    %42 = arith.muli %41, %39 : vector<64x128xi32>
    %c1_i32_18 = arith.constant 1 : i32
    %43 = vector.broadcast %c1_i32_18 : i32 to vector<64x128xi32>
    %44 = arith.subi %42, %43 : vector<64x128xi32>
    %c2_i32_19 = arith.constant 2 : i32
    %45 = vector.broadcast %c2_i32_19 : i32 to vector<64x128xi32>
    %46 = arith.addi %44, %45 : vector<64x128xi32>
    %47 = arith.cmpi eq, %40, %46 : vector<64x128xi32>
    %cst_20 = arith.constant 1.000000e+00 : f32
    %cst_21 = arith.constant 0.000000e+00 : f32
    %48 = vector.broadcast %cst_20 : f32 to vector<64x128xf32>
    %49 = vector.broadcast %cst_21 : f32 to vector<64x128xf32>
    %50 = arith.select %47, %48, %49 : vector<64x128xi1>, vector<64x128xf32>
    %cst_22 = arith.constant dense<0.000000e+00> : vector<64x4xf32>
    %51 = tpu.matmul %50, %0, %cst_22 {dimension_numbers = #tpu.dot_dimension_numbers<[1], [0], [0], [1], [0, 0, 1, 1], [], []>} : vector<64x128xf32>, vector<128x4xf32>, vector<64x4xf32> -> vector<64x4xf32>
    %c2 = arith.constant 2 : index
    %c0_23 = arith.constant 0 : index
    %c0_24 = arith.constant 0 : index
    %52 = vector.load %arg1[%c2, %c0_23, %c0_24] : memref<3x4x32xf32, #tpu.memory_space<vmem>>, vector<1x4x32xf32>
    %53 = vector.shape_cast %52 : vector<1x4x32xf32> to vector<4x32xf32>
    %cst_25 = arith.constant dense<0.000000e+00> : vector<64x32xf32>
    %54 = tpu.matmul %51, %53, %cst_25 {dimension_numbers = #tpu.dot_dimension_numbers<[1], [0], [0], [1], [0, 0, 1, 1], [], []>} : vector<64x4xf32>, vector<4x32xf32>, vector<64x32xf32> -> vector<64x32xf32>
    %55 = arith.addf %38, %54 : vector<64x32xf32>
    %c0_26 = arith.constant 0 : index
    %c0_27 = arith.constant 0 : index
    %56 = vector.load %arg2[%c0_26, %c0_27] : memref<1x32xf32, #tpu.memory_space<vmem>>, vector<1x32xf32>
    %57 = vector.broadcast %56 : vector<1x32xf32> to vector<64x32xf32>
    %58 = arith.addf %55, %57 : vector<64x32xf32>
    %cst_28 = arith.constant 0.000000e+00 : f32
    %59 = vector.broadcast %cst_28 : f32 to vector<64x32xf32>
    %60 = arith.cmpf ogt, %58, %59 : vector<64x32xf32>
    %cst_29 = arith.constant 2.000000e-01 : f32
    %61 = vector.broadcast %cst_29 : f32 to vector<64x32xf32>
    %62 = arith.mulf %61, %58 : vector<64x32xf32>
    %63 = arith.select %60, %58, %62 : vector<64x32xi1>, vector<64x32xf32>
    %64 = tpu.iota {dimensions = array<i32: 0>} : vector<32x64xi32>
    %65 = tpu.iota {dimensions = array<i32: 1>} : vector<32x64xi32>
    %c2_i32_30 = arith.constant 2 : i32
    %66 = vector.broadcast %c2_i32_30 : i32 to vector<32x64xi32>
    %67 = arith.muli %66, %64 : vector<32x64xi32>
    %c1_i32_31 = arith.constant 1 : i32
    %68 = vector.broadcast %c1_i32_31 : i32 to vector<32x64xi32>
    %69 = arith.subi %67, %68 : vector<32x64xi32>
    %c0_i32_32 = arith.constant 0 : i32
    %70 = vector.broadcast %c0_i32_32 : i32 to vector<32x64xi32>
    %71 = arith.addi %69, %70 : vector<32x64xi32>
    %72 = arith.cmpi eq, %65, %71 : vector<32x64xi32>
    %c15_i32 = arith.constant 15 : i32
    %73 = vector.broadcast %c15_i32 : i32 to vector<32x64xi32>
    %74 = arith.andi %64, %73 : vector<32x64xi32>
    %c0_i32_33 = arith.constant 0 : i32
    %75 = vector.broadcast %c0_i32_33 : i32 to vector<32x64xi32>
    %76 = arith.cmpi ne, %74, %75 : vector<32x64xi32>
    %77 = arith.andi %72, %76 : vector<32x64xi1>
    %cst_34 = arith.constant 1.000000e+00 : f32
    %cst_35 = arith.constant 0.000000e+00 : f32
    %78 = vector.broadcast %cst_34 : f32 to vector<32x64xf32>
    %79 = vector.broadcast %cst_35 : f32 to vector<32x64xf32>
    %80 = arith.select %77, %78, %79 : vector<32x64xi1>, vector<32x64xf32>
    %cst_36 = arith.constant dense<0.000000e+00> : vector<32x32xf32>
    %81 = tpu.matmul %80, %63, %cst_36 {dimension_numbers = #tpu.dot_dimension_numbers<[1], [0], [0], [1], [0, 0, 1, 1], [], []>} : vector<32x64xf32>, vector<64x32xf32>, vector<32x32xf32> -> vector<32x32xf32>
    %c0_37 = arith.constant 0 : index
    %c0_38 = arith.constant 0 : index
    %c0_39 = arith.constant 0 : index
    %82 = vector.load %arg3[%c0_37, %c0_38, %c0_39] : memref<3x32x64xf32, #tpu.memory_space<vmem>>, vector<1x32x64xf32>
    %83 = vector.shape_cast %82 : vector<1x32x64xf32> to vector<32x64xf32>
    %cst_40 = arith.constant dense<0.000000e+00> : vector<32x64xf32>
    %84 = tpu.matmul %81, %83, %cst_40 {dimension_numbers = #tpu.dot_dimension_numbers<[1], [0], [0], [1], [0, 0, 1, 1], [], []>} : vector<32x32xf32>, vector<32x64xf32>, vector<32x64xf32> -> vector<32x64xf32>
    %85 = tpu.iota {dimensions = array<i32: 0>} : vector<32x64xi32>
    %86 = tpu.iota {dimensions = array<i32: 1>} : vector<32x64xi32>
    %c2_i32_41 = arith.constant 2 : i32
    %87 = vector.broadcast %c2_i32_41 : i32 to vector<32x64xi32>
    %88 = arith.muli %87, %85 : vector<32x64xi32>
    %c1_i32_42 = arith.constant 1 : i32
    %89 = vector.broadcast %c1_i32_42 : i32 to vector<32x64xi32>
    %90 = arith.subi %88, %89 : vector<32x64xi32>
    %c1_i32_43 = arith.constant 1 : i32
    %91 = vector.broadcast %c1_i32_43 : i32 to vector<32x64xi32>
    %92 = arith.addi %90, %91 : vector<32x64xi32>
    %93 = arith.cmpi eq, %86, %92 : vector<32x64xi32>
    %cst_44 = arith.constant 1.000000e+00 : f32
    %cst_45 = arith.constant 0.000000e+00 : f32
    %94 = vector.broadcast %cst_44 : f32 to vector<32x64xf32>
    %95 = vector.broadcast %cst_45 : f32 to vector<32x64xf32>
    %96 = arith.select %93, %94, %95 : vector<32x64xi1>, vector<32x64xf32>
    %cst_46 = arith.constant dense<0.000000e+00> : vector<32x32xf32>
    %97 = tpu.matmul %96, %63, %cst_46 {dimension_numbers = #tpu.dot_dimension_numbers<[1], [0], [0], [1], [0, 0, 1, 1], [], []>} : vector<32x64xf32>, vector<64x32xf32>, vector<32x32xf32> -> vector<32x32xf32>
    %c1_47 = arith.constant 1 : index
    %c0_48 = arith.constant 0 : index
    %c0_49 = arith.constant 0 : index
    %98 = vector.load %arg3[%c1_47, %c0_48, %c0_49] : memref<3x32x64xf32, #tpu.memory_space<vmem>>, vector<1x32x64xf32>
    %99 = vector.shape_cast %98 : vector<1x32x64xf32> to vector<32x64xf32>
    %cst_50 = arith.constant dense<0.000000e+00> : vector<32x64xf32>
    %100 = tpu.matmul %97, %99, %cst_50 {dimension_numbers = #tpu.dot_dimension_numbers<[1], [0], [0], [1], [0, 0, 1, 1], [], []>} : vector<32x32xf32>, vector<32x64xf32>, vector<32x64xf32> -> vector<32x64xf32>
    %101 = arith.addf %84, %100 : vector<32x64xf32>
    %102 = tpu.iota {dimensions = array<i32: 0>} : vector<32x64xi32>
    %103 = tpu.iota {dimensions = array<i32: 1>} : vector<32x64xi32>
    %c2_i32_51 = arith.constant 2 : i32
    %104 = vector.broadcast %c2_i32_51 : i32 to vector<32x64xi32>
    %105 = arith.muli %104, %102 : vector<32x64xi32>
    %c1_i32_52 = arith.constant 1 : i32
    %106 = vector.broadcast %c1_i32_52 : i32 to vector<32x64xi32>
    %107 = arith.subi %105, %106 : vector<32x64xi32>
    %c2_i32_53 = arith.constant 2 : i32
    %108 = vector.broadcast %c2_i32_53 : i32 to vector<32x64xi32>
    %109 = arith.addi %107, %108 : vector<32x64xi32>
    %110 = arith.cmpi eq, %103, %109 : vector<32x64xi32>
    %cst_54 = arith.constant 1.000000e+00 : f32
    %cst_55 = arith.constant 0.000000e+00 : f32
    %111 = vector.broadcast %cst_54 : f32 to vector<32x64xf32>
    %112 = vector.broadcast %cst_55 : f32 to vector<32x64xf32>
    %113 = arith.select %110, %111, %112 : vector<32x64xi1>, vector<32x64xf32>
    %cst_56 = arith.constant dense<0.000000e+00> : vector<32x32xf32>
    %114 = tpu.matmul %113, %63, %cst_56 {dimension_numbers = #tpu.dot_dimension_numbers<[1], [0], [0], [1], [0, 0, 1, 1], [], []>} : vector<32x64xf32>, vector<64x32xf32>, vector<32x32xf32> -> vector<32x32xf32>
    %c2_57 = arith.constant 2 : index
    %c0_58 = arith.constant 0 : index
    %c0_59 = arith.constant 0 : index
    %115 = vector.load %arg3[%c2_57, %c0_58, %c0_59] : memref<3x32x64xf32, #tpu.memory_space<vmem>>, vector<1x32x64xf32>
    %116 = vector.shape_cast %115 : vector<1x32x64xf32> to vector<32x64xf32>
    %cst_60 = arith.constant dense<0.000000e+00> : vector<32x64xf32>
    %117 = tpu.matmul %114, %116, %cst_60 {dimension_numbers = #tpu.dot_dimension_numbers<[1], [0], [0], [1], [0, 0, 1, 1], [], []>} : vector<32x32xf32>, vector<32x64xf32>, vector<32x64xf32> -> vector<32x64xf32>
    %118 = arith.addf %101, %117 : vector<32x64xf32>
    %cst_61 = arith.constant dense<0.000000e+00> : vector<64xf32>
    %119 = vector.multi_reduction <add>, %118, %cst_61 [0] : vector<32x64xf32> to vector<64xf32>
    %120 = vector.shape_cast %119 : vector<64xf32> to vector<1x64xf32>
    %cst_62 = arith.constant 3.200000e+01 : f32
    %121 = vector.broadcast %cst_62 : f32 to vector<1x64xf32>
    %122 = arith.divf %120, %121 : vector<1x64xf32>
    %123 = vector.broadcast %122 : vector<1x64xf32> to vector<32x64xf32>
    %124 = arith.subf %118, %123 : vector<32x64xf32>
    %125 = arith.mulf %124, %124 : vector<32x64xf32>
    %cst_63 = arith.constant dense<0.000000e+00> : vector<64xf32>
    %126 = vector.multi_reduction <add>, %125, %cst_63 [0] : vector<32x64xf32> to vector<64xf32>
    %127 = vector.shape_cast %126 : vector<64xf32> to vector<1x64xf32>
    %cst_64 = arith.constant 3.200000e+01 : f32
    %128 = vector.broadcast %cst_64 : f32 to vector<1x64xf32>
    %129 = arith.divf %127, %128 : vector<1x64xf32>
    %130 = vector.broadcast %122 : vector<1x64xf32> to vector<32x64xf32>
    %131 = arith.subf %118, %130 : vector<32x64xf32>
    %cst_65 = arith.constant 8.000000e-01 : f32
    %132 = vector.broadcast %cst_65 : f32 to vector<1x64xf32>
    %133 = arith.addf %129, %132 : vector<1x64xf32>
    %134 = math.rsqrt %133 : vector<1x64xf32>
    %135 = vector.broadcast %134 : vector<1x64xf32> to vector<32x64xf32>
    %136 = arith.mulf %131, %135 : vector<32x64xf32>
    %c0_66 = arith.constant 0 : index
    %c0_67 = arith.constant 0 : index
    %137 = vector.load %arg4[%c0_66, %c0_67] : memref<1x64xf32, #tpu.memory_space<vmem>>, vector<1x64xf32>
    %138 = vector.broadcast %137 : vector<1x64xf32> to vector<32x64xf32>
    %139 = arith.mulf %136, %138 : vector<32x64xf32>
    %c0_68 = arith.constant 0 : index
    %c0_69 = arith.constant 0 : index
    %140 = vector.load %arg5[%c0_68, %c0_69] : memref<1x64xf32, #tpu.memory_space<vmem>>, vector<1x64xf32>
    %141 = vector.broadcast %140 : vector<1x64xf32> to vector<32x64xf32>
    %142 = arith.addf %139, %141 : vector<32x64xf32>
    %cst_70 = arith.constant 0.000000e+00 : f32
    %143 = vector.broadcast %cst_70 : f32 to vector<32x64xf32>
    %144 = arith.cmpf ogt, %142, %143 : vector<32x64xf32>
    %cst_71 = arith.constant 2.000000e-01 : f32
    %145 = vector.broadcast %cst_71 : f32 to vector<32x64xf32>
    %146 = arith.mulf %145, %142 : vector<32x64xf32>
    %147 = arith.select %144, %142, %146 : vector<32x64xi1>, vector<32x64xf32>
    %148 = tpu.iota {dimensions = array<i32: 0>} : vector<16x32xi32>
    %149 = tpu.iota {dimensions = array<i32: 1>} : vector<16x32xi32>
    %c2_i32_72 = arith.constant 2 : i32
    %150 = vector.broadcast %c2_i32_72 : i32 to vector<16x32xi32>
    %151 = arith.muli %150, %148 : vector<16x32xi32>
    %c1_i32_73 = arith.constant 1 : i32
    %152 = vector.broadcast %c1_i32_73 : i32 to vector<16x32xi32>
    %153 = arith.subi %151, %152 : vector<16x32xi32>
    %c0_i32_74 = arith.constant 0 : i32
    %154 = vector.broadcast %c0_i32_74 : i32 to vector<16x32xi32>
    %155 = arith.addi %153, %154 : vector<16x32xi32>
    %156 = arith.cmpi eq, %149, %155 : vector<16x32xi32>
    %c7_i32 = arith.constant 7 : i32
    %157 = vector.broadcast %c7_i32 : i32 to vector<16x32xi32>
    %158 = arith.andi %148, %157 : vector<16x32xi32>
    %c0_i32_75 = arith.constant 0 : i32
    %159 = vector.broadcast %c0_i32_75 : i32 to vector<16x32xi32>
    %160 = arith.cmpi ne, %158, %159 : vector<16x32xi32>
    %161 = arith.andi %156, %160 : vector<16x32xi1>
    %cst_76 = arith.constant 1.000000e+00 : f32
    %cst_77 = arith.constant 0.000000e+00 : f32
    %162 = vector.broadcast %cst_76 : f32 to vector<16x32xf32>
    %163 = vector.broadcast %cst_77 : f32 to vector<16x32xf32>
    %164 = arith.select %161, %162, %163 : vector<16x32xi1>, vector<16x32xf32>
    %cst_78 = arith.constant dense<0.000000e+00> : vector<16x64xf32>
    %165 = tpu.matmul %164, %147, %cst_78 {dimension_numbers = #tpu.dot_dimension_numbers<[1], [0], [0], [1], [0, 0, 1, 1], [], []>} : vector<16x32xf32>, vector<32x64xf32>, vector<16x64xf32> -> vector<16x64xf32>
    %c0_79 = arith.constant 0 : index
    %c0_80 = arith.constant 0 : index
    %c0_81 = arith.constant 0 : index
    %166 = vector.load %arg6[%c0_79, %c0_80, %c0_81] : memref<3x64x128xf32, #tpu.memory_space<vmem>>, vector<1x64x128xf32>
    %167 = vector.shape_cast %166 : vector<1x64x128xf32> to vector<64x128xf32>
    %cst_82 = arith.constant dense<0.000000e+00> : vector<16x128xf32>
    %168 = tpu.matmul %165, %167, %cst_82 {dimension_numbers = #tpu.dot_dimension_numbers<[1], [0], [0], [1], [0, 0, 1, 1], [], []>} : vector<16x64xf32>, vector<64x128xf32>, vector<16x128xf32> -> vector<16x128xf32>
    %169 = tpu.iota {dimensions = array<i32: 0>} : vector<16x32xi32>
    %170 = tpu.iota {dimensions = array<i32: 1>} : vector<16x32xi32>
    %c2_i32_83 = arith.constant 2 : i32
    %171 = vector.broadcast %c2_i32_83 : i32 to vector<16x32xi32>
    %172 = arith.muli %171, %169 : vector<16x32xi32>
    %c1_i32_84 = arith.constant 1 : i32
    %173 = vector.broadcast %c1_i32_84 : i32 to vector<16x32xi32>
    %174 = arith.subi %172, %173 : vector<16x32xi32>
    %c1_i32_85 = arith.constant 1 : i32
    %175 = vector.broadcast %c1_i32_85 : i32 to vector<16x32xi32>
    %176 = arith.addi %174, %175 : vector<16x32xi32>
    %177 = arith.cmpi eq, %170, %176 : vector<16x32xi32>
    %cst_86 = arith.constant 1.000000e+00 : f32
    %cst_87 = arith.constant 0.000000e+00 : f32
    %178 = vector.broadcast %cst_86 : f32 to vector<16x32xf32>
    %179 = vector.broadcast %cst_87 : f32 to vector<16x32xf32>
    %180 = arith.select %177, %178, %179 : vector<16x32xi1>, vector<16x32xf32>
    %cst_88 = arith.constant dense<0.000000e+00> : vector<16x64xf32>
    %181 = tpu.matmul %180, %147, %cst_88 {dimension_numbers = #tpu.dot_dimension_numbers<[1], [0], [0], [1], [0, 0, 1, 1], [], []>} : vector<16x32xf32>, vector<32x64xf32>, vector<16x64xf32> -> vector<16x64xf32>
    %c1_89 = arith.constant 1 : index
    %c0_90 = arith.constant 0 : index
    %c0_91 = arith.constant 0 : index
    %182 = vector.load %arg6[%c1_89, %c0_90, %c0_91] : memref<3x64x128xf32, #tpu.memory_space<vmem>>, vector<1x64x128xf32>
    %183 = vector.shape_cast %182 : vector<1x64x128xf32> to vector<64x128xf32>
    %cst_92 = arith.constant dense<0.000000e+00> : vector<16x128xf32>
    %184 = tpu.matmul %181, %183, %cst_92 {dimension_numbers = #tpu.dot_dimension_numbers<[1], [0], [0], [1], [0, 0, 1, 1], [], []>} : vector<16x64xf32>, vector<64x128xf32>, vector<16x128xf32> -> vector<16x128xf32>
    %185 = arith.addf %168, %184 : vector<16x128xf32>
    %186 = tpu.iota {dimensions = array<i32: 0>} : vector<16x32xi32>
    %187 = tpu.iota {dimensions = array<i32: 1>} : vector<16x32xi32>
    %c2_i32_93 = arith.constant 2 : i32
    %188 = vector.broadcast %c2_i32_93 : i32 to vector<16x32xi32>
    %189 = arith.muli %188, %186 : vector<16x32xi32>
    %c1_i32_94 = arith.constant 1 : i32
    %190 = vector.broadcast %c1_i32_94 : i32 to vector<16x32xi32>
    %191 = arith.subi %189, %190 : vector<16x32xi32>
    %c2_i32_95 = arith.constant 2 : i32
    %192 = vector.broadcast %c2_i32_95 : i32 to vector<16x32xi32>
    %193 = arith.addi %191, %192 : vector<16x32xi32>
    %194 = arith.cmpi eq, %187, %193 : vector<16x32xi32>
    %cst_96 = arith.constant 1.000000e+00 : f32
    %cst_97 = arith.constant 0.000000e+00 : f32
    %195 = vector.broadcast %cst_96 : f32 to vector<16x32xf32>
    %196 = vector.broadcast %cst_97 : f32 to vector<16x32xf32>
    %197 = arith.select %194, %195, %196 : vector<16x32xi1>, vector<16x32xf32>
    %cst_98 = arith.constant dense<0.000000e+00> : vector<16x64xf32>
    %198 = tpu.matmul %197, %147, %cst_98 {dimension_numbers = #tpu.dot_dimension_numbers<[1], [0], [0], [1], [0, 0, 1, 1], [], []>} : vector<16x32xf32>, vector<32x64xf32>, vector<16x64xf32> -> vector<16x64xf32>
    %c2_99 = arith.constant 2 : index
    %c0_100 = arith.constant 0 : index
    %c0_101 = arith.constant 0 : index
    %199 = vector.load %arg6[%c2_99, %c0_100, %c0_101] : memref<3x64x128xf32, #tpu.memory_space<vmem>>, vector<1x64x128xf32>
    %200 = vector.shape_cast %199 : vector<1x64x128xf32> to vector<64x128xf32>
    %cst_102 = arith.constant dense<0.000000e+00> : vector<16x128xf32>
    %201 = tpu.matmul %198, %200, %cst_102 {dimension_numbers = #tpu.dot_dimension_numbers<[1], [0], [0], [1], [0, 0, 1, 1], [], []>} : vector<16x64xf32>, vector<64x128xf32>, vector<16x128xf32> -> vector<16x128xf32>
    %202 = arith.addf %185, %201 : vector<16x128xf32>
    %cst_103 = arith.constant dense<0.000000e+00> : vector<128xf32>
    %203 = vector.multi_reduction <add>, %202, %cst_103 [0] : vector<16x128xf32> to vector<128xf32>
    %204 = vector.shape_cast %203 : vector<128xf32> to vector<1x128xf32>
    %cst_104 = arith.constant 1.600000e+01 : f32
    %205 = vector.broadcast %cst_104 : f32 to vector<1x128xf32>
    %206 = arith.divf %204, %205 : vector<1x128xf32>
    %207 = vector.broadcast %206 : vector<1x128xf32> to vector<16x128xf32>
    %208 = arith.subf %202, %207 : vector<16x128xf32>
    %209 = arith.mulf %208, %208 : vector<16x128xf32>
    %cst_105 = arith.constant dense<0.000000e+00> : vector<128xf32>
    %210 = vector.multi_reduction <add>, %209, %cst_105 [0] : vector<16x128xf32> to vector<128xf32>
    %211 = vector.shape_cast %210 : vector<128xf32> to vector<1x128xf32>
    %cst_106 = arith.constant 1.600000e+01 : f32
    %212 = vector.broadcast %cst_106 : f32 to vector<1x128xf32>
    %213 = arith.divf %211, %212 : vector<1x128xf32>
    %214 = vector.broadcast %206 : vector<1x128xf32> to vector<16x128xf32>
    %215 = arith.subf %202, %214 : vector<16x128xf32>
    %cst_107 = arith.constant 8.000000e-01 : f32
    %216 = vector.broadcast %cst_107 : f32 to vector<1x128xf32>
    %217 = arith.addf %213, %216 : vector<1x128xf32>
    %218 = math.rsqrt %217 : vector<1x128xf32>
    %219 = vector.broadcast %218 : vector<1x128xf32> to vector<16x128xf32>
    %220 = arith.mulf %215, %219 : vector<16x128xf32>
    %c0_108 = arith.constant 0 : index
    %c0_109 = arith.constant 0 : index
    %221 = vector.load %arg7[%c0_108, %c0_109] : memref<1x128xf32, #tpu.memory_space<vmem>>, vector<1x128xf32>
    %222 = vector.broadcast %221 : vector<1x128xf32> to vector<16x128xf32>
    %223 = arith.mulf %220, %222 : vector<16x128xf32>
    %c0_110 = arith.constant 0 : index
    %c0_111 = arith.constant 0 : index
    %224 = vector.load %arg8[%c0_110, %c0_111] : memref<1x128xf32, #tpu.memory_space<vmem>>, vector<1x128xf32>
    %225 = vector.broadcast %224 : vector<1x128xf32> to vector<16x128xf32>
    %226 = arith.addf %223, %225 : vector<16x128xf32>
    %cst_112 = arith.constant 0.000000e+00 : f32
    %227 = vector.broadcast %cst_112 : f32 to vector<16x128xf32>
    %228 = arith.cmpf ogt, %226, %227 : vector<16x128xf32>
    %cst_113 = arith.constant 2.000000e-01 : f32
    %229 = vector.broadcast %cst_113 : f32 to vector<16x128xf32>
    %230 = arith.mulf %229, %226 : vector<16x128xf32>
    %231 = arith.select %228, %226, %230 : vector<16x128xi1>, vector<16x128xf32>
    %232 = tpu.iota {dimensions = array<i32: 0>} : vector<8x16xi32>
    %233 = tpu.iota {dimensions = array<i32: 1>} : vector<8x16xi32>
    %c2_i32_114 = arith.constant 2 : i32
    %234 = vector.broadcast %c2_i32_114 : i32 to vector<8x16xi32>
    %235 = arith.muli %234, %232 : vector<8x16xi32>
    %c1_i32_115 = arith.constant 1 : i32
    %236 = vector.broadcast %c1_i32_115 : i32 to vector<8x16xi32>
    %237 = arith.subi %235, %236 : vector<8x16xi32>
    %c0_i32_116 = arith.constant 0 : i32
    %238 = vector.broadcast %c0_i32_116 : i32 to vector<8x16xi32>
    %239 = arith.addi %237, %238 : vector<8x16xi32>
    %240 = arith.cmpi eq, %233, %239 : vector<8x16xi32>
    %c3_i32 = arith.constant 3 : i32
    %241 = vector.broadcast %c3_i32 : i32 to vector<8x16xi32>
    %242 = arith.andi %232, %241 : vector<8x16xi32>
    %c0_i32_117 = arith.constant 0 : i32
    %243 = vector.broadcast %c0_i32_117 : i32 to vector<8x16xi32>
    %244 = arith.cmpi ne, %242, %243 : vector<8x16xi32>
    %245 = arith.andi %240, %244 : vector<8x16xi1>
    %cst_118 = arith.constant 1.000000e+00 : f32
    %cst_119 = arith.constant 0.000000e+00 : f32
    %246 = vector.broadcast %cst_118 : f32 to vector<8x16xf32>
    %247 = vector.broadcast %cst_119 : f32 to vector<8x16xf32>
    %248 = arith.select %245, %246, %247 : vector<8x16xi1>, vector<8x16xf32>
    %cst_120 = arith.constant dense<0.000000e+00> : vector<8x128xf32>
    %249 = tpu.matmul %248, %231, %cst_120 {dimension_numbers = #tpu.dot_dimension_numbers<[1], [0], [0], [1], [0, 0, 1, 1], [], []>} : vector<8x16xf32>, vector<16x128xf32>, vector<8x128xf32> -> vector<8x128xf32>
    %c0_121 = arith.constant 0 : index
    %c0_122 = arith.constant 0 : index
    %c0_123 = arith.constant 0 : index
    %250 = vector.load %arg9[%c0_121, %c0_122, %c0_123] : memref<3x128x256xf32, #tpu.memory_space<vmem>>, vector<1x128x256xf32>
    %251 = vector.shape_cast %250 : vector<1x128x256xf32> to vector<128x256xf32>
    %cst_124 = arith.constant dense<0.000000e+00> : vector<8x256xf32>
    %252 = tpu.matmul %249, %251, %cst_124 {dimension_numbers = #tpu.dot_dimension_numbers<[1], [0], [0], [1], [0, 0, 1, 1], [], []>} : vector<8x128xf32>, vector<128x256xf32>, vector<8x256xf32> -> vector<8x256xf32>
    %253 = tpu.iota {dimensions = array<i32: 0>} : vector<8x16xi32>
    %254 = tpu.iota {dimensions = array<i32: 1>} : vector<8x16xi32>
    %c2_i32_125 = arith.constant 2 : i32
    %255 = vector.broadcast %c2_i32_125 : i32 to vector<8x16xi32>
    %256 = arith.muli %255, %253 : vector<8x16xi32>
    %c1_i32_126 = arith.constant 1 : i32
    %257 = vector.broadcast %c1_i32_126 : i32 to vector<8x16xi32>
    %258 = arith.subi %256, %257 : vector<8x16xi32>
    %c1_i32_127 = arith.constant 1 : i32
    %259 = vector.broadcast %c1_i32_127 : i32 to vector<8x16xi32>
    %260 = arith.addi %258, %259 : vector<8x16xi32>
    %261 = arith.cmpi eq, %254, %260 : vector<8x16xi32>
    %cst_128 = arith.constant 1.000000e+00 : f32
    %cst_129 = arith.constant 0.000000e+00 : f32
    %262 = vector.broadcast %cst_128 : f32 to vector<8x16xf32>
    %263 = vector.broadcast %cst_129 : f32 to vector<8x16xf32>
    %264 = arith.select %261, %262, %263 : vector<8x16xi1>, vector<8x16xf32>
    %cst_130 = arith.constant dense<0.000000e+00> : vector<8x128xf32>
    %265 = tpu.matmul %264, %231, %cst_130 {dimension_numbers = #tpu.dot_dimension_numbers<[1], [0], [0], [1], [0, 0, 1, 1], [], []>} : vector<8x16xf32>, vector<16x128xf32>, vector<8x128xf32> -> vector<8x128xf32>
    %c1_131 = arith.constant 1 : index
    %c0_132 = arith.constant 0 : index
    %c0_133 = arith.constant 0 : index
    %266 = vector.load %arg9[%c1_131, %c0_132, %c0_133] : memref<3x128x256xf32, #tpu.memory_space<vmem>>, vector<1x128x256xf32>
    %267 = vector.shape_cast %266 : vector<1x128x256xf32> to vector<128x256xf32>
    %cst_134 = arith.constant dense<0.000000e+00> : vector<8x256xf32>
    %268 = tpu.matmul %265, %267, %cst_134 {dimension_numbers = #tpu.dot_dimension_numbers<[1], [0], [0], [1], [0, 0, 1, 1], [], []>} : vector<8x128xf32>, vector<128x256xf32>, vector<8x256xf32> -> vector<8x256xf32>
    %269 = arith.addf %252, %268 : vector<8x256xf32>
    %270 = tpu.iota {dimensions = array<i32: 0>} : vector<8x16xi32>
    %271 = tpu.iota {dimensions = array<i32: 1>} : vector<8x16xi32>
    %c2_i32_135 = arith.constant 2 : i32
    %272 = vector.broadcast %c2_i32_135 : i32 to vector<8x16xi32>
    %273 = arith.muli %272, %270 : vector<8x16xi32>
    %c1_i32_136 = arith.constant 1 : i32
    %274 = vector.broadcast %c1_i32_136 : i32 to vector<8x16xi32>
    %275 = arith.subi %273, %274 : vector<8x16xi32>
    %c2_i32_137 = arith.constant 2 : i32
    %276 = vector.broadcast %c2_i32_137 : i32 to vector<8x16xi32>
    %277 = arith.addi %275, %276 : vector<8x16xi32>
    %278 = arith.cmpi eq, %271, %277 : vector<8x16xi32>
    %cst_138 = arith.constant 1.000000e+00 : f32
    %cst_139 = arith.constant 0.000000e+00 : f32
    %279 = vector.broadcast %cst_138 : f32 to vector<8x16xf32>
    %280 = vector.broadcast %cst_139 : f32 to vector<8x16xf32>
    %281 = arith.select %278, %279, %280 : vector<8x16xi1>, vector<8x16xf32>
    %cst_140 = arith.constant dense<0.000000e+00> : vector<8x128xf32>
    %282 = tpu.matmul %281, %231, %cst_140 {dimension_numbers = #tpu.dot_dimension_numbers<[1], [0], [0], [1], [0, 0, 1, 1], [], []>} : vector<8x16xf32>, vector<16x128xf32>, vector<8x128xf32> -> vector<8x128xf32>
    %c2_141 = arith.constant 2 : index
    %c0_142 = arith.constant 0 : index
    %c0_143 = arith.constant 0 : index
    %283 = vector.load %arg9[%c2_141, %c0_142, %c0_143] : memref<3x128x256xf32, #tpu.memory_space<vmem>>, vector<1x128x256xf32>
    %284 = vector.shape_cast %283 : vector<1x128x256xf32> to vector<128x256xf32>
    %cst_144 = arith.constant dense<0.000000e+00> : vector<8x256xf32>
    %285 = tpu.matmul %282, %284, %cst_144 {dimension_numbers = #tpu.dot_dimension_numbers<[1], [0], [0], [1], [0, 0, 1, 1], [], []>} : vector<8x128xf32>, vector<128x256xf32>, vector<8x256xf32> -> vector<8x256xf32>
    %286 = arith.addf %269, %285 : vector<8x256xf32>
    %cst_145 = arith.constant dense<0.000000e+00> : vector<256xf32>
    %287 = vector.multi_reduction <add>, %286, %cst_145 [0] : vector<8x256xf32> to vector<256xf32>
    %288 = vector.shape_cast %287 : vector<256xf32> to vector<1x256xf32>
    %cst_146 = arith.constant 8.000000e+00 : f32
    %289 = vector.broadcast %cst_146 : f32 to vector<1x256xf32>
    %290 = arith.divf %288, %289 : vector<1x256xf32>
    %291 = vector.broadcast %290 : vector<1x256xf32> to vector<8x256xf32>
    %292 = arith.subf %286, %291 : vector<8x256xf32>
    %293 = arith.mulf %292, %292 : vector<8x256xf32>
    %cst_147 = arith.constant dense<0.000000e+00> : vector<256xf32>
    %294 = vector.multi_reduction <add>, %293, %cst_147 [0] : vector<8x256xf32> to vector<256xf32>
    %295 = vector.shape_cast %294 : vector<256xf32> to vector<1x256xf32>
    %cst_148 = arith.constant 8.000000e+00 : f32
    %296 = vector.broadcast %cst_148 : f32 to vector<1x256xf32>
    %297 = arith.divf %295, %296 : vector<1x256xf32>
    %298 = vector.broadcast %290 : vector<1x256xf32> to vector<8x256xf32>
    %299 = arith.subf %286, %298 : vector<8x256xf32>
    %cst_149 = arith.constant 8.000000e-01 : f32
    %300 = vector.broadcast %cst_149 : f32 to vector<1x256xf32>
    %301 = arith.addf %297, %300 : vector<1x256xf32>
    %302 = math.rsqrt %301 : vector<1x256xf32>
    %303 = vector.broadcast %302 : vector<1x256xf32> to vector<8x256xf32>
    %304 = arith.mulf %299, %303 : vector<8x256xf32>
    %c0_150 = arith.constant 0 : index
    %c0_151 = arith.constant 0 : index
    %305 = vector.load %arg10[%c0_150, %c0_151] : memref<1x256xf32, #tpu.memory_space<vmem>>, vector<1x256xf32>
    %306 = vector.broadcast %305 : vector<1x256xf32> to vector<8x256xf32>
    %307 = arith.mulf %304, %306 : vector<8x256xf32>
    %c0_152 = arith.constant 0 : index
    %c0_153 = arith.constant 0 : index
    %308 = vector.load %arg11[%c0_152, %c0_153] : memref<1x256xf32, #tpu.memory_space<vmem>>, vector<1x256xf32>
    %309 = vector.broadcast %308 : vector<1x256xf32> to vector<8x256xf32>
    %310 = arith.addf %307, %309 : vector<8x256xf32>
    %cst_154 = arith.constant 0.000000e+00 : f32
    %311 = vector.broadcast %cst_154 : f32 to vector<8x256xf32>
    %312 = arith.cmpf ogt, %310, %311 : vector<8x256xf32>
    %cst_155 = arith.constant 2.000000e-01 : f32
    %313 = vector.broadcast %cst_155 : f32 to vector<8x256xf32>
    %314 = arith.mulf %313, %310 : vector<8x256xf32>
    %315 = arith.select %312, %310, %314 : vector<8x256xi1>, vector<8x256xf32>
    %316 = tpu.iota {dimensions = array<i32: 0>} : vector<4x8xi32>
    %317 = tpu.iota {dimensions = array<i32: 1>} : vector<4x8xi32>
    %c2_i32_156 = arith.constant 2 : i32
    %318 = vector.broadcast %c2_i32_156 : i32 to vector<4x8xi32>
    %319 = arith.muli %318, %316 : vector<4x8xi32>
    %c1_i32_157 = arith.constant 1 : i32
    %320 = vector.broadcast %c1_i32_157 : i32 to vector<4x8xi32>
    %321 = arith.subi %319, %320 : vector<4x8xi32>
    %c0_i32_158 = arith.constant 0 : i32
    %322 = vector.broadcast %c0_i32_158 : i32 to vector<4x8xi32>
    %323 = arith.addi %321, %322 : vector<4x8xi32>
    %324 = arith.cmpi eq, %317, %323 : vector<4x8xi32>
    %c1_i32_159 = arith.constant 1 : i32
    %325 = vector.broadcast %c1_i32_159 : i32 to vector<4x8xi32>
    %326 = arith.andi %316, %325 : vector<4x8xi32>
    %c0_i32_160 = arith.constant 0 : i32
    %327 = vector.broadcast %c0_i32_160 : i32 to vector<4x8xi32>
    %328 = arith.cmpi ne, %326, %327 : vector<4x8xi32>
    %329 = arith.andi %324, %328 : vector<4x8xi1>
    %cst_161 = arith.constant 1.000000e+00 : f32
    %cst_162 = arith.constant 0.000000e+00 : f32
    %330 = vector.broadcast %cst_161 : f32 to vector<4x8xf32>
    %331 = vector.broadcast %cst_162 : f32 to vector<4x8xf32>
    %332 = arith.select %329, %330, %331 : vector<4x8xi1>, vector<4x8xf32>
    %cst_163 = arith.constant dense<0.000000e+00> : vector<4x256xf32>
    %333 = tpu.matmul %332, %315, %cst_163 {dimension_numbers = #tpu.dot_dimension_numbers<[1], [0], [0], [1], [0, 0, 1, 1], [], []>} : vector<4x8xf32>, vector<8x256xf32>, vector<4x256xf32> -> vector<4x256xf32>
    %c0_164 = arith.constant 0 : index
    %c0_165 = arith.constant 0 : index
    %c0_166 = arith.constant 0 : index
    %334 = vector.load %arg12[%c0_164, %c0_165, %c0_166] : memref<3x256x512xf32, #tpu.memory_space<vmem>>, vector<1x256x512xf32>
    %335 = vector.shape_cast %334 : vector<1x256x512xf32> to vector<256x512xf32>
    %cst_167 = arith.constant dense<0.000000e+00> : vector<4x512xf32>
    %336 = tpu.matmul %333, %335, %cst_167 {dimension_numbers = #tpu.dot_dimension_numbers<[1], [0], [0], [1], [0, 0, 1, 1], [], []>} : vector<4x256xf32>, vector<256x512xf32>, vector<4x512xf32> -> vector<4x512xf32>
    %337 = tpu.iota {dimensions = array<i32: 0>} : vector<4x8xi32>
    %338 = tpu.iota {dimensions = array<i32: 1>} : vector<4x8xi32>
    %c2_i32_168 = arith.constant 2 : i32
    %339 = vector.broadcast %c2_i32_168 : i32 to vector<4x8xi32>
    %340 = arith.muli %339, %337 : vector<4x8xi32>
    %c1_i32_169 = arith.constant 1 : i32
    %341 = vector.broadcast %c1_i32_169 : i32 to vector<4x8xi32>
    %342 = arith.subi %340, %341 : vector<4x8xi32>
    %c1_i32_170 = arith.constant 1 : i32
    %343 = vector.broadcast %c1_i32_170 : i32 to vector<4x8xi32>
    %344 = arith.addi %342, %343 : vector<4x8xi32>
    %345 = arith.cmpi eq, %338, %344 : vector<4x8xi32>
    %cst_171 = arith.constant 1.000000e+00 : f32
    %cst_172 = arith.constant 0.000000e+00 : f32
    %346 = vector.broadcast %cst_171 : f32 to vector<4x8xf32>
    %347 = vector.broadcast %cst_172 : f32 to vector<4x8xf32>
    %348 = arith.select %345, %346, %347 : vector<4x8xi1>, vector<4x8xf32>
    %cst_173 = arith.constant dense<0.000000e+00> : vector<4x256xf32>
    %349 = tpu.matmul %348, %315, %cst_173 {dimension_numbers = #tpu.dot_dimension_numbers<[1], [0], [0], [1], [0, 0, 1, 1], [], []>} : vector<4x8xf32>, vector<8x256xf32>, vector<4x256xf32> -> vector<4x256xf32>
    %c1_174 = arith.constant 1 : index
    %c0_175 = arith.constant 0 : index
    %c0_176 = arith.constant 0 : index
    %350 = vector.load %arg12[%c1_174, %c0_175, %c0_176] : memref<3x256x512xf32, #tpu.memory_space<vmem>>, vector<1x256x512xf32>
    %351 = vector.shape_cast %350 : vector<1x256x512xf32> to vector<256x512xf32>
    %cst_177 = arith.constant dense<0.000000e+00> : vector<4x512xf32>
    %352 = tpu.matmul %349, %351, %cst_177 {dimension_numbers = #tpu.dot_dimension_numbers<[1], [0], [0], [1], [0, 0, 1, 1], [], []>} : vector<4x256xf32>, vector<256x512xf32>, vector<4x512xf32> -> vector<4x512xf32>
    %353 = arith.addf %336, %352 : vector<4x512xf32>
    %354 = tpu.iota {dimensions = array<i32: 0>} : vector<4x8xi32>
    %355 = tpu.iota {dimensions = array<i32: 1>} : vector<4x8xi32>
    %c2_i32_178 = arith.constant 2 : i32
    %356 = vector.broadcast %c2_i32_178 : i32 to vector<4x8xi32>
    %357 = arith.muli %356, %354 : vector<4x8xi32>
    %c1_i32_179 = arith.constant 1 : i32
    %358 = vector.broadcast %c1_i32_179 : i32 to vector<4x8xi32>
    %359 = arith.subi %357, %358 : vector<4x8xi32>
    %c2_i32_180 = arith.constant 2 : i32
    %360 = vector.broadcast %c2_i32_180 : i32 to vector<4x8xi32>
    %361 = arith.addi %359, %360 : vector<4x8xi32>
    %362 = arith.cmpi eq, %355, %361 : vector<4x8xi32>
    %cst_181 = arith.constant 1.000000e+00 : f32
    %cst_182 = arith.constant 0.000000e+00 : f32
    %363 = vector.broadcast %cst_181 : f32 to vector<4x8xf32>
    %364 = vector.broadcast %cst_182 : f32 to vector<4x8xf32>
    %365 = arith.select %362, %363, %364 : vector<4x8xi1>, vector<4x8xf32>
    %cst_183 = arith.constant dense<0.000000e+00> : vector<4x256xf32>
    %366 = tpu.matmul %365, %315, %cst_183 {dimension_numbers = #tpu.dot_dimension_numbers<[1], [0], [0], [1], [0, 0, 1, 1], [], []>} : vector<4x8xf32>, vector<8x256xf32>, vector<4x256xf32> -> vector<4x256xf32>
    %c2_184 = arith.constant 2 : index
    %c0_185 = arith.constant 0 : index
    %c0_186 = arith.constant 0 : index
    %367 = vector.load %arg12[%c2_184, %c0_185, %c0_186] : memref<3x256x512xf32, #tpu.memory_space<vmem>>, vector<1x256x512xf32>
    %368 = vector.shape_cast %367 : vector<1x256x512xf32> to vector<256x512xf32>
    %cst_187 = arith.constant dense<0.000000e+00> : vector<4x512xf32>
    %369 = tpu.matmul %366, %368, %cst_187 {dimension_numbers = #tpu.dot_dimension_numbers<[1], [0], [0], [1], [0, 0, 1, 1], [], []>} : vector<4x256xf32>, vector<256x512xf32>, vector<4x512xf32> -> vector<4x512xf32>
    %370 = arith.addf %353, %369 : vector<4x512xf32>
    %cst_188 = arith.constant dense<0.000000e+00> : vector<512xf32>
    %371 = vector.multi_reduction <add>, %370, %cst_188 [0] : vector<4x512xf32> to vector<512xf32>
    %372 = vector.shape_cast %371 : vector<512xf32> to vector<1x512xf32>
    %cst_189 = arith.constant 4.000000e+00 : f32
    %373 = vector.broadcast %cst_189 : f32 to vector<1x512xf32>
    %374 = arith.divf %372, %373 : vector<1x512xf32>
    %375 = vector.broadcast %374 : vector<1x512xf32> to vector<4x512xf32>
    %376 = arith.subf %370, %375 : vector<4x512xf32>
    %377 = arith.mulf %376, %376 : vector<4x512xf32>
    %cst_190 = arith.constant dense<0.000000e+00> : vector<512xf32>
    %378 = vector.multi_reduction <add>, %377, %cst_190 [0] : vector<4x512xf32> to vector<512xf32>
    %379 = vector.shape_cast %378 : vector<512xf32> to vector<1x512xf32>
    %cst_191 = arith.constant 4.000000e+00 : f32
    %380 = vector.broadcast %cst_191 : f32 to vector<1x512xf32>
    %381 = arith.divf %379, %380 : vector<1x512xf32>
    %382 = vector.broadcast %374 : vector<1x512xf32> to vector<4x512xf32>
    %383 = arith.subf %370, %382 : vector<4x512xf32>
    %cst_192 = arith.constant 8.000000e-01 : f32
    %384 = vector.broadcast %cst_192 : f32 to vector<1x512xf32>
    %385 = arith.addf %381, %384 : vector<1x512xf32>
    %386 = math.rsqrt %385 : vector<1x512xf32>
    %387 = vector.broadcast %386 : vector<1x512xf32> to vector<4x512xf32>
    %388 = arith.mulf %383, %387 : vector<4x512xf32>
    %c0_193 = arith.constant 0 : index
    %c0_194 = arith.constant 0 : index
    %389 = vector.load %arg13[%c0_193, %c0_194] : memref<1x512xf32, #tpu.memory_space<vmem>>, vector<1x512xf32>
    %390 = vector.broadcast %389 : vector<1x512xf32> to vector<4x512xf32>
    %391 = arith.mulf %388, %390 : vector<4x512xf32>
    %c0_195 = arith.constant 0 : index
    %c0_196 = arith.constant 0 : index
    %392 = vector.load %arg14[%c0_195, %c0_196] : memref<1x512xf32, #tpu.memory_space<vmem>>, vector<1x512xf32>
    %393 = vector.broadcast %392 : vector<1x512xf32> to vector<4x512xf32>
    %394 = arith.addf %391, %393 : vector<4x512xf32>
    %cst_197 = arith.constant 0.000000e+00 : f32
    %395 = vector.broadcast %cst_197 : f32 to vector<4x512xf32>
    %396 = arith.cmpf ogt, %394, %395 : vector<4x512xf32>
    %cst_198 = arith.constant 2.000000e-01 : f32
    %397 = vector.broadcast %cst_198 : f32 to vector<4x512xf32>
    %398 = arith.mulf %397, %394 : vector<4x512xf32>
    %399 = arith.select %396, %394, %398 : vector<4x512xi1>, vector<4x512xf32>
    %400 = tpu.iota {dimensions = array<i32: 0>} : vector<2x4xi32>
    %401 = tpu.iota {dimensions = array<i32: 1>} : vector<2x4xi32>
    %c2_i32_199 = arith.constant 2 : i32
    %402 = vector.broadcast %c2_i32_199 : i32 to vector<2x4xi32>
    %403 = arith.muli %402, %400 : vector<2x4xi32>
    %c1_i32_200 = arith.constant 1 : i32
    %404 = vector.broadcast %c1_i32_200 : i32 to vector<2x4xi32>
    %405 = arith.subi %403, %404 : vector<2x4xi32>
    %c0_i32_201 = arith.constant 0 : i32
    %406 = vector.broadcast %c0_i32_201 : i32 to vector<2x4xi32>
    %407 = arith.addi %405, %406 : vector<2x4xi32>
    %408 = arith.cmpi eq, %401, %407 : vector<2x4xi32>
    %c0_i32_202 = arith.constant 0 : i32
    %409 = vector.broadcast %c0_i32_202 : i32 to vector<2x4xi32>
    %410 = arith.andi %400, %409 : vector<2x4xi32>
    %c0_i32_203 = arith.constant 0 : i32
    %411 = vector.broadcast %c0_i32_203 : i32 to vector<2x4xi32>
    %412 = arith.cmpi ne, %410, %411 : vector<2x4xi32>
    %413 = arith.andi %408, %412 : vector<2x4xi1>
    %cst_204 = arith.constant 1.000000e+00 : f32
    %cst_205 = arith.constant 0.000000e+00 : f32
    %414 = vector.broadcast %cst_204 : f32 to vector<2x4xf32>
    %415 = vector.broadcast %cst_205 : f32 to vector<2x4xf32>
    %416 = arith.select %413, %414, %415 : vector<2x4xi1>, vector<2x4xf32>
    %cst_206 = arith.constant dense<0.000000e+00> : vector<2x512xf32>
    %417 = tpu.matmul %416, %399, %cst_206 {dimension_numbers = #tpu.dot_dimension_numbers<[1], [0], [0], [1], [0, 0, 1, 1], [], []>} : vector<2x4xf32>, vector<4x512xf32>, vector<2x512xf32> -> vector<2x512xf32>
    %c0_207 = arith.constant 0 : index
    %c0_208 = arith.constant 0 : index
    %418 = vector.load %arg15[%c0_207, %c0_208] : memref<3x512xf32, #tpu.memory_space<vmem>>, vector<1x512xf32>
    %419 = vector.broadcast %418 : vector<1x512xf32> to vector<2x512xf32>
    %420 = arith.mulf %417, %419 : vector<2x512xf32>
    %421 = tpu.iota {dimensions = array<i32: 0>} : vector<2x4xi32>
    %422 = tpu.iota {dimensions = array<i32: 1>} : vector<2x4xi32>
    %c2_i32_209 = arith.constant 2 : i32
    %423 = vector.broadcast %c2_i32_209 : i32 to vector<2x4xi32>
    %424 = arith.muli %423, %421 : vector<2x4xi32>
    %c1_i32_210 = arith.constant 1 : i32
    %425 = vector.broadcast %c1_i32_210 : i32 to vector<2x4xi32>
    %426 = arith.subi %424, %425 : vector<2x4xi32>
    %c1_i32_211 = arith.constant 1 : i32
    %427 = vector.broadcast %c1_i32_211 : i32 to vector<2x4xi32>
    %428 = arith.addi %426, %427 : vector<2x4xi32>
    %429 = arith.cmpi eq, %422, %428 : vector<2x4xi32>
    %cst_212 = arith.constant 1.000000e+00 : f32
    %cst_213 = arith.constant 0.000000e+00 : f32
    %430 = vector.broadcast %cst_212 : f32 to vector<2x4xf32>
    %431 = vector.broadcast %cst_213 : f32 to vector<2x4xf32>
    %432 = arith.select %429, %430, %431 : vector<2x4xi1>, vector<2x4xf32>
    %cst_214 = arith.constant dense<0.000000e+00> : vector<2x512xf32>
    %433 = tpu.matmul %432, %399, %cst_214 {dimension_numbers = #tpu.dot_dimension_numbers<[1], [0], [0], [1], [0, 0, 1, 1], [], []>} : vector<2x4xf32>, vector<4x512xf32>, vector<2x512xf32> -> vector<2x512xf32>
    %c1_215 = arith.constant 1 : index
    %c0_216 = arith.constant 0 : index
    %434 = vector.load %arg15[%c1_215, %c0_216] : memref<3x512xf32, #tpu.memory_space<vmem>>, vector<1x512xf32>
    %435 = vector.broadcast %434 : vector<1x512xf32> to vector<2x512xf32>
    %436 = arith.mulf %433, %435 : vector<2x512xf32>
    %437 = arith.addf %420, %436 : vector<2x512xf32>
    %438 = tpu.iota {dimensions = array<i32: 0>} : vector<2x4xi32>
    %439 = tpu.iota {dimensions = array<i32: 1>} : vector<2x4xi32>
    %c2_i32_217 = arith.constant 2 : i32
    %440 = vector.broadcast %c2_i32_217 : i32 to vector<2x4xi32>
    %441 = arith.muli %440, %438 : vector<2x4xi32>
    %c1_i32_218 = arith.constant 1 : i32
    %442 = vector.broadcast %c1_i32_218 : i32 to vector<2x4xi32>
    %443 = arith.subi %441, %442 : vector<2x4xi32>
    %c2_i32_219 = arith.constant 2 : i32
    %444 = vector.broadcast %c2_i32_219 : i32 to vector<2x4xi32>
    %445 = arith.addi %443, %444 : vector<2x4xi32>
    %446 = arith.cmpi eq, %439, %445 : vector<2x4xi32>
    %cst_220 = arith.constant 1.000000e+00 : f32
    %cst_221 = arith.constant 0.000000e+00 : f32
    %447 = vector.broadcast %cst_220 : f32 to vector<2x4xf32>
    %448 = vector.broadcast %cst_221 : f32 to vector<2x4xf32>
    %449 = arith.select %446, %447, %448 : vector<2x4xi1>, vector<2x4xf32>
    %cst_222 = arith.constant dense<0.000000e+00> : vector<2x512xf32>
    %450 = tpu.matmul %449, %399, %cst_222 {dimension_numbers = #tpu.dot_dimension_numbers<[1], [0], [0], [1], [0, 0, 1, 1], [], []>} : vector<2x4xf32>, vector<4x512xf32>, vector<2x512xf32> -> vector<2x512xf32>
    %c2_223 = arith.constant 2 : index
    %c0_224 = arith.constant 0 : index
    %451 = vector.load %arg15[%c2_223, %c0_224] : memref<3x512xf32, #tpu.memory_space<vmem>>, vector<1x512xf32>
    %452 = vector.broadcast %451 : vector<1x512xf32> to vector<2x512xf32>
    %453 = arith.mulf %450, %452 : vector<2x512xf32>
    %454 = arith.addf %437, %453 : vector<2x512xf32>
    %cst_225 = arith.constant dense<0.000000e+00> : vector<2xf32>
    %455 = vector.multi_reduction <add>, %454, %cst_225 [1] : vector<2x512xf32> to vector<2xf32>
    %456 = vector.shape_cast %455 : vector<2xf32> to vector<2x1xf32>
    %c0_226 = arith.constant 0 : index
    %457 = memref.load %arg16[%c0_226] : memref<1xf32, #tpu.memory_space<smem>>
    %458 = vector.broadcast %457 : f32 to vector<2x1xf32>
    %459 = arith.addf %456, %458 : vector<2x1xf32>
    %cst_227 = arith.constant 0.000000e+00 : f32
    %460 = vector.broadcast %cst_227 : f32 to vector<2x1xf32>
    %461 = arith.cmpf ogt, %459, %460 : vector<2x1xf32>
    %cst_228 = arith.constant 2.000000e-01 : f32
    %462 = vector.broadcast %cst_228 : f32 to vector<2x1xf32>
    %463 = arith.mulf %462, %459 : vector<2x1xf32>
    %464 = arith.select %461, %459, %463 : vector<2x1xi1>, vector<2x1xf32>
    %c0_229 = arith.constant 0 : index
    %465 = memref.load %arg17[%c0_229] : memref<1xf32, #tpu.memory_space<smem>>
    %466 = vector.broadcast %465 : f32 to vector<2x1xf32>
    %467 = arith.mulf %464, %466 : vector<2x1xf32>
    %c0_230 = arith.constant 0 : index
    %468 = memref.load %arg18[%c0_230] : memref<1xf32, #tpu.memory_space<smem>>
    %469 = vector.broadcast %468 : f32 to vector<2x1xf32>
    %470 = arith.addf %467, %469 : vector<2x1xf32>
    %c0_231 = arith.constant 0 : index
    %c0_232 = arith.constant 0 : index
    %471 = vector.load %arg19[%c0_231, %c0_232] : memref<2x1xf32, #tpu.memory_space<vmem>>, vector<2x1xf32>
    tpu.vector_store %arg19[%c0_231, %c0_232], %470 {strides = array<i32>} : memref<2x1xf32, #tpu.memory_space<vmem>>, vector<2x1xf32>,
    return
  }
}

</mosaic_0001>

<bundles_post_ra>
// kernel: discriminator_forward.1
= control target key start
LH: loop header
LB: loop body
LE: loop exit
PB: predicated region body
PF: predicated region fallthrough
CT: control target
= control target key end

     0   :  { %s7560_s0 = inlined_call_operand.vmem [shape: f32[128,4], index: 0, kind: input, shape index: {}]   ;;  %s7561_s1 = inlined_call_operand.hbm [shape: f32[3,4,32], index: 1, kind: input, shape index: {}]   ;;  %s7562_s2 = inlined_call_operand.hbm [shape: f32[1,32], index: 2, kind: input, shape index: {}]   ;;  %s7563_s3 = inlined_call_operand.hbm [shape: f32[3,32,64], index: 3, kind: input, shape index: {}]   ;;  %s7564_s4 = inlined_call_operand.hbm [shape: f32[1,64], index: 4, kind: input, shape index: {}]   ;;  %s7565_s5 = inlined_call_operand.hbm [shape: f32[1,64], index: 5, kind: input, shape index: {}]   ;;  %s7566_s6 = inlined_call_operand.hbm [shape: f32[3,64,128], index: 6, kind: input, shape index: {}]   ;;  %s7567_s7 = inlined_call_operand.hbm [shape: f32[1,128], index: 7, kind: input, shape index: {}]   ;;  %s7568_s8 = inlined_call_operand.hbm [shape: f32[1,128], index: 8, kind: input, shape index: {}]   ;;  %s7569_s9 = inlined_call_operand.hbm [shape: f32[3,128,256], index: 9, kind: input, shape index: {}]   ;;  %s7570_s10 = inlined_call_operand.hbm [shape: f32[1,256], index: 10, kind: input, shape index: {}]   ;;  %s7571_s11 = inlined_call_operand.hbm [shape: f32[1,256], index: 11, kind: input, shape index: {}]   ;;  %s7572_s12 = inlined_call_operand.hbm [shape: f32[3,256,512], index: 12, kind: input, shape index: {}]   ;;  %s7573_s13 = inlined_call_operand.hbm [shape: f32[1,512], index: 13, kind: input, shape index: {}]   ;;  %s7574_s14 = inlined_call_operand.hbm [shape: f32[1,512], index: 14, kind: input, shape index: {}]   ;;  %s7575_s15 = inlined_call_operand.hbm [shape: f32[3,512], index: 15, kind: input, shape index: {}]   ;;  %s7576_s16 = inlined_call_operand.<no memory space> [shape: f32[1], index: 16, kind: input, shape index: {}]   ;;  %s7577_s17 = inlined_call_operand.<no memory space> [shape: f32[1], index: 17, kind: input, shape index: {}]   ;;  %s7578_s18 = inlined_call_operand.<no memory space> [shape: f32[1], index: 18, kind: input, shape index: {}]   ;;  %s7579_s19 = inlined_call_operand.vmem [shape: f32[2,1], index: 19, kind: output, shape index: {}]  }
   0x1   :  { %7586 = sst [smem:[#allocation36_spill]] %s7560_s0 }
   0x2   :  { %7587 = sst [smem:[#allocation37_spill]] %s7561_s1 }
   0x3   :  { %7588 = sst [smem:[#allocation38_spill]] %s7562_s2 }
   0x4   :  { %7589 = sst [smem:[#allocation39_spill]] %s7563_s3 }
   0x5   :  { %27 = vsyncpa [#allocation6], 0 }
   0x6   :  { %28 = vsyncpa [#allocation8], 0 }
   0x7   :  { %29 = vsyncpa [#allocation11], 0 }
   0x8   :  { %30 = vsyncpa [#allocation14], 0 }
   0x9   :  { %31 = vsyncpa [#allocation17], 0 }
   0xa   :  { %32 = vsyncpa [#allocation20], 0 }
   0xb   :  { %33 = vsyncpa [#allocation23], 0 }
   0xc   :  { %34 = vsyncpa [#allocation26], 0  ;;  %s6654_s0 = smov [#allocation7]   ;;  %s6655_s20 = smov [#allocation10]  }
   0xd   :  { %s55_s30 = sshll.u32 %s6654_s0, 4  ;;  %s77_s21 = sshll.u32 %s6655_s20, 4  ;;  %s56_s30 = int_to_ptr.vmem [resolvable:$true] %s55_s30  ;;  %s78_s21 = int_to_ptr.vmem [resolvable:$true] %s77_s21 }
   0xe   :  { %s7590_s2 = sld [smem:[#allocation38_spill]] }
  0x14   :  { %s6308_s23 = scalar_lea.hbm %s7590_s2, 16 }
  0x15   :  { %p6309_p0 = scmp.ne.s32.totalorder %s7590_s2, %s6308_s23  ;;  %p6312_p1 = scmp.lt.u32.totalorder %s6308_s23, %s7590_s2 }
  0x17   :  { %p6314_p2 = pnand %p6312_p1, %p6309_p0 }
  0x19   :  { %6317 = shalt.err (!%p6314_p2)
}
  0x1a   :  { %s6318_s27 = scalar_lea.vmem %s56_s30, 16  ;;  %s6322_s28 = scalar_lea.vmem %s56_s30, 32 }
  0x1b   :  { %p6319_p3 = scmp.ne.s32.totalorder %s56_s30, %s6318_s27  ;;  %p6323_p4 = scmp.lt.s32.totalorder %s56_s30, %s56_s30 }
  0x1c   :  { %p6324_p5 = scmp.lt.s32.totalorder %s6322_s28, %s6318_s27 }
  0x1e   :  { %p6325_p6 = por %p6324_p5, %p6323_p4 }
  0x20   :  { %p6326_p7 = pnand %p6325_p6, %p6319_p3 }
  0x22   :  { %6329 = shalt.err (!%p6326_p7)
}
  0x23   :  { %58 = dma.hbm_to_vmem [thread:$0]  %s7590_s2, 16, %s56_s30, [#allocation8]  }
  0x24   :  { %s6330_s22 = scalar_lea.hbm %s7564_s4, 16 }
  0x25   :  { %p6331_p8 = scmp.ne.s32.totalorder %s7564_s4, %s6330_s22  ;;  %p6334_p9 = scmp.lt.u32.totalorder %s6330_s22, %s7564_s4 }
  0x27   :  { %p6336_p10 = pnand %p6334_p9, %p6331_p8 }
  0x29   :  { %6339 = shalt.err (!%p6336_p10)
}
  0x2a   :  { %s6340_s26 = scalar_lea.vmem %s78_s21, 16  ;;  %s6344_s27 = scalar_lea.vmem %s78_s21, 32 }
  0x2b   :  { %p6341_p11 = scmp.ne.s32.totalorder %s78_s21, %s6340_s26  ;;  %p6345_p12 = scmp.lt.s32.totalorder %s78_s21, %s78_s21 }
  0x2c   :  { %p6346_p13 = scmp.lt.s32.totalorder %s6344_s27, %s6340_s26 }
  0x2e   :  { %p6347_p0 = por %p6346_p13, %p6345_p12 }
  0x30   :  { %p6348_p1 = pnand %p6347_p0, %p6341_p11 }
  0x32   :  { %6351 = shalt.err (!%p6348_p1)
}
  0x33   :  { %80 = dma.hbm_to_vmem [thread:$0]  %s7564_s4, 16, %s78_s21, [#allocation11]  }
  0x34   :  { %s6656_s28 = smov [#allocation13]   ;;  %s6657_s0 = smov [#allocation16]  }
  0x35   :  { %s96_s29 = sshll.u32 %s6656_s28, 4  ;;  %s119_s20 = sshll.u32 %s6657_s0, 4  ;;  %s97_s29 = int_to_ptr.vmem [resolvable:$true] %s96_s29  ;;  %s6805_s20 = int_to_ptr.vmem [resolvable:$true] %s119_s20 }
  0x36   :  { %s6352_s24 = scalar_lea.hbm %s7566_s6, 3072 }
  0x37   :  { %p6353_p2 = scmp.ne.s32.totalorder %s7566_s6, %s6352_s24  ;;  %p6356_p3 = scmp.lt.u32.totalorder %s6352_s24, %s7566_s6 }
  0x39   :  { %p6358_p4 = pnand %p6356_p3, %p6353_p2 }
  0x3b   :  { %6361 = shalt.err (!%p6358_p4)
}
  0x3c   :  { %s6362_s4 = scalar_lea.vmem %s97_s29, 3072  ;;  %p6367_p6 = scmp.lt.s32.totalorder %s97_s29, %s97_s29 }
  0x3d   :  { %p6363_p5 = scmp.ne.s32.totalorder %s97_s29, %s6362_s4  ;;  %p6368_p7 = scmp.lt.s32.totalorder %s6362_s4, %s6362_s4 }
  0x3f   :  { %p6369_p8 = por %p6368_p7, %p6367_p6 }
  0x41   :  { %p6370_p9 = pnand %p6369_p8, %p6363_p5 }
  0x43   :  { %6373 = shalt.err (!%p6370_p9)
}
  0x44   :  { %s6658_s21 = smov 128   ;;  %s6659_s27 = smov 8  }
  0x45   :  { %102 = dma.hbm_to_vmem [thread:$0]  %s7566_s6, 3072, %s97_s29, [#allocation14], %s6658_s21, %s6658_s21, %s6659_s27  }
  0x46   :  { %s6374_s1 = scalar_lea.hbm %s7568_s8, 16 }
  0x47   :  { %p6375_p10 = scmp.ne.s32.totalorder %s7568_s8, %s6374_s1  ;;  %p6378_p11 = scmp.lt.u32.totalorder %s6374_s1, %s7568_s8 }
  0x49   :  { %p6380_p12 = pnand %p6378_p11, %p6375_p10 }
  0x4b   :  { %6383 = shalt.err (!%p6380_p12)
}
  0x4c   :  { %s6384_s3 = scalar_lea.vmem %s6805_s20, 16  ;;  %s6388_s6 = scalar_lea.vmem %s6805_s20, 32 }
  0x4d   :  { %p6385_p13 = scmp.ne.s32.totalorder %s6805_s20, %s6384_s3  ;;  %p6389_p0 = scmp.lt.s32.totalorder %s6805_s20, %s6805_s20 }
  0x4e   :  { %p6390_p1 = scmp.lt.s32.totalorder %s6388_s6, %s6384_s3 }
  0x50   :  { %p6391_p2 = por %p6390_p1, %p6389_p0 }
  0x52   :  { %p6392_p3 = pnand %p6391_p2, %p6385_p13 }
  0x54   :  { %6395 = shalt.err (!%p6392_p3)
}
  0x55   :  { %122 = dma.hbm_to_vmem [thread:$0]  %s7568_s8, 16, %s6805_s20, [#allocation17]  }
  0x56   :  { %s6660_s4 = smov [#allocation19]   ;;  %s6661_s2 = smov [#allocation22]  }
  0x57   :  { %s141_s30 = sshll.u32 %s6660_s4, 4  ;;  %s160_s28 = sshll.u32 %s6661_s2, 4  ;;  %s142_s30 = int_to_ptr.vmem [resolvable:$true] %s141_s30  ;;  %s6840_s28 = int_to_ptr.vmem [resolvable:$true] %s160_s28 }
  0x58   :  { %s6396_s22 = scalar_lea.hbm %s7570_s10, 32 }
  0x59   :  { %p6397_p4 = scmp.ne.s32.totalorder %s7570_s10, %s6396_s22  ;;  %p6400_p5 = scmp.lt.u32.totalorder %s6396_s22, %s7570_s10 }
  0x5b   :  { %p6402_p6 = pnand %p6400_p5, %p6397_p4 }
  0x5d   :  { %6405 = shalt.err (!%p6402_p6)
}
  0x5e   :  { %s6406_s8 = scalar_lea.vmem %s142_s30, 32  ;;  %p6411_p8 = scmp.lt.s32.totalorder %s142_s30, %s142_s30 }
  0x5f   :  { %p6407_p7 = scmp.ne.s32.totalorder %s142_s30, %s6406_s8  ;;  %p6412_p9 = scmp.lt.s32.totalorder %s6406_s8, %s6406_s8 }
  0x61   :  { %p6413_p10 = por %p6412_p9, %p6411_p8 }
  0x63   :  { %p6414_p11 = pnand %p6413_p10, %p6407_p7 }
  0x65   :  { %6417 = shalt.err (!%p6414_p11)
}
  0x66   :  { %144 = dma.hbm_to_vmem [thread:$0]  %s7570_s10, 32, %s142_s30, [#allocation20]  }
  0x67   :  { %s6418_s4 = scalar_lea.hbm %s7572_s12, 49152 }
  0x68   :  { %p6419_p12 = scmp.ne.s32.totalorder %s7572_s12, %s6418_s4  ;;  %p6422_p13 = scmp.lt.u32.totalorder %s6418_s4, %s7572_s12 }
  0x6a   :  { %p6424_p0 = pnand %p6422_p13, %p6419_p12 }
  0x6c   :  { %6427 = shalt.err (!%p6424_p0)
}
  0x6d   :  { %s6428_s24 = scalar_lea.vmem %s6840_s28, 49152  ;;  %p6433_p2 = scmp.lt.s32.totalorder %s6840_s28, %s6840_s28 }
  0x6e   :  { %p6429_p1 = scmp.ne.s32.totalorder %s6840_s28, %s6428_s24  ;;  %p6434_p3 = scmp.lt.s32.totalorder %s6428_s24, %s6428_s24 }
  0x70   :  { %p6435_p4 = por %p6434_p3, %p6433_p2 }
  0x72   :  { %p6436_p5 = pnand %p6435_p4, %p6429_p1 }
  0x74   :  { %6439 = shalt.err (!%p6436_p5)
}
  0x75   :  { %s6662_s10 = smov 512   ;;  %s6663_s30 = smov 32  }
  0x76   :  { %166 = dma.hbm_to_vmem [thread:$0]  %s7572_s12, 49152, %s6840_s28, [#allocation23], %s6662_s10, %s6662_s10, %s6663_s30  }
  0x77   :  { %s6664_s3 = smov [#allocation25]   ;;  %s6665_s20 = smov [#allocation5]  }
  0x78   :  { %s183_s8 = sshll.u32 %s6664_s3, 4  ;;  %s42_s6 = sshll.u32 %s6665_s20, 4  ;;  %s184_s8 = int_to_ptr.vmem [resolvable:$true] %s183_s8  ;;  %s6871_s6 = int_to_ptr.vmem [resolvable:$true] %s42_s6 }
  0x79   :  { %s6440_s4 = scalar_lea.hbm %s7574_s14, 64 }
  0x7a   :  { %p6441_p6 = scmp.ne.s32.totalorder %s7574_s14, %s6440_s4  ;;  %p6444_p7 = scmp.lt.u32.totalorder %s6440_s4, %s7574_s14 }
  0x7c   :  { %p6446_p8 = pnand %p6444_p7, %p6441_p6 }
  0x7e   :  { %6449 = shalt.err (!%p6446_p8)
}
  0x7f   :  { %s6450_s12 = scalar_lea.vmem %s184_s8, 64  ;;  %p6455_p10 = scmp.lt.s32.totalorder %s184_s8, %s184_s8 }
  0x80   :  { %p6451_p9 = scmp.ne.s32.totalorder %s184_s8, %s6450_s12  ;;  %p6456_p11 = scmp.lt.s32.totalorder %s6450_s12, %s6450_s12 }
  0x82   :  { %p6457_p12 = por %p6456_p11, %p6455_p10 }
  0x84   :  { %p6458_p13 = pnand %p6457_p12, %p6451_p9 }
  0x86   :  { %6461 = shalt.err (!%p6458_p13)
}
  0x87   :  { %186 = dma.hbm_to_vmem [thread:$0]  %s7574_s14, 64, %s184_s8, [#allocation26]  }
  0x88   :  { %s7591_s23 = sld [smem:[#allocation37_spill]] }
  0x8e   :  { %s6462_s25 = scalar_lea.hbm %s7591_s23, 192 }
  0x8f   :  { %p6463_p0 = scmp.ne.s32.totalorder %s7591_s23, %s6462_s25  ;;  %p6466_p1 = scmp.lt.u32.totalorder %s6462_s25, %s7591_s23 }
  0x91   :  { %p6468_p2 = pnand %p6466_p1, %p6463_p0 }
  0x93   :  { %6471 = shalt.err (!%p6468_p2)
}
  0x94   :  { %s6472_s4 = scalar_lea.vmem %s6871_s6, 192  ;;  %p6477_p4 = scmp.lt.s32.totalorder %s6871_s6, %s6871_s6 }
  0x95   :  { %p6473_p3 = scmp.ne.s32.totalorder %s6871_s6, %s6472_s4  ;;  %p6478_p5 = scmp.lt.s32.totalorder %s6472_s4, %s6472_s4 }
  0x97   :  { %p6479_p6 = por %p6478_p5, %p6477_p4 }
  0x99   :  { %p6480_p7 = pnand %p6479_p6, %p6473_p3 }
  0x9b   :  { %6483 = shalt.err (!%p6480_p7)
}
  0x9c   :  { %s6666_s14 = smov 64   ;;  %s6667_s8 = smov 4  }
  0x9d   :  { %48 = dma.hbm_to_vmem [thread:$0]  %s7591_s23, 192, %s6871_s6, [#allocation6], %s6666_s14, %s6666_s14, %s6667_s8  }
  0x9e   :  { %s6668_s1 = smov [#allocation9]   ;;  %s6669_s12 = smov [#allocation12]  }
  0x9f   :  { %s64_s22 = sshll.u32 %s6668_s1, 4  ;;  %s87_s28 = sshll.u32 %s6669_s12, 4  ;;  %s65_s22 = int_to_ptr.vmem [resolvable:$true] %s64_s22  ;;  %s88_s28 = int_to_ptr.vmem [resolvable:$true] %s87_s28 }
  0xa0   :  { %s7592_s30 = sld [smem:[#allocation39_spill]] }
  0xa6   :  { %s6484_s25 = scalar_lea.hbm %s7592_s30, 1536 }
  0xa7   :  { %p6485_p8 = scmp.ne.s32.totalorder %s7592_s30, %s6484_s25  ;;  %p6488_p9 = scmp.lt.u32.totalorder %s6484_s25, %s7592_s30 }
  0xa9   :  { %p6490_p10 = pnand %p6488_p9, %p6485_p8 }
  0xab   :  { %6493 = shalt.err (!%p6490_p10)
}
  0xac   :  { %s6494_s6 = scalar_lea.vmem %s65_s22, 1536  ;;  %p6499_p12 = scmp.lt.s32.totalorder %s65_s22, %s65_s22 }
  0xad   :  { %p6495_p11 = scmp.ne.s32.totalorder %s65_s22, %s6494_s6  ;;  %p6500_p13 = scmp.lt.s32.totalorder %s6494_s6, %s6494_s6 }
  0xaf   :  { %p6501_p0 = por %p6500_p13, %p6499_p12 }
  0xb1   :  { %p6502_p1 = pnand %p6501_p0, %p6495_p11 }
  0xb3   :  { %6505 = shalt.err (!%p6502_p1)
}
  0xb4   :  { %70 = dma.hbm_to_vmem [thread:$0]  %s7592_s30, 1536, %s65_s22, [#allocation8], %s6658_s21, %s6658_s21, %s6659_s27  }
  0xb5   :  { %s6506_s2 = scalar_lea.hbm %s7565_s5, 16 }
  0xb6   :  { %p6507_p2 = scmp.ne.s32.totalorder %s7565_s5, %s6506_s2  ;;  %p6510_p3 = scmp.lt.u32.totalorder %s6506_s2, %s7565_s5 }
  0xb8   :  { %p6512_p4 = pnand %p6510_p3, %p6507_p2 }
  0xba   :  { %6515 = shalt.err (!%p6512_p4)
}
  0xbb   :  { %s6516_s10 = scalar_lea.vmem %s88_s28, 16  ;;  %s6520_s25 = scalar_lea.vmem %s88_s28, 32 }
  0xbc   :  { %p6517_p5 = scmp.ne.s32.totalorder %s88_s28, %s6516_s10  ;;  %p6521_p6 = scmp.lt.s32.totalorder %s88_s28, %s88_s28 }
  0xbd   :  { %p6522_p7 = scmp.lt.s32.totalorder %s6520_s25, %s6516_s10 }
  0xbf   :  { %p6523_p8 = por %p6522_p7, %p6521_p6 }
  0xc1   :  { %p6524_p9 = pnand %p6523_p8, %p6517_p5 }
  0xc3   :  { %6527 = shalt.err (!%p6524_p9)
}
  0xc4   :  { %90 = dma.hbm_to_vmem [thread:$0]  %s7565_s5, 16, %s88_s28, [#allocation11]  }
  0xc5   :  { %s6670_s22 = smov [#allocation15]   ;;  %s6671_s3 = smov [#allocation18]  }
  0xc6   :  { %s109_s30 = sshll.u32 %s6670_s22, 4  ;;  %s128_s20 = sshll.u32 %s6671_s3, 4  ;;  %s110_s30 = int_to_ptr.vmem [resolvable:$true] %s109_s30  ;;  %s6929_s20 = int_to_ptr.vmem [resolvable:$true] %s128_s20 }
  0xc7   :  { %s6528_s6 = scalar_lea.hbm %s7567_s7, 16 }
  0xc8   :  { %p6529_p10 = scmp.ne.s32.totalorder %s7567_s7, %s6528_s6  ;;  %p6532_p11 = scmp.lt.u32.totalorder %s6528_s6, %s7567_s7 }
  0xca   :  { %p6534_p12 = pnand %p6532_p11, %p6529_p10 }
  0xcc   :  { %6537 = shalt.err (!%p6534_p12)
}
  0xcd   :  { %s6538_s5 = scalar_lea.vmem %s110_s30, 16  ;;  %s6542_s28 = scalar_lea.vmem %s110_s30, 32 }
  0xce   :  { %p6539_p13 = scmp.ne.s32.totalorder %s110_s30, %s6538_s5  ;;  %p6543_p0 = scmp.lt.s32.totalorder %s110_s30, %s110_s30 }
  0xcf   :  { %p6544_p1 = scmp.lt.s32.totalorder %s6542_s28, %s6538_s5 }
  0xd1   :  { %p6545_p2 = por %p6544_p1, %p6543_p0 }
  0xd3   :  { %p6546_p3 = pnand %p6545_p2, %p6539_p13 }
  0xd5   :  { %6549 = shalt.err (!%p6546_p3)
}
  0xd6   :  { %112 = dma.hbm_to_vmem [thread:$0]  %s7567_s7, 16, %s110_s30, [#allocation14]  }
  0xd7   :  { %s6550_s24 = scalar_lea.hbm %s7569_s9, 12288 }
  0xd8   :  { %p6551_p4 = scmp.ne.s32.totalorder %s7569_s9, %s6550_s24  ;;  %p6554_p5 = scmp.lt.u32.totalorder %s6550_s24, %s7569_s9 }
  0xda   :  { %p6556_p6 = pnand %p6554_p5, %p6551_p4 }
  0xdc   :  { %6559 = shalt.err (!%p6556_p6)
}
  0xdd   :  { %s6560_s22 = scalar_lea.vmem %s6929_s20, 12288  ;;  %p6565_p8 = scmp.lt.s32.totalorder %s6929_s20, %s6929_s20 }
  0xde   :  { %p6561_p7 = scmp.ne.s32.totalorder %s6929_s20, %s6560_s22  ;;  %p6566_p9 = scmp.lt.s32.totalorder %s6560_s22, %s6560_s22 }
  0xe0   :  { %p6567_p10 = por %p6566_p9, %p6565_p8 }
  0xe2   :  { %p6568_p11 = pnand %p6567_p10, %p6561_p7 }
  0xe4   :  { %6571 = shalt.err (!%p6568_p11)
}
  0xe5   :  { %s6672_s7 = smov 256   ;;  %s6673_s30 = smov 16  }
  0xe6   :  { %134 = dma.hbm_to_vmem [thread:$0]  %s7569_s9, 12288, %s6929_s20, [#allocation17], %s6672_s7, %s6672_s7, %s6673_s30  }
  0xe7   :  { %s6674_s26 = smov [#allocation21]   ;;  %s6675_s23 = smov [#allocation24]  }
  0xe8   :  { %s151_s6 = sshll.u32 %s6674_s26, 4  ;;  %s173_s4 = sshll.u32 %s6675_s23, 4  ;;  %s152_s6 = int_to_ptr.vmem [resolvable:$true] %s151_s6  ;;  %s174_s4 = int_to_ptr.vmem [resolvable:$true] %s173_s4 }
  0xe9   :  { %s6572_s5 = scalar_lea.hbm %s7571_s11, 32 }
  0xea   :  { %p6573_p12 = scmp.ne.s32.totalorder %s7571_s11, %s6572_s5  ;;  %p6576_p13 = scmp.lt.u32.totalorder %s6572_s5, %s7571_s11 }
  0xec   :  { %p6578_p0 = pnand %p6576_p13, %p6573_p12 }
  0xee   :  { %6581 = shalt.err (!%p6578_p0)
}
  0xef   :  { %s6582_s9 = scalar_lea.vmem %s152_s6, 32  ;;  %p6587_p2 = scmp.lt.s32.totalorder %s152_s6, %s152_s6 }
  0xf0   :  { %p6583_p1 = scmp.ne.s32.totalorder %s152_s6, %s6582_s9  ;;  %p6588_p3 = scmp.lt.s32.totalorder %s6582_s9, %s6582_s9 }
  0xf2   :  { %p6589_p4 = por %p6588_p3, %p6587_p2 }
  0xf4   :  { %p6590_p5 = pnand %p6589_p4, %p6583_p1 }
  0xf6   :  { %6593 = shalt.err (!%p6590_p5)
}
  0xf7   :  { %154 = dma.hbm_to_vmem [thread:$0]  %s7571_s11, 32, %s152_s6, [#allocation20]  }
  0xf8   :  { %s6594_s25 = scalar_lea.hbm %s7573_s13, 64 }
  0xf9   :  { %p6595_p6 = scmp.ne.s32.totalorder %s7573_s13, %s6594_s25  ;;  %p6598_p7 = scmp.lt.u32.totalorder %s6594_s25, %s7573_s13 }
  0xfb   :  { %p6600_p8 = pnand %p6598_p7, %p6595_p6 }
  0xfd   :  { %6603 = shalt.err (!%p6600_p8)
}
  0xfe   :  { %s6604_s30 = scalar_lea.vmem %s174_s4, 64  ;;  %p6609_p10 = scmp.lt.s32.totalorder %s174_s4, %s174_s4 }
  0xff   :  { %p6605_p9 = scmp.ne.s32.totalorder %s174_s4, %s6604_s30  ;;  %p6610_p11 = scmp.lt.s32.totalorder %s6604_s30, %s6604_s30 }
 0x101   :  { %p6611_p12 = por %p6610_p11, %p6609_p10 }
 0x103   :  { %p6612_p13 = pnand %p6611_p12, %p6605_p9 }
 0x105   :  { %6615 = shalt.err (!%p6612_p13)
}
 0x106   :  { %176 = dma.hbm_to_vmem [thread:$0]  %s7573_s13, 64, %s174_s4, [#allocation23]  }
 0x107   :  { %s6676_s29 = smov [#allocation27]   ;;  %s6616_s14 = scalar_lea.hbm %s7575_s15, 256 }
 0x108   :  { %s193_s26 = sshll.u32 %s6676_s29, 4  ;;  %p6617_p0 = scmp.ne.s32.totalorder %s7575_s15, %s6616_s14  ;;  %s194_s26 = int_to_ptr.vmem [resolvable:$true] %s193_s26 }
 0x109   :  { %p6620_p1 = scmp.lt.u32.totalorder %s6616_s14, %s7575_s15 }
 0x10b   :  { %p6622_p2 = pnand %p6620_p1, %p6617_p0 }
 0x10d   :  { %6625 = shalt.err (!%p6622_p2)
}
 0x10e   :  { %s6626_s0 = scalar_lea.vmem %s194_s26, 256  ;;  %p6631_p4 = scmp.lt.s32.totalorder %s194_s26, %s194_s26 }
 0x10f   :  { %p6627_p3 = scmp.ne.s32.totalorder %s194_s26, %s6626_s0  ;;  %p6632_p5 = scmp.lt.s32.totalorder %s6626_s0, %s6626_s0 }
 0x111   :  { %p6633_p6 = por %p6632_p5, %p6631_p4 }
 0x113   :  { %p6634_p7 = pnand %p6633_p6, %p6627_p3 }
 0x115   :  { %6637 = shalt.err (!%p6634_p7)
}
 0x116   :  { %196 = dma.hbm_to_vmem [thread:$0]  %s7575_s15, 256, %s194_s26, [#allocation26]  }
 0x117   :  { %6638 = dma.done.wait [#allocation6], 192  }
 0x118   :  { %6639 = vsyncadd [#allocation6], 4294967104 }
 0x119   :  { %6640 = dma.done.wait [#allocation8], 1552  }
 0x11a   :  { %6641 = vsyncadd [#allocation8], 4294965744 }
 0x11b   :  { %6642 = dma.done.wait [#allocation11], 32  }
 0x11c   :  { %6643 = vsyncadd [#allocation11], 4294967264 }
 0x11d   :  { %6644 = dma.done.wait [#allocation14], 3088  }
 0x11e   :  { %6645 = vsyncadd [#allocation14], 4294964208 }
 0x11f   :  { %6646 = dma.done.wait [#allocation17], 12304  }
 0x120   :  { %6647 = vsyncadd [#allocation17], 4294954992 }
 0x121   :  { %6648 = dma.done.wait [#allocation20], 64  }
 0x122   :  { %6649 = vsyncadd [#allocation20], 4294967232 }
 0x123   :  { %6650 = dma.done.wait [#allocation23], 49216  }
 0x124   :  { %6651 = vsyncadd [#allocation23], 4294918080 }
 0x125   :  { %6652 = dma.done.wait [#allocation26], 320  }
 0x126   :  { %6653 = vsyncadd [#allocation26], 4294966976  ;;  %v264_v0 = vlaneseq  ;;  %s7595_s9 = sld [smem:[#allocation36_spill]]  ;;  %v6677_v8 = vmov 1.0   ;;  %v559_v36 = vld [vmem:[#allocation5 + $0x4] sm:$0xf] }
 0x127   :  { %vm585_vm1 = vcmask 1043456   ;;  %v1355_v37 = vld [vmem:[#allocation9 + $0x38] sm:$0xff] }
 0x128   :  { %v6996_v1 = vshrl.u32 %v264_v0, 7  ;;  %v6998_v2 = vand.u32 127, %v264_v0  ;;  %v3296_v49 = vld [vmem:[#allocation22 + $0x448] sm:$0xff] }
 0x12a   :  { %v275_v3 = vmul.u32 2, %v6996_v1  ;;  %v7097_v29 = vadd.s32 8, %v6996_v1  ;;  %v7104_v31 = vadd.s32 16, %v6996_v1  ;;  %v268_v33 = vadd.s32 24, %v6996_v1 }
 0x12b   :  { %v269_v35 = vadd.s32 32, %v6996_v1  ;;  %v270_v39 = vadd.s32 40, %v6996_v1  ;;  %v271_v42 = vadd.s32 48, %v6996_v1  ;;  %v272_v45 = vadd.s32 56, %v6996_v1 }
 0x12c   :  { %vm7004_vm0 = vcmp.eq.s32.totalorder %v6998_v2, %v275_v3  ;;  %v248_v5 = vld [vmem:[%s7595_s9] sm:$0xff]  ;;  %v249_v6 = vld [vmem:[%s7595_s9 + $0x8] sm:$0xff]  ;;  %v250_v7 = vld [vmem:[%s7595_s9 + $0x10] sm:$0xff]  ;;  %v276_v32 = vmul.u32 2, %v7097_v29  ;;  %v277_v34 = vmul.u32 2, %v7104_v31  ;;  %v4765_v48 = vadd.s32 4294967295, %v275_v3 }
 0x12d   :  { %5179 = vmatprep.mubr.msk.f32.mxu1 %vm7004_vm0, %v6677_v8  ;;  %v7020_v9 = vpack.c.bf16 %v249_v6, %v248_v5  ;;  %v251_v10 = vld [vmem:[%s7595_s9 + $0x18] sm:$0xff]  ;;  %v252_v12 = vld [vmem:[%s7595_s9 + $0x20] sm:$0xff]  ;;  %v253_v13 = vld [vmem:[%s7595_s9 + $0x28] sm:$0xff]  ;;  %v278_v38 = vmul.u32 2, %v268_v33  ;;  %v279_v41 = vmul.u32 2, %v269_v35  ;;  %v299_v50 = vand.u32 31, %v6996_v1 }
 0x12e   :  { %v7025_v11 = vpack.c.bf16 %v251_v10, %v250_v7  ;;  %v7038_v14 = vpack.c.bf16 %v253_v13, %v252_v12  ;;  %v254_v15 = vld [vmem:[%s7595_s9 + $0x30] sm:$0xff]  ;;  %v255_v16 = vld [vmem:[%s7595_s9 + $0x38] sm:$0xff]  ;;  %v256_v18 = vld [vmem:[%s7595_s9 + $0x40] sm:$0xff]  ;;  %vm7117_vm2 = vcmp.eq.s32.totalorder %v6998_v2, %v276_v32  ;;  %vm7124_vm3 = vcmp.eq.s32.totalorder %v6998_v2, %v277_v34 }
 0x12f   :  { %5529 = vmatprep.subr.bf16.mxu1 %v7020_v9  ;;  %5497 = vmatprep.subr.bf16.mxu0 %v7020_v9  ;;  %v7050_v17 = vpack.c.bf16 %v255_v16, %v254_v15  ;;  %v257_v19 = vld [vmem:[%s7595_s9 + $0x48] sm:$0xff]  ;;  %v258_v21 = vld [vmem:[%s7595_s9 + $0x50] sm:$0xff]  ;;  %v259_v22 = vld [vmem:[%s7595_s9 + $0x58] sm:$0xff]  ;;  %vm7137_vm4 = vcmp.eq.s32.totalorder %v6998_v2, %v278_v38  ;;  %v280_v44 = vmul.u32 2, %v270_v39  ;;  %vm441_vm5 = vcmp.eq.s32.totalorder %v6998_v2, %v279_v41 }
 0x130   :  { %5531 = vmatpush3.bf16.msra.mxu1 %v7020_v9  ;;  %5499 = vmatpush3.bf16.msra.mxu0 %v7020_v9  ;;  %v7062_v20 = vpack.c.bf16 %v257_v19, %v256_v18  ;;  %v7074_v23 = vpack.c.bf16 %v259_v22, %v258_v21  ;;  %v260_v24 = vld [vmem:[%s7595_s9 + $0x60] sm:$0xff]  ;;  %v261_v25 = vld [vmem:[%s7595_s9 + $0x68] sm:$0xff]  ;;  %v262_v27 = vld [vmem:[%s7595_s9 + $0x70] sm:$0xff]  ;;  %v281_v46 = vmul.u32 2, %v271_v42  ;;  %v282_v47 = vmul.u32 2, %v272_v45 }
 0x131   :  { %5533 = vmatprep.subr.bf16.mxu1 %v7025_v11  ;;  %5501 = vmatprep.subr.bf16.mxu0 %v7025_v11  ;;  %v7086_v26 = vpack.c.bf16 %v261_v25, %v260_v24  ;;  %v263_v28 = vld [vmem:[%s7595_s9 + $0x78] sm:$0xff]  ;;  %vm442_vm6 = vcmp.eq.s32.totalorder %v6998_v2, %v280_v44  ;;  %vm7158_vm9 = vcmp.eq.s32.totalorder %v6998_v2, %v4765_v48  ;;  %vm307_vm10 = vcmp.ne.s32.totalorder %v299_v50, 0  ;;  %v436_v15 = vld [vmem:[#allocation5] sm:$0xf]  ;;  %v956_v16 = vld [vmem:[#allocation5 + $0x8] sm:$0xf] }
 0x132   :  { %v7101_v30 = vpack.c.bf16 %v263_v28, %v262_v27  ;;  %vm443_vm7 = vcmp.eq.s32.totalorder %v6998_v2, %v281_v46  ;;  %vm444_vm8 = vcmp.eq.s32.totalorder %v6998_v2, %v282_v47  ;;  %v7163_v51 = vadd.s32 4294967295, %v276_v32  ;;  %vm315_vm11 = vmand %vm7158_vm9, %vm307_vm10 }
 0x133   :  { %5135 = vmatprep.mubr.msk.f32.mxu0 %vm315_vm11, %v6677_v8  ;;  %v7174_v52 = vadd.s32 4294967295, %v277_v34  ;;  %v7176_v53 = vadd.s32 4294967295, %v278_v38  ;;  %v4769_v54 = vadd.s32 4294967295, %v279_v41  ;;  %v303_v55 = vand.u32 31, %v269_v35 }
 0x134   :  { %5535 = vmatpush3.bf16.msra.mxu1 %v7025_v11  ;;  %5503 = vmatpush3.bf16.msra.mxu0 %v7025_v11  ;;  %vm292_vm12 = vcmp.eq.s32.totalorder %v6998_v2, %v7163_v51  ;;  %v4770_v56 = vadd.s32 4294967295, %v280_v44  ;;  %v4771_v57 = vadd.s32 4294967295, %v281_v46  ;;  %v4772_v58 = vadd.s32 4294967295, %v282_v47 }
 0x135   :  { %5537 = vmatprep.subr.bf16.mxu1 %v7038_v14  ;;  %5505 = vmatprep.subr.bf16.mxu0 %v7038_v14  ;;  %vm293_vm13 = vcmp.eq.s32.totalorder %v6998_v2, %v7174_v52  ;;  %vm294_vm14 = vcmp.eq.s32.totalorder %v6998_v2, %v7176_v53  ;;  %vm295_vm15 = vcmp.eq.s32.totalorder %v6998_v2, %v4769_v54  ;;  %vm560_vm11 = vcmask 31744  }
 0x136   :  { %vm298_vm10 = vcmp.eq.s32.totalorder %v6998_v2, %v4772_v58  ;;  %v7206_v3 = vadd.s32 2, %v4765_v48  ;;  %v7227_v7 = vadd.s32 2, %v7163_v51  ;;  %v7238_v10 = vadd.s32 2, %v7176_v53 }
 0x137   :  { %v831_v12 = vadd.s32 2, %v4770_v56  ;;  %v832_v13 = vadd.s32 2, %v4771_v57  ;;  %v6678_v45 = vmov 0.0   ;;  %v1136_v47 = vand.u32 15, %v6996_v1 }
 0x138   :  { %5539 = vmatpush3.bf16.msra.mxu1 %v7038_v14  ;;  %5507 = vmatpush3.bf16.msra.mxu0 %v7038_v14  ;;  %v7291_v46 = vsel %vm7004_vm0, 1.0, %v6678_v45  ;;  %v1151_v40 = vsel %vm294_vm14, 1.0, %v6678_v45 }
 0x139   :  { %5541 = vmatprep.subr.bf16.mxu1 %v7050_v17  ;;  %5509 = vmatprep.subr.bf16.mxu0 %v7050_v17 }
 0x13c   :  { %5543 = vmatpush3.bf16.msra.mxu1 %v7050_v17  ;;  %5511 = vmatpush3.bf16.msra.mxu0 %v7050_v17 }
 0x13d   :  { %5545 = vmatprep.subr.bf16.mxu1 %v7062_v20  ;;  %5513 = vmatprep.subr.bf16.mxu0 %v7062_v20 }
 0x140   :  { %5547 = vmatpush3.bf16.msra.mxu1 %v7062_v20  ;;  %5515 = vmatpush3.bf16.msra.mxu0 %v7062_v20 }
 0x141   :  { %5549 = vmatprep.subr.bf16.mxu1 %v7074_v23  ;;  %5517 = vmatprep.subr.bf16.mxu0 %v7074_v23 }
 0x144   :  { %5551 = vmatpush3.bf16.msra.mxu1 %v7074_v23  ;;  %5519 = vmatpush3.bf16.msra.mxu0 %v7074_v23 }
 0x145   :  { %5553 = vmatprep.subr.bf16.mxu1 %v7086_v26  ;;  %5521 = vmatprep.subr.bf16.mxu0 %v7086_v26 }
 0x148   :  { %5555 = vmatpush3.bf16.msra.mxu1 %v7086_v26  ;;  %5523 = vmatpush3.bf16.msra.mxu0 %v7086_v26 }
 0x149   :  { %5557 = vmatprep.subr.bf16.mxu1 %v7101_v30  ;;  %5525 = vmatprep.subr.bf16.mxu0 %v7101_v30 }
 0x14c   :  { %5559 = vmatpush3.bf16.msra.mxu1 %v7101_v30  ;;  %5527 = vmatpush3.bf16.msra.mxu0 %v7101_v30 }
 0x14d   :  { %5191 = vmatprep.subr.msk.mxu1 %vm585_vm1, %v559_v36  ;;  %5205 = vmatprep.subr.msk.mxu0 %vm585_vm1, %v436_v15 }
 0x14f   :  { %5180 = vmatmul.mubr.msk.f32.vlgmr.msra.gmra.mrb[0].mxu1 %vm7117_vm2, %v6677_v8  ;;  %5136 = vmatmul.mubr.msk.f32.vlgmr.msra.gmra.mrb[0].mxu0 %vm292_vm12, %v6677_v8 }
 0x150   :  { %5182 = vmatprep.mubr.msk.f32.mxu1 %vm7124_vm3, %v6677_v8  ;;  %5192 = vmatpush3.msk.msra.mxu1 %vm585_vm1, %v559_v36 }
 0x151   :  { %5561 = vmatprep.subr.bf16.mxu1 %v7020_v9  ;;  %5138 = vmatprep.mubr.msk.f32.mxu0 %vm293_vm13, %v6677_v8 }
 0x152   :  { %5206 = vmatpush3.msk.msra.mxu0 %vm585_vm1, %v436_v15 }
 0x153   :  { %5183 = vmatmul.mubr.msk.f32.gmra.mrb[2].mxu1 %vm7137_vm4, %v6677_v8  ;;  %5139 = vmatmul.mubr.msk.f32.gmra.mrb[2].mxu0 %vm294_vm14, %v6677_v8 }
 0x154   :  { %5185 = vmatprep.mubr.msk.f32.mxu1 %vm441_vm5, %v6677_v8  ;;  %vm311_vm5 = vcmp.ne.s32.totalorder %v303_v55, 0  ;;  %5263 = vmatprep.subr.msk.mxu0 %vm585_vm1, %v956_v16 }
 0x157   :  { %5186 = vmatmul.mubr.msk.f32.gmra.mrb[4].mxu1 %vm442_vm6, %v6677_v8  ;;  %vm319_vm6 = vmand %vm295_vm15, %vm311_vm5  ;;  %vm834_vm15 = vcmp.eq.s32.totalorder %v6998_v2, %v7206_v3  ;;  %vm7584_vm5 = vcmp.eq.s32.totalorder %v6998_v2, %v7227_v7 }
 0x158   :  { %5188 = vmatprep.mubr.msk.f32.mxu1 %vm443_vm7, %v6677_v8  ;;  %5141 = vmatprep.mubr.msk.f32.mxu0 %vm319_vm6, %v6677_v8  ;;  %vm296_vm7 = vcmp.eq.s32.totalorder %v6998_v2, %v4770_v56 }
 0x159   :  { %5142 = vmatmul.mubr.msk.f32.gmra.mrb[4].mxu0 %vm296_vm7, %v6677_v8  ;;  %vm837_vm7 = vcmp.eq.s32.totalorder %v6998_v2, %v7238_v10  ;;  %v1649_v10 = vld [vmem:[#allocation9 + $0x40] sm:$0xff] }
 0x15a   :  { %v845_v3 = vsel %vm837_vm7, 1.0, %v6678_v45 }
 0x15b   :  { %5189 = vmatmul.mubr.msk.f32.gmra.mrb[6].mxu1 %vm444_vm8, %v6677_v8  ;;  %vm297_vm8 = vcmp.eq.s32.totalorder %v6998_v2, %v4771_v57 }
 0x15c   :  { %5144 = vmatprep.mubr.msk.f32.mxu0 %vm297_vm8, %v6677_v8 }
 0x15d   :  { %5145 = vmatmul.mubr.msk.f32.gmra.mrb[6].mxu0 %vm298_vm10, %v6677_v8  ;;  %vm839_vm10 = vcmp.eq.s32.totalorder %v6998_v2, %v831_v12 }
 0x222   :  { %v5181_v59 = vpop.f32.mrb[0].mxu1 }
 0x223   :  { %v519_v60 = vpop.f32.mrb[1].mxu1 }
 0x224   :  { %5193 = vmatprep.mubr.msk.f32.mxu1 %vm560_vm11, %v519_v60 }
 0x225   :  { %5194 = vmatmul.mubr.msk.f32.vlgmr.msra.gmra.mrb[8].mxu1 %vm560_vm11, %v5181_v59 }
 0x226   :  { %5563 = vmatpush3.bf16.msra.mxu1 %v7020_v9  ;;  %v5184_v61 = vpop.f32.mrb[2].mxu1  ;;  %v7232_v9 = vadd.s32 2, %v7174_v52 }
 0x227   :  { %5565 = vmatprep.subr.bf16.mxu1 %v7025_v11  ;;  %v529_v62 = vpop.f32.mrb[3].mxu1 }
 0x228   :  { %5196 = vmatprep.mubr.msk.f32.mxu1 %vm560_vm11, %v529_v62  ;;  %vm7585_vm6 = vcmp.eq.s32.totalorder %v6998_v2, %v7232_v9 }
 0x229   :  { %5197 = vmatmul.mubr.msk.f32.gmra.mrb[10].mxu1 %vm560_vm11, %v5184_v61 }
 0x22a   :  { %5567 = vmatpush3.bf16.msra.mxu1 %v7025_v11  ;;  %v5187_v63 = vpop.f32.mrb[4].mxu1  ;;  %v830_v11 = vadd.s32 2, %v4769_v54  ;;  %v4824_v54 = vld [vmem:[#allocation7] ss:$0 sm:$0xff] }
 0x22b   :  { %5569 = vmatprep.subr.bf16.mxu1 %v7038_v14  ;;  %v539_v0 = vpop.f32.mrb[5].mxu1 }
 0x22c   :  { %5199 = vmatprep.mubr.msk.f32.mxu1 %vm560_vm11, %v539_v0  ;;  %vm838_vm8 = vcmp.eq.s32.totalorder %v6998_v2, %v830_v11 }
 0x22d   :  { %5200 = vmatmul.mubr.msk.f32.gmra.mrb[12].mxu1 %vm560_vm11, %v5187_v63 }
 0x22e   :  { %5571 = vmatpush3.bf16.msra.mxu1 %v7038_v14  ;;  %v5190_v5 = vpop.f32.mrb[6].mxu1  ;;  %v833_v14 = vadd.s32 2, %v4772_v58 }
 0x22f   :  { %5573 = vmatprep.subr.bf16.mxu1 %v7050_v17  ;;  %v549_v6 = vpop.f32.mrb[7].mxu1 }
 0x230   :  { %5202 = vmatprep.mubr.msk.f32.mxu1 %vm560_vm11, %v549_v6 }
 0x231   :  { %5203 = vmatmul.mubr.msk.f32.gmra.mrb[14].mxu1 %vm560_vm11, %v5190_v5 }
 0x232   :  { %5575 = vmatpush3.bf16.msra.mxu1 %v7050_v17  ;;  %5251 = vmatprep.mubr.msk.f32.mxu1 %vm834_vm15, %v6677_v8  ;;  %v5137_v17 = vpop.f32.mrb[0].mxu0 }
 0x233   :  { %5577 = vmatprep.subr.bf16.mxu1 %v7062_v20  ;;  %v397_v18 = vpop.f32.mrb[1].mxu0 }
 0x234   :  { %5207 = vmatprep.mubr.msk.f32.mxu0 %vm560_vm11, %v397_v18  ;;  %v5140_v19 = vpop.f32.mrb[2].mxu0 }
 0x235   :  { %5208 = vmatmul.mubr.msk.f32.vlgmr.msra.gmra.mrb[8].mxu0 %vm560_vm11, %v5137_v17 }
 0x236   :  { %5579 = vmatpush3.bf16.msra.mxu1 %v7062_v20  ;;  %5264 = vmatpush3.msk.msra.mxu0 %vm585_vm1, %v956_v16  ;;  %v407_v20 = vpop.f32.mrb[3].mxu0 }
 0x237   :  { %5581 = vmatprep.subr.bf16.mxu1 %v7074_v23  ;;  %5210 = vmatprep.mubr.msk.f32.mxu0 %vm560_vm11, %v407_v20 }
 0x239   :  { %5211 = vmatmul.mubr.msk.f32.gmra.mrb[10].mxu0 %vm560_vm11, %v5140_v19 }
 0x23a   :  { %5583 = vmatpush3.bf16.msra.mxu1 %v7074_v23 }
 0x23b   :  { %5585 = vmatprep.subr.bf16.mxu1 %v7086_v26 }
 0x23e   :  { %5587 = vmatpush3.bf16.msra.mxu1 %v7086_v26 }
 0x23f   :  { %5589 = vmatprep.subr.bf16.mxu1 %v7101_v30 }
 0x242   :  { %5591 = vmatpush3.bf16.msra.mxu1 %v7101_v30 }
 0x245   :  { %5252 = vmatmul.mubr.msk.f32.vlgmr.msra.gmra.mrb[16].mxu1 %vm7584_vm5, %v6677_v8  ;;  %vm840_vm5 = vcmp.eq.s32.totalorder %v6998_v2, %v832_v13 }
 0x246   :  { %5254 = vmatprep.mubr.msk.f32.mxu1 %vm7585_vm6, %v6677_v8  ;;  %vm841_vm6 = vcmp.eq.s32.totalorder %v6998_v2, %v833_v14 }
 0x249   :  { %5255 = vmatmul.mubr.msk.f32.gmra.mrb[18].mxu1 %vm837_vm7, %v6677_v8 }
 0x24a   :  { %5257 = vmatprep.mubr.msk.f32.mxu1 %vm838_vm8, %v6677_v8 }
 0x24d   :  { %5258 = vmatmul.mubr.msk.f32.gmra.mrb[20].mxu1 %vm839_vm10, %v6677_v8 }
 0x24e   :  { %5260 = vmatprep.mubr.msk.f32.mxu1 %vm840_vm5, %v6677_v8  ;;  %vm1152_vm5 = vcmask 523264  }
 0x251   :  { %5261 = vmatmul.mubr.msk.f32.gmra.mrb[22].mxu1 %vm841_vm6, %v6677_v8  ;;  %v5143_v8 = vpop.f32.mrb[4].mxu0  ;;  %vm1140_vm6 = vcmp.ne.s32.totalorder %v1136_v47, 0  ;;  %v1353_v47 = vld [vmem:[#allocation9 + $0x28] sm:$0xff] }
 0x252   :  { %v417_v21 = vpop.f32.mrb[5].mxu0  ;;  %vm1144_vm8 = vmand %vm7158_vm9, %vm1140_vm6 }
 0x253   :  { %5213 = vmatprep.mubr.msk.f32.mxu0 %vm560_vm11, %v417_v21  ;;  %v5146_v22 = vpop.f32.mrb[6].mxu0  ;;  %v1148_v48 = vsel %vm1144_vm8, 1.0, %v6678_v45 }
 0x254   :  { %5214 = vmatmul.mubr.msk.f32.gmra.mrb[12].mxu0 %vm560_vm11, %v5143_v8  ;;  %v427_v23 = vpop.f32.mrb[7].mxu0  ;;  %5293 = vmatprep.mubr.msk.f32.mxu1 %vm1152_vm5, %v1148_v48 }
 0x255   :  { %5216 = vmatprep.mubr.msk.f32.mxu0 %vm560_vm11, %v427_v23 }
 0x258   :  { %5217 = vmatmul.mubr.msk.f32.gmra.mrb[14].mxu0 %vm560_vm11, %v5146_v22 }
 0x2f8   :  { %v5195_v24 = vpop.f32.mrb[8].mxu1 }
 0x2f9   :  { %v655_v25 = vpop.f32.mrb[9].mxu1 }
 0x2fc   :  { %v5198_v26 = vpop.f32.mrb[10].mxu1 }
 0x2fd   :  { %v665_v27 = vpop.f32.mrb[11].mxu1 }
 0x300   :  { %v5201_v28 = vpop.f32.mrb[12].mxu1 }
 0x301   :  { %v675_v30 = vpop.f32.mrb[13].mxu1 }
 0x304   :  { %v7276_v32 = vpop.f32.mrb[14].mxu1 }
 0x305   :  { %v7278_v33 = vpop.f32.mrb[15].mxu1 }
 0x318   :  { %v5253_v34 = vpop.f32.mrb[16].mxu1 }
 0x319   :  { %v916_v35 = vpop.f32.mrb[17].mxu1 }
 0x31a   :  { %5265 = vmatprep.mubr.msk.f32.mxu0 %vm560_vm11, %v916_v35 }
 0x31b   :  { %5266 = vmatmul.mubr.msk.f32.vlgmr.msra.gmra.mrb[8].mxu0 %vm560_vm11, %v5253_v34 }
 0x31c   :  { %v5256_v36 = vpop.f32.mrb[18].mxu1 }
 0x31d   :  { %v926_v38 = vpop.f32.mrb[19].mxu1 }
 0x31e   :  { %5268 = vmatprep.mubr.msk.f32.mxu0 %vm560_vm11, %v926_v38 }
 0x31f   :  { %5269 = vmatmul.mubr.msk.f32.gmra.mrb[10].mxu0 %vm560_vm11, %v5256_v36 }
 0x320   :  { %v5259_v39 = vpop.f32.mrb[20].mxu1 }
 0x321   :  { %v936_v41 = vpop.f32.mrb[21].mxu1 }
 0x322   :  { %5271 = vmatprep.mubr.msk.f32.mxu0 %vm560_vm11, %v936_v41 }
 0x323   :  { %5272 = vmatmul.mubr.msk.f32.gmra.mrb[12].mxu0 %vm560_vm11, %v5259_v39  ;;  %v1138_v39 = vand.u32 15, %v7104_v31  ;;  %v7315_v31 = vsel %vm7117_vm2, 1.0, %v6678_v45  ;;  %vm7604_vm2 = vcmp.eq.s32.totalorder %v6998_v2, %v7227_v7  ;;  %v1250_v7 = vld [vmem:[#allocation9] sm:$0xff] }
 0x324   :  { %v5262_v42 = vpop.f32.mrb[22].mxu1  ;;  %v7353_v43 = vsel %vm7604_vm2, 1.0, %v6678_v45 }
 0x325   :  { %v946_v44 = vpop.f32.mrb[23].mxu1 }
 0x326   :  { %5274 = vmatprep.mubr.msk.f32.mxu0 %vm560_vm11, %v946_v44  ;;  %v1352_v44 = vld [vmem:[#allocation9 + $0x20] sm:$0xff] }
 0x327   :  { %5275 = vmatmul.mubr.msk.f32.gmra.mrb[14].mxu0 %vm560_vm11, %v5262_v42 }
 0x328   :  { %5315 = vmatprep.mubr.msk.f32.mxu0 %vm1152_vm5, %v7291_v46 }
 0x3ee   :  { %v5267_v50 = vpop.f32.mrb[8].mxu0 }
 0x3ef   :  { %v6225_v55 = vadd.f32 %v5267_v50, %v5195_v24  ;;  %v1050_v4 = vpop.f32.mrb[9].mxu0 }
 0x3f0   :  { %v6226_v56 = vadd.f32 %v1050_v4, %v655_v25  ;;  %v447_v4 = vsel %vm7124_vm3, 1.0, %v6678_v45  ;;  %vm7605_vm3 = vcmp.eq.s32.totalorder %v6998_v2, %v7232_v9  ;;  %v1252_v9 = vld [vmem:[#allocation9 + $0x10] sm:$0xff] }
 0x3f1   :  { %v1105_v57 = vadd.f32 %v6225_v55, %v4824_v54  ;;  %v1149_v55 = vsel %vm292_vm12, 1.0, %v6678_v45  ;;  %v844_v53 = vsel %vm7605_vm3, 1.0, %v6678_v45  ;;  %v2013_v2 = vld [vmem:[#allocation13 + $0x68] sm:$0xff] }
 0x3f2   :  { %v1104_v58 = vadd.f32 %v6226_v56, %v4824_v54  ;;  %v5270_v59 = vpop.f32.mrb[10].mxu0  ;;  %v1354_v56 = vld [vmem:[#allocation9 + $0x30] sm:$0xff] }
 0x3f3   :  { %vm1113_vm0 = vcmp.gt.f32.partialorder %v1105_v57, 0.0  ;;  %v1121_v60 = vmul.f32 0.2, %v1105_v57  ;;  %v6227_v61 = vadd.f32 %v5270_v59, %v5198_v26  ;;  %v1060_v62 = vpop.f32.mrb[11].mxu0  ;;  %v5628_v59 = vpack.c.bf16 %v1355_v37, %v1354_v56 }
 0x3f4   :  { %vm1112_vm10 = vcmp.gt.f32.partialorder %v1104_v58, 0.0  ;;  %v1120_v63 = vmul.f32 0.2, %v1104_v58  ;;  %v6228_v0 = vadd.f32 %v1060_v62, %v665_v27  ;;  %v1253_v62 = vld [vmem:[#allocation9 + $0x18] sm:$0xff] }
 0x3f5   :  { %v1129_v5 = vsel %vm1113_vm0, %v1105_v57, %v1121_v60  ;;  %v1107_v6 = vadd.f32 %v6227_v61, %v4824_v54  ;;  %v448_v57 = vsel %vm7137_vm4, 1.0, %v6678_v45  ;;  %v1251_v60 = vld [vmem:[#allocation9 + $0x8] sm:$0xff]  ;;  %vm1356_vm4 = vcmask 261120  }
 0x3f6   :  { %v1128_v11 = vsel %vm1112_vm10, %v1104_v58, %v1120_v63  ;;  %v1106_v12 = vadd.f32 %v6228_v0, %v4824_v54  ;;  %v5273_v13 = vpop.f32.mrb[12].mxu0  ;;  %v7342_v58 = vsel %vm834_vm15, 1.0, %v6678_v45  ;;  %v5632_v61 = vpack.c.bf16 %v1251_v60, %v1250_v7 }
 0x3f7   :  { %v7300_v14 = vpack.c.bf16 %v1129_v5, %v1128_v11  ;;  %vm1115_vm6 = vcmp.gt.f32.partialorder %v1107_v6, 0.0  ;;  %v1123_v15 = vmul.f32 0.2, %v1107_v6  ;;  %v6229_v16 = vadd.f32 %v5273_v13, %v5201_v28  ;;  %v1070_v17 = vpop.f32.mrb[13].mxu0 }
 0x3f8   :  { %vm1114_vm8 = vcmp.gt.f32.partialorder %v1106_v12, 0.0  ;;  %v1122_v18 = vmul.f32 0.2, %v1106_v12  ;;  %v6230_v19 = vadd.f32 %v1070_v17, %v675_v30 }
 0x3f9   :  { %v1131_v20 = vsel %vm1115_vm6, %v1107_v6, %v1123_v15  ;;  %v1109_v8 = vadd.f32 %v6229_v16, %v4824_v54  ;;  %5593 = vmatprep.subr.bf16.mxu1 %v7300_v14  ;;  %5609 = vmatprep.subr.bf16.mxu0 %v7300_v14  ;;  %v5636_v6 = vpack.c.bf16 %v1253_v62, %v1252_v9 }
 0x3fa   :  { %v1130_v21 = vsel %vm1114_vm8, %v1106_v12, %v1122_v18  ;;  %v1108_v22 = vadd.f32 %v6230_v19, %v4824_v54  ;;  %v5276_v23 = vpop.f32.mrb[14].mxu0  ;;  %5595 = vmatpush3.bf16.msra.mxu1 %v7300_v14  ;;  %5611 = vmatpush3.bf16.msra.mxu0 %v7300_v14  ;;  %v1650_v12 = vld [vmem:[#allocation9 + $0x48] sm:$0xff]  ;;  %v1651_v18 = vld [vmem:[#allocation9 + $0x50] sm:$0xff]  ;;  %v1652_v19 = vld [vmem:[#allocation9 + $0x58] sm:$0xff] }
 0x3fb   :  { %v5596_v24 = vpack.c.bf16 %v1131_v20, %v1130_v21  ;;  %vm1117_vm0 = vcmp.gt.f32.partialorder %v1109_v8, 0.0  ;;  %v1125_v25 = vmul.f32 0.2, %v1109_v8  ;;  %v6231_v26 = vadd.f32 %v5276_v23, %v7276_v32  ;;  %v1080_v27 = vpop.f32.mrb[15].mxu0 }
 0x3fc   :  { %vm1116_vm10 = vcmp.gt.f32.partialorder %v1108_v22, 0.0  ;;  %v1124_v28 = vmul.f32 0.2, %v1108_v22  ;;  %v6232_v30 = vadd.f32 %v1080_v27, %v7278_v33  ;;  %v5656_v16 = vpack.c.bf16 %v1650_v12, %v1649_v10 }
 0x3fd   :  { %v1133_v34 = vsel %vm1117_vm0, %v1109_v8, %v1125_v25  ;;  %v1111_v35 = vadd.f32 %v6231_v26, %v4824_v54  ;;  %5597 = vmatprep.subr.bf16.mxu1 %v5596_v24  ;;  %5613 = vmatprep.subr.bf16.mxu0 %v5596_v24  ;;  %vm1142_vm0 = vcmp.ne.s32.totalorder %v1138_v39, 0  ;;  %v5660_v20 = vpack.c.bf16 %v1652_v19, %v1651_v18 }
 0x3fe   :  { %v1132_v36 = vsel %vm1116_vm10, %v1108_v22, %v1124_v28  ;;  %v1110_v38 = vadd.f32 %v6232_v30, %v4824_v54  ;;  %5599 = vmatpush3.bf16.msra.mxu1 %v5596_v24  ;;  %5615 = vmatpush3.bf16.msra.mxu0 %v5596_v24  ;;  %v5624_v54 = vpack.c.bf16 %v1353_v47, %v1352_v44  ;;  %vm1146_vm10 = vmand %vm293_vm13, %vm1142_vm0 }
 0x3ff   :  { %v5600_v41 = vpack.c.bf16 %v1133_v34, %v1132_v36  ;;  %vm1119_vm6 = vcmp.gt.f32.partialorder %v1111_v35, 0.0  ;;  %v1127_v42 = vmul.f32 0.2, %v1111_v35  ;;  %v1150_v52 = vsel %vm1146_vm10, 1.0, %v6678_v45 }
 0x400   :  { %vm1118_vm8 = vcmp.gt.f32.partialorder %v1110_v38, 0.0  ;;  %v1126_v32 = vmul.f32 0.2, %v1110_v38 }
 0x401   :  { %v1135_v48 = vsel %vm1119_vm6, %v1111_v35, %v1127_v42  ;;  %5601 = vmatprep.subr.bf16.mxu1 %v5600_v41  ;;  %5617 = vmatprep.subr.bf16.mxu0 %v5600_v41 }
 0x402   :  { %v1134_v33 = vsel %vm1118_vm8, %v1110_v38, %v1126_v32  ;;  %5603 = vmatpush3.bf16.msra.mxu1 %v5600_v41  ;;  %5619 = vmatpush3.bf16.msra.mxu0 %v5600_v41 }
 0x403   :  { %v5604_v50 = vpack.c.bf16 %v1135_v48, %v1134_v33 }
 0x405   :  { %5605 = vmatprep.subr.bf16.mxu1 %v5604_v50  ;;  %5621 = vmatprep.subr.bf16.mxu0 %v5604_v50 }
 0x406   :  { %5607 = vmatpush3.bf16.msra.mxu1 %v5604_v50  ;;  %5623 = vmatpush3.bf16.msra.mxu0 %v5604_v50 }
 0x407   :  { %5641 = vmatprep.subr.bf16.mxu0 %v7300_v14  ;;  %5625 = vmatprep.subr.bf16.mxu1 %v5624_v54 }
 0x409   :  { %5316 = vmatmul.mubr.msk.f32.vlgmr.msra.gmra.mrb[16].mxu0 %vm1152_vm5, %v7315_v31  ;;  %5294 = vmatmul.mubr.msk.f32.vlgmr.msra.gmra.mrb[24].mxu1 %vm1152_vm5, %v1149_v55 }
 0x40a   :  { %5643 = vmatpush3.bf16.msra.mxu0 %v7300_v14  ;;  %5318 = vmatprep.mubr.msk.f32.mxu0 %vm1152_vm5, %v447_v4 }
 0x40b   :  { %5645 = vmatprep.subr.bf16.mxu0 %v5596_v24  ;;  %5296 = vmatprep.mubr.msk.f32.mxu1 %vm1152_vm5, %v1150_v52 }
 0x40c   :  { %5627 = vmatpush3.bf16.msra.mxu1 %v5624_v54 }
 0x40d   :  { %5319 = vmatmul.mubr.msk.f32.gmra.mrb[18].mxu0 %vm1152_vm5, %v448_v57  ;;  %5297 = vmatmul.mubr.msk.f32.gmra.mrb[26].mxu1 %vm1152_vm5, %v1151_v40 }
 0x40e   :  { %5647 = vmatpush3.bf16.msra.mxu0 %v5596_v24  ;;  %5365 = vmatprep.mubr.msk.f32.mxu0 %vm1152_vm5, %v7342_v58  ;;  %v1831_v24 = vand.u32 7, %v6996_v1 }
 0x40f   :  { %5649 = vmatprep.subr.bf16.mxu0 %v5600_v41  ;;  %5629 = vmatprep.subr.bf16.mxu1 %v5628_v59 }
 0x410   :  { %5631 = vmatpush3.bf16.msra.mxu1 %v5628_v59  ;;  %vm1833_vm13 = vcmp.ne.s32.totalorder %v1831_v24, 0 }
 0x411   :  { %5633 = vmatprep.subr.bf16.mxu1 %v5632_v61  ;;  %vm1835_vm14 = vmand %vm7158_vm9, %vm1833_vm13  ;;  %vm2402_vm13 = vcmask 130048  }
 0x412   :  { %5651 = vmatpush3.bf16.msra.mxu0 %v5600_v41  ;;  %v1837_v25 = vsel %vm1835_vm14, 1.0, %v6678_v45 }
 0x413   :  { %5653 = vmatprep.subr.bf16.mxu0 %v5604_v50 }
 0x416   :  { %5655 = vmatpush3.bf16.msra.mxu0 %v5604_v50 }
 0x419   :  { %5366 = vmatmul.mubr.msk.f32.vlgmr.msra.gmra.mrb[20].mxu0 %vm1152_vm5, %v7353_v43 }
 0x41a   :  { %5368 = vmatprep.mubr.msk.f32.mxu0 %vm1152_vm5, %v844_v53 }
 0x41d   :  { %5369 = vmatmul.mubr.msk.f32.gmra.mrb[22].mxu0 %vm1152_vm5, %v845_v3 }
 0x41e   :  { %5404 = vmatprep.mubr.msk.f32.mxu0 %vm1356_vm4, %v7291_v46 }
 0x4dc   :  { %v5317_v63 = vpop.f32.mrb[16].mxu0  ;;  %v5295_v0 = vpop.f32.mrb[24].mxu1 }
 0x4dd   :  { %v1332_v5 = vpop.f32.mrb[17].mxu0  ;;  %v1231_v11 = vpop.f32.mrb[25].mxu1 }
 0x4de   :  { %5329 = vmatprep.mubr.msk.f32.mxu1 %vm1356_vm4, %v1332_v5 }
 0x4df   :  { %5330 = vmatmul.mubr.msk.f32.vlgmr.msra.gmra.mrb[28].mxu1 %vm1356_vm4, %v5317_v63 }
 0x4e0   :  { %v5320_v13 = vpop.f32.mrb[18].mxu0  ;;  %5635 = vmatpush3.bf16.msra.mxu1 %v5632_v61  ;;  %v5298_v14 = vpop.f32.mrb[26].mxu1 }
 0x4e1   :  { %v1342_v15 = vpop.f32.mrb[19].mxu0  ;;  %5637 = vmatprep.subr.bf16.mxu1 %v5636_v6  ;;  %v1241_v17 = vpop.f32.mrb[27].mxu1 }
 0x4e2   :  { %5332 = vmatprep.mubr.msk.f32.mxu1 %vm1356_vm4, %v1342_v15  ;;  %v4849_v15 = vld [vmem:[#allocation10] ss:$0 sm:$0xff] }
 0x4e3   :  { %5333 = vmatmul.mubr.msk.f32.gmra.mrb[30].mxu1 %vm1356_vm4, %v5320_v13 }
 0x4e4   :  { %5639 = vmatpush3.bf16.msra.mxu1 %v5636_v6  ;;  %5343 = vmatprep.mubr.msk.f32.mxu1 %vm1356_vm4, %v1231_v11 }
 0x4e5   :  { %5657 = vmatprep.subr.bf16.mxu1 %v5656_v16 }
 0x4e7   :  { %5344 = vmatmul.mubr.msk.f32.vlgmr.msra.gmra.mrb[28].mxu1 %vm1356_vm4, %v5295_v0 }
 0x4e8   :  { %5659 = vmatpush3.bf16.msra.mxu1 %v5656_v16  ;;  %5346 = vmatprep.mubr.msk.f32.mxu1 %vm1356_vm4, %v1241_v17 }
 0x4e9   :  { %5661 = vmatprep.subr.bf16.mxu1 %v5660_v20 }
 0x4eb   :  { %5347 = vmatmul.mubr.msk.f32.gmra.mrb[30].mxu1 %vm1356_vm4, %v5298_v14 }
 0x4ec   :  { %v5367_v8 = vpop.f32.mrb[20].mxu0  ;;  %5663 = vmatpush3.bf16.msra.mxu1 %v5660_v20  ;;  %v4850_v20 = vld [vmem:[#allocation12] ss:$0 sm:$0xff] }
 0x4ed   :  { %v1629_v21 = vpop.f32.mrb[21].mxu0 }
 0x4ee   :  { %5379 = vmatprep.mubr.msk.f32.mxu1 %vm1356_vm4, %v1629_v21 }
 0x4ef   :  { %5380 = vmatmul.mubr.msk.f32.vlgmr.msra.gmra.mrb[28].mxu1 %vm1356_vm4, %v5367_v8 }
 0x4f0   :  { %v5370_v22 = vpop.f32.mrb[22].mxu0 }
 0x4f1   :  { %v1639_v23 = vpop.f32.mrb[23].mxu0 }
 0x4f2   :  { %5382 = vmatprep.mubr.msk.f32.mxu1 %vm1356_vm4, %v1639_v23 }
 0x4f3   :  { %5383 = vmatmul.mubr.msk.f32.gmra.mrb[30].mxu1 %vm1356_vm4, %v5370_v22 }
 0x4f4   :  { %5393 = vmatprep.mubr.msk.f32.mxu1 %vm1356_vm4, %v1837_v25 }
 0x5c2   :  { %v5381_v26 = vpop.f32.mrb[28].mxu1 }
 0x5c3   :  { %v1755_v27 = vsel %vm1152_vm5, %v5381_v26, 0.0  ;;  %v1731_v28 = vpop.f32.mrb[29].mxu1 }
 0x5c4   :  { %v1754_v30 = vsel %vm1152_vm5, %v1731_v28, 0.0 }
 0x5c5   :  { %v1756_v34 = vadd.f32 %v1755_v27, %v1754_v30 }
 0x5c6   :  { %v5384_v35 = vpop.f32.mrb[30].mxu1 }
 0x5c7   :  { %v1741_v36 = vpop.f32.mrb[31].mxu1  ;;  %v1759_v41 = vsel %vm1152_vm5, %v5384_v35, 0.0 }
 0x5c8   :  { %v1757_v38 = vsel %vm1152_vm5, %v1741_v36, 0.0 }
 0x5c9   :  { %v1758_v39 = vadd.f32 %v1757_v38, %v1756_v34 }
 0x5cb   :  { %v1760_v42 = vadd.f32 %v1759_v41, %v1758_v39 }
 0x5cd   :  { %v1761_v32 = vrot.slane %v1760_v42, 4 }
 0x5cf   :  { %v1762_v44 = vadd.f32 %v1761_v32, %v1760_v42 }
 0x5d1   :  { %v1763_v47 = vrot.slane %v1762_v44, 2 }
 0x5d3   :  { %v1764_v48 = vadd.f32 %v1763_v47, %v1762_v44  ;;  %v2008_v47 = vld [vmem:[#allocation13 + $0x40] sm:$0xff] }
 0x5d5   :  { %v1765_v33 = vrot.slane %v1764_v48, 1 }
 0x5d7   :  { %v1766_v50 = vadd.f32 %v1765_v33, %v1764_v48  ;;  %v2009_v48 = vld [vmem:[#allocation13 + $0x48] sm:$0xff]  ;;  %v2010_v33 = vld [vmem:[#allocation13 + $0x50] sm:$0xff] }
 0x5d9   :  { %v1768_v54 = vmul.f32 0.03125, %v1766_v50  ;;  %v2011_v50 = vld [vmem:[#allocation13 + $0x58] sm:$0xff] }
 0x5db   :  { %v1769_v55 = vsub.f32 %v1731_v28, %v1768_v54  ;;  %v1770_v4 = vsub.f32 %v5381_v26, %v1768_v54  ;;  %v1771_v52 = vsub.f32 %v1741_v36, %v1768_v54  ;;  %v1772_v56 = vsub.f32 %v5384_v35, %v1768_v54 }
 0x5dc   :  { %v1832_v28 = vand.u32 7, %v7097_v29  ;;  %v5680_v29 = vpack.c.bf16 %v2009_v48, %v2008_v47 }
 0x5dd   :  { %v1773_v37 = vmul.f32 %v1769_v55, %v1769_v55  ;;  %v1774_v57 = vmul.f32 %v1770_v4, %v1770_v4  ;;  %v1775_v40 = vmul.f32 %v1771_v52, %v1771_v52  ;;  %v1776_v59 = vmul.f32 %v1772_v56, %v1772_v56 }
 0x5de   :  { %vm1834_vm0 = vcmp.ne.s32.totalorder %v1832_v28, 0 }
 0x5df   :  { %v1777_v53 = vsel %vm1152_vm5, %v1773_v37, 0.0  ;;  %v1778_v3 = vsel %vm1152_vm5, %v1774_v57, 0.0  ;;  %v1780_v60 = vsel %vm1152_vm5, %v1775_v40, 0.0  ;;  %v1782_v9 = vsel %vm1152_vm5, %v1776_v59, 0.0  ;;  %vm1836_vm10 = vmand %vm292_vm12, %vm1834_vm0  ;;  %v1921_v57 = vld [vmem:[#allocation13 + $0x8] sm:$0xff]  ;;  %v1922_v59 = vld [vmem:[#allocation13 + $0x10] sm:$0xff] }
 0x5e0   :  { %v1779_v7 = vadd.f32 %v1778_v3, %v1777_v53  ;;  %v1838_v54 = vsel %vm1836_vm10, 1.0, %v6678_v45  ;;  %v1923_v53 = vld [vmem:[#allocation13 + $0x18] sm:$0xff]  ;;  %vm6680_vm12 = vmmov 0  }
 0x5e2   :  { %v1781_v61 = vadd.f32 %v1780_v60, %v1779_v7 }
 0x5e4   :  { %v1783_v62 = vadd.f32 %v1782_v9, %v1781_v61  ;;  %v5700_v61 = vpack.c.bf16 %v1923_v53, %v1922_v59 }
 0x5e6   :  { %v1784_v63 = vrot.slane %v1783_v62, 4 }
 0x5e8   :  { %v1785_v0 = vadd.f32 %v1784_v63, %v1783_v62  ;;  %v1924_v62 = vld [vmem:[#allocation13 + $0x20] sm:$0xff]  ;;  %v1925_v63 = vld [vmem:[#allocation13 + $0x28] sm:$0xff] }
 0x5ea   :  { %v1786_v5 = vrot.slane %v1785_v0, 2 }
 0x5ec   :  { %v1787_v6 = vadd.f32 %v1786_v5, %v1785_v0  ;;  %v1926_v0 = vld [vmem:[#allocation13 + $0x30] sm:$0xff]  ;;  %v1927_v5 = vld [vmem:[#allocation13 + $0x38] sm:$0xff] }
 0x5ee   :  { %v1788_v11 = vrot.slane %v1787_v6, 1 }
 0x5f0   :  { %v1789_v10 = vadd.f32 %v1788_v11, %v1787_v6  ;;  %v5708_v11 = vpack.c.bf16 %v1927_v5, %v1926_v0  ;;  %v2581_v5 = vld [vmem:[#allocation18 + $0x100] sm:$0xff] }
 0x5f2   :  { %v1790_v12 = vmul.f32 0.03125, %v1789_v10 }
 0x5f4   :  { %v1791_v13 = vadd.f32 0.8, %v1790_v12  ;;  %v2258_v12 = vld [vmem:[#allocation13 + $0x80] sm:$0xff] }
 0x5f6   :  { %6292 = vrsqrt.f32 %v1791_v13  ;;  %v2259_v13 = vld [vmem:[#allocation13 + $0x88] sm:$0xff] }
 0x600   :  { %v6293_v14 = vpop.eup %6292 }
 0x601   :  { %v1793_v16 = vmul.f32 %v6293_v14, %v1769_v55  ;;  %v1794_v17 = vmul.f32 %v6293_v14, %v1770_v4  ;;  %v1795_v18 = vmul.f32 %v6293_v14, %v1771_v52  ;;  %v1796_v19 = vmul.f32 %v6293_v14, %v1772_v56  ;;  %v2012_v4 = vld [vmem:[#allocation13 + $0x60] sm:$0xff]  ;;  %v2014_v52 = vld [vmem:[#allocation13 + $0x70] sm:$0xff]  ;;  %v2015_v56 = vld [vmem:[#allocation13 + $0x78] sm:$0xff] }
 0x602   :  { %v5684_v55 = vpack.c.bf16 %v2011_v50, %v2010_v33  ;;  %v5688_v51 = vpack.c.bf16 %v2013_v2, %v2012_v4  ;;  %v5692_v37 = vpack.c.bf16 %v2015_v56, %v2014_v52  ;;  %v5720_v14 = vpack.c.bf16 %v2259_v13, %v2258_v12 }
 0x603   :  { %v1804_v8 = vmul.f32 %v4849_v15, %v1793_v16  ;;  %v1805_v21 = vmul.f32 %v4849_v15, %v1794_v17  ;;  %v1806_v22 = vmul.f32 %v4849_v15, %v1795_v18  ;;  %v1807_v23 = vmul.f32 %v4849_v15, %v1796_v19  ;;  %v2260_v15 = vld [vmem:[#allocation13 + $0x90] sm:$0xff]  ;;  %v2261_v16 = vld [vmem:[#allocation13 + $0x98] sm:$0xff]  ;;  %v2262_v18 = vld [vmem:[#allocation13 + $0xa0] sm:$0xff] }
 0x604   :  { %v5724_v17 = vpack.c.bf16 %v2261_v16, %v2260_v15  ;;  %v2263_v19 = vld [vmem:[#allocation13 + $0xa8] sm:$0xff]  ;;  %v2587_v15 = vld [vmem:[#allocation18 + $0x130] sm:$0xff] }
 0x605   :  { %v1815_v24 = vadd.f32 %v4850_v20, %v1804_v8  ;;  %v1816_v25 = vadd.f32 %v4850_v20, %v1805_v21  ;;  %v1817_v26 = vadd.f32 %v4850_v20, %v1806_v22  ;;  %v1818_v27 = vadd.f32 %v4850_v20, %v1807_v23  ;;  %v2264_v8 = vld [vmem:[#allocation13 + $0xb0] sm:$0xff]  ;;  %v2265_v21 = vld [vmem:[#allocation13 + $0xb8] sm:$0xff] }
 0x606   :  { %v5728_v20 = vpack.c.bf16 %v2263_v19, %v2262_v18  ;;  %v5732_v22 = vpack.c.bf16 %v2265_v21, %v2264_v8  ;;  %v6679_v23 = vmov 0.0|0.0   ;;  %v2590_v16 = vld [vmem:[#allocation18 + $0x148] sm:$0xff]  ;;  %v2591_v8 = vld [vmem:[#allocation18 + $0x150] sm:$0xff] }
 0x607   :  { %vm1819_vm15 = vcmp.gt.f32.partialorder %v1815_v24, 0.0  ;;  %vm1820_vm7 = vcmp.gt.f32.partialorder %v1816_v25, 0.0  ;;  %vm1821_vm6 = vcmp.gt.f32.partialorder %v1817_v26, 0.0  ;;  %vm1822_vm8 = vcmp.gt.f32.partialorder %v1818_v27, 0.0  ;;  %v2594_v21 = vld [vmem:[#allocation18 + $0x168] sm:$0xff] }
 0x608   :  { %v1823_v30 = vmul.f32 0.2, %v1815_v24  ;;  %v1824_v34 = vmul.f32 0.2, %v1816_v25  ;;  %v1825_v35 = vmul.f32 0.2, %v1817_v26 }
 0x609   :  { %v1826_v36 = vmul.f32 0.2, %v1818_v27 }
 0x60a   :  { %v1829_v38 = vsel %vm1821_vm6, %v1817_v26, %v1825_v35  ;;  %v1827_v39 = vsel %vm1819_vm15, %v1815_v24, %v1823_v30  ;;  %v1828_v41 = vsel %vm1820_vm7, %v1816_v25, %v1824_v34 }
 0x60b   :  { %v1830_v42 = vsel %vm1822_vm8, %v1818_v27, %v1826_v36  ;;  %v5664_v32 = vpack.c.bf16 %v1828_v41, %v1827_v39  ;;  %vm3010_vm8 = vcmask 64512  }
 0x60c   :  { %v5668_v44 = vpack.c.bf16 %v1830_v42, %v1829_v38 }
 0x60d   :  { %5665 = vmatprep.subr.bf16.mxu1 %v5664_v32  ;;  %5673 = vmatprep.subr.bf16.mxu0 %v5664_v32 }
 0x60e   :  { %5667 = vmatpush3.bf16.msra.mxu1 %v5664_v32  ;;  %5675 = vmatpush3.bf16.msra.mxu0 %v5664_v32 }
 0x60f   :  { %5669 = vmatprep.subr.bf16.mxu1 %v5668_v44  ;;  %5677 = vmatprep.subr.bf16.mxu0 %v5668_v44 }
 0x612   :  { %5671 = vmatpush3.bf16.msra.mxu1 %v5668_v44  ;;  %5679 = vmatpush3.bf16.msra.mxu0 %v5668_v44 }
 0x613   :  { %5713 = vmatprep.subr.bf16.mxu0 %v5664_v32  ;;  %5681 = vmatprep.subr.bf16.mxu1 %v5680_v29 }
 0x615   :  { %5405 = vmatmul.mubr.msk.f32.vlgmr.msra.gmra.mrb[24].mxu0 %vm1356_vm4, %v7315_v31  ;;  %5394 = vmatmul.mubr.msk.f32.vlgmr.msra.gmra.mrb[32].mxu1 %vm1356_vm4, %v1838_v54  ;;  %v1920_v31 = vld [vmem:[#allocation13] sm:$0xff] }
 0x616   :  { %5715 = vmatpush3.bf16.msra.mxu0 %v5664_v32  ;;  %5453 = vmatprep.mubr.msk.f32.mxu0 %vm1356_vm4, %v7342_v58  ;;  %v5696_v40 = vpack.c.bf16 %v1921_v57, %v1920_v31  ;;  %v2398_v31 = vand.u32 3, %v6996_v1 }
 0x617   :  { %5717 = vmatprep.subr.bf16.mxu0 %v5668_v44  ;;  %5683 = vmatpush3.bf16.msra.mxu1 %v5680_v29 }
 0x618   :  { %5685 = vmatprep.subr.bf16.mxu1 %v5684_v55 }
 0x61a   :  { %5719 = vmatpush3.bf16.msra.mxu0 %v5668_v44 }
 0x61b   :  { %5687 = vmatpush3.bf16.msra.mxu1 %v5684_v55  ;;  %5736 = vmatprep.subr.bf16.mxu0 %v6679_v23 }
 0x61c   :  { %5689 = vmatprep.subr.bf16.mxu1 %v5688_v51 }
 0x61d   :  { %5454 = vmatmul.mubr.msk.f32.vlgmr.msra.gmra.mrb[26].mxu0 %vm1356_vm4, %v7353_v43  ;;  %v5704_v43 = vpack.c.bf16 %v1925_v63, %v1924_v62  ;;  %v2582_v62 = vld [vmem:[#allocation18 + $0x108] sm:$0xff]  ;;  %v2584_v63 = vld [vmem:[#allocation18 + $0x118] sm:$0xff] }
 0x61e   :  { %5479 = vmatprep.mubr.msk.f32.mxu0 %vm6680_vm12, %v6678_v45  ;;  %v5742_v0 = vpack.c.bf16 %v2584_v63, %v2582_v62 }
 0x61f   :  { %5691 = vmatpush3.bf16.msra.mxu1 %v5688_v51  ;;  %v4863_v51 = vld [vmem:[#allocation15] ss:$0 sm:$0xff] }
 0x620   :  { %5693 = vmatprep.subr.bf16.mxu1 %v5692_v37 }
 0x623   :  { %5695 = vmatpush3.bf16.msra.mxu1 %v5692_v37  ;;  %v4864_v37 = vld [vmem:[#allocation16] ss:$0 sm:$0xff] }
 0x624   :  { %5697 = vmatprep.subr.bf16.mxu1 %v5696_v40 }
 0x6e8   :  { %v5406_v3 = vpop.f32.mrb[24].mxu0  ;;  %v5395_v7 = vpop.f32.mrb[32].mxu1 }
 0x6e9   :  { %v1998_v60 = vpop.f32.mrb[25].mxu0  ;;  %v1911_v9 = vpop.f32.mrb[33].mxu1 }
 0x6ea   :  { %5423 = vmatprep.mubr.msk.f32.mxu1 %vm1152_vm5, %v1998_v60 }
 0x6eb   :  { %5424 = vmatmul.mubr.msk.f32.vlgmr.msra.gmra.mrb[34].mxu1 %vm1152_vm5, %v5406_v3 }
 0x6ec   :  { %5699 = vmatpush3.bf16.msra.mxu1 %v5696_v40  ;;  %5442 = vmatprep.mubr.msk.f32.mxu1 %vm1152_vm5, %v1911_v9 }
 0x6ed   :  { %5701 = vmatprep.subr.bf16.mxu1 %v5700_v61 }
 0x6f0   :  { %5703 = vmatpush3.bf16.msra.mxu1 %v5700_v61  ;;  %v5455_v6 = vpop.f32.mrb[26].mxu0 }
 0x6f1   :  { %5705 = vmatprep.subr.bf16.mxu1 %v5704_v43  ;;  %v2248_v10 = vpop.f32.mrb[27].mxu0 }
 0x6f4   :  { %5707 = vmatpush3.bf16.msra.mxu1 %v5704_v43 }
 0x6f5   :  { %5709 = vmatprep.subr.bf16.mxu1 %v5708_v11 }
 0x6f8   :  { %5711 = vmatpush3.bf16.msra.mxu1 %v5708_v11  ;;  %v2586_v11 = vld [vmem:[#allocation18 + $0x128] sm:$0xff] }
 0x6f9   :  { %5721 = vmatprep.subr.bf16.mxu1 %v5720_v14 }
 0x6fb   :  { %5443 = vmatmul.mubr.msk.f32.vlgmr.msra.gmra.mrb[34].mxu1 %vm1152_vm5, %v5395_v7 }
 0x6fc   :  { %5723 = vmatpush3.bf16.msra.mxu1 %v5720_v14  ;;  %5472 = vmatprep.mubr.msk.f32.mxu1 %vm1152_vm5, %v2248_v10  ;;  %v2588_v10 = vld [vmem:[#allocation18 + $0x138] sm:$0xff]  ;;  %v2585_v14 = vld [vmem:[#allocation18 + $0x120] sm:$0xff] }
 0x6fd   :  { %5725 = vmatprep.subr.bf16.mxu1 %v5724_v17  ;;  %v5746_v13 = vpack.c.bf16 %v2588_v10, %v2586_v11  ;;  %v5748_v18 = vpack.c.bf16 %v2587_v15, %v2585_v14  ;;  %v2485_v11 = vld [vmem:[#allocation18 + $0x48] sm:$0xff]  ;;  %v2487_v10 = vld [vmem:[#allocation18 + $0x58] sm:$0xff]  ;;  %v2484_v15 = vld [vmem:[#allocation18 + $0x40] sm:$0xff] }
 0x6fe   :  { %v5782_v14 = vpack.c.bf16 %v2487_v10, %v2485_v11 }
 0x700   :  { %5727 = vmatpush3.bf16.msra.mxu1 %v5724_v17  ;;  %v2592_v17 = vld [vmem:[#allocation18 + $0x158] sm:$0xff] }
 0x701   :  { %5729 = vmatprep.subr.bf16.mxu1 %v5728_v20  ;;  %v5750_v19 = vpack.c.bf16 %v2592_v17, %v2590_v16  ;;  %v2486_v16 = vld [vmem:[#allocation18 + $0x50] sm:$0xff]  ;;  %v2489_v17 = vld [vmem:[#allocation18 + $0x68] sm:$0xff] }
 0x704   :  { %5731 = vmatpush3.bf16.msra.mxu1 %v5728_v20  ;;  %v2589_v20 = vld [vmem:[#allocation18 + $0x140] sm:$0xff] }
 0x705   :  { %5733 = vmatprep.subr.bf16.mxu1 %v5732_v22 }
 0x708   :  { %5735 = vmatpush3.bf16.msra.mxu1 %v5732_v22  ;;  %v2596_v22 = vld [vmem:[#allocation18 + $0x178] sm:$0xff] }
 0x709   :  { %5806 = vmatprep.subr.bf16.mxu1 %v6679_v23 }
 0x70b   :  { %5473 = vmatmul.mubr.msk.f32.vlgmr.msra.gmra.mrb[34].mxu1 %vm1152_vm5, %v5455_v6  ;;  %vm2399_vm5 = vcmp.ne.s32.totalorder %v2398_v31, 0  ;;  %v2583_v6 = vld [vmem:[#allocation18 + $0x110] sm:$0xff]  ;;  %v2477_v31 = vld [vmem:[#allocation18 + $0x8] sm:$0xff] }
 0x70c   :  { %5493 = vmatprep.mubr.msk.f32.mxu1 %vm6680_vm12, %v6678_v45  ;;  %vm2400_vm4 = vmand %vm7158_vm9, %vm2399_vm5  ;;  %v5744_v12 = vpack.c.bf16 %v2583_v6, %v2581_v5  ;;  %v2482_v5 = vld [vmem:[#allocation18 + $0x30] sm:$0xff]  ;;  %vm4751_vm5 = vcmask 1024  }
 0x70d   :  { %v2401_v43 = vsel %vm2400_vm4, 1.0, %v6678_v45 }
 0x7de   :  { %v5474_v24 = vpop.f32.mrb[34].mxu1 }
 0x7df   :  { %v2338_v25 = vpop.f32.mrb[35].mxu1 }
 0x7e0   :  { %v2349_v26 = vadd.f32 %v5474_v24, %v2338_v25 }
 0x7e2   :  { %v2350_v27 = vrot.slane %v2349_v26, 4 }
 0x7e4   :  { %v2351_v28 = vadd.f32 %v2350_v27, %v2349_v26  ;;  %v2595_v26 = vld [vmem:[#allocation18 + $0x170] sm:$0xff]  ;;  %v2598_v27 = vld [vmem:[#allocation18 + $0x188] sm:$0xff] }
 0x7e6   :  { %v2352_v30 = vrot.slane %v2351_v28, 2 }
 0x7e8   :  { %v2353_v34 = vadd.f32 %v2352_v30, %v2351_v28  ;;  %v2600_v28 = vld [vmem:[#allocation18 + $0x198] sm:$0xff] }
 0x7ea   :  { %v2354_v35 = vrot.slane %v2353_v34, 1 }
 0x7ec   :  { %v2355_v36 = vadd.f32 %v2354_v35, %v2353_v34  ;;  %v5758_v34 = vpack.c.bf16 %v2600_v28, %v2598_v27  ;;  %v2597_v35 = vld [vmem:[#allocation18 + $0x180] sm:$0xff]  ;;  %v2494_v27 = vld [vmem:[#allocation18 + $0x90] sm:$0xff]  ;;  %v2497_v28 = vld [vmem:[#allocation18 + $0xa8] sm:$0xff] }
 0x7ee   :  { %v2357_v38 = vmul.f32 0.0625, %v2355_v36  ;;  %v2599_v36 = vld [vmem:[#allocation18 + $0x190] sm:$0xff] }
 0x7f0   :  { %v2358_v39 = vsub.f32 %v2338_v25, %v2357_v38  ;;  %v2359_v41 = vsub.f32 %v5474_v24, %v2357_v38  ;;  %v5754_v24 = vpack.c.bf16 %v2596_v22, %v2594_v21  ;;  %v2593_v25 = vld [vmem:[#allocation18 + $0x160] sm:$0xff]  ;;  %v2602_v38 = vld [vmem:[#allocation18 + $0x1a8] sm:$0xff]  ;;  %v2490_v21 = vld [vmem:[#allocation18 + $0x70] sm:$0xff] }
 0x7f1   :  { %v5756_v30 = vpack.c.bf16 %v2595_v26, %v2593_v25  ;;  %v2493_v22 = vld [vmem:[#allocation18 + $0x88] sm:$0xff]  ;;  %v2492_v26 = vld [vmem:[#allocation18 + $0x80] sm:$0xff] }
 0x7f2   :  { %v2360_v42 = vmul.f32 %v2358_v39, %v2358_v39  ;;  %v2361_v32 = vmul.f32 %v2359_v41, %v2359_v41 }
 0x7f4   :  { %v2362_v44 = vadd.f32 %v2361_v32, %v2360_v42  ;;  %v2601_v32 = vld [vmem:[#allocation18 + $0x1a0] sm:$0xff] }
 0x7f6   :  { %v2363_v47 = vrot.slane %v2362_v44, 4 }
 0x7f8   :  { %v2364_v48 = vadd.f32 %v2363_v47, %v2362_v44  ;;  %v2603_v44 = vld [vmem:[#allocation18 + $0x1b0] sm:$0xff]  ;;  %v2606_v47 = vld [vmem:[#allocation18 + $0x1c8] sm:$0xff] }
 0x7fa   :  { %v2365_v29 = vrot.slane %v2364_v48, 2 }
 0x7fc   :  { %v2366_v33 = vadd.f32 %v2365_v29, %v2364_v48  ;;  %v2608_v48 = vld [vmem:[#allocation18 + $0x1d8] sm:$0xff]  ;;  %v5764_v29 = vpack.c.bf16 %v2603_v44, %v2601_v32  ;;  %v2500_v44 = vld [vmem:[#allocation18 + $0xc0] sm:$0xff] }
 0x7fe   :  { %v2367_v50 = vrot.slane %v2366_v33, 1 }
 0x800   :  { %v2368_v54 = vadd.f32 %v2367_v50, %v2366_v33  ;;  %v5766_v33 = vpack.c.bf16 %v2608_v48, %v2606_v47  ;;  %v2605_v50 = vld [vmem:[#allocation18 + $0x1c0] sm:$0xff]  ;;  %v2502_v47 = vld [vmem:[#allocation18 + $0xd0] sm:$0xff]  ;;  %v2505_v48 = vld [vmem:[#allocation18 + $0xe8] sm:$0xff] }
 0x802   :  { %v2369_v55 = vmul.f32 0.0625, %v2368_v54  ;;  %v2607_v54 = vld [vmem:[#allocation18 + $0x1d0] sm:$0xff] }
 0x804   :  { %v2370_v4 = vadd.f32 0.8, %v2369_v55  ;;  %v5768_v55 = vpack.c.bf16 %v2607_v54, %v2605_v50  ;;  %v2504_v54 = vld [vmem:[#allocation18 + $0xe0] sm:$0xff] }
 0x806   :  { %6294 = vrsqrt.f32 %v2370_v4  ;;  %v2610_v4 = vld [vmem:[#allocation18 + $0x1e8] sm:$0xff] }
 0x810   :  { %v6295_v2 = vpop.eup %6294 }
 0x811   :  { %v2372_v52 = vmul.f32 %v6295_v2, %v2358_v39  ;;  %v2373_v56 = vmul.f32 %v6295_v2, %v2359_v41  ;;  %v2604_v39 = vld [vmem:[#allocation18 + $0x1b8] sm:$0xff]  ;;  %v5760_v41 = vpack.c.bf16 %v2599_v36, %v2597_v35  ;;  %v2496_v36 = vld [vmem:[#allocation18 + $0xa0] sm:$0xff] }
 0x812   :  { %v5762_v42 = vpack.c.bf16 %v2604_v39, %v2602_v38  ;;  %v2612_v2 = vld [vmem:[#allocation18 + $0x1f8] sm:$0xff]  ;;  %v2498_v38 = vld [vmem:[#allocation18 + $0xb0] sm:$0xff]  ;;  %v2501_v39 = vld [vmem:[#allocation18 + $0xc8] sm:$0xff] }
 0x813   :  { %v2381_v57 = vmul.f32 %v4863_v51, %v2372_v52  ;;  %v2382_v40 = vmul.f32 %v4863_v51, %v2373_v56  ;;  %v5770_v51 = vpack.c.bf16 %v2612_v2, %v2610_v4  ;;  %v2609_v52 = vld [vmem:[#allocation18 + $0x1e0] sm:$0xff]  ;;  %v2611_v56 = vld [vmem:[#allocation18 + $0x1f0] sm:$0xff]  ;;  %v2829_v4 = vld [vmem:[#allocation18 + $0x208] sm:$0xff] }
 0x814   :  { %v2831_v2 = vld [vmem:[#allocation18 + $0x218] sm:$0xff] }
 0x815   :  { %v2390_v59 = vadd.f32 %v4864_v37, %v2381_v57  ;;  %v2391_v53 = vadd.f32 %v4864_v37, %v2382_v40  ;;  %v5772_v37 = vpack.c.bf16 %v2611_v56, %v2609_v52  ;;  %v2479_v57 = vld [vmem:[#allocation18 + $0x18] sm:$0xff]  ;;  %v5809_v52 = vpack.c.bf16 %v2831_v2, %v2829_v4  ;;  %v2828_v56 = vld [vmem:[#allocation18 + $0x200] sm:$0xff] }
 0x816   :  { %v5774_v40 = vpack.c.bf16 %v2479_v57, %v2477_v31  ;;  %v2833_v31 = vld [vmem:[#allocation18 + $0x228] sm:$0xff]  ;;  %v2835_v57 = vld [vmem:[#allocation18 + $0x238] sm:$0xff] }
 0x817   :  { %v2394_v3 = vmul.f32 0.2, %v2390_v59  ;;  %vm2392_vm2 = vcmp.gt.f32.partialorder %v2390_v59, 0.0  ;;  %vm2393_vm3 = vcmp.gt.f32.partialorder %v2391_v53, 0.0  ;;  %v2395_v7 = vmul.f32 0.2, %v2391_v53 }
 0x818   :  { %v3297_v4 = vld [vmem:[#allocation22 + $0x450] sm:$0xff] }
 0x819   :  { %v2396_v60 = vsel %vm2392_vm2, %v2390_v59, %v2394_v3  ;;  %v2397_v61 = vsel %vm2393_vm3, %v2391_v53, %v2395_v7  ;;  %v2476_v59 = vld [vmem:[#allocation18] sm:$0xff]  ;;  %v2478_v53 = vld [vmem:[#allocation18 + $0x10] sm:$0xff]  ;;  %v2481_v7 = vld [vmem:[#allocation18 + $0x28] sm:$0xff] }
 0x81a   :  { %v5737_v9 = vpack.c.bf16 %v2397_v61, %v2396_v60  ;;  %v2483_v60 = vld [vmem:[#allocation18 + $0x38] sm:$0xff]  ;;  %v5776_v63 = vpack.c.bf16 %v2478_v53, %v2476_v59  ;;  %v5813_v59 = vpack.c.bf16 %v2835_v57, %v2833_v31  ;;  %v2832_v53 = vld [vmem:[#allocation18 + $0x220] sm:$0xff] }
 0x81b   :  { %v3301_v2 = vld [vmem:[#allocation22 + $0x470] sm:$0xff] }
 0x81c   :  { %5738 = vmatpush3.bf16.msra.mxu0 %v5737_v9  ;;  %5808 = vmatpush3.bf16.msra.mxu1 %v5737_v9  ;;  %v3309_v31 = vld [vmem:[#allocation22 + $0x4b0] sm:$0xff] }
 0x81d   :  { %5739 = vmatprep.subr.bf16.mxu0 %v6679_v23  ;;  %v5752_v23 = vpack.c.bf16 %v2591_v8, %v2589_v20  ;;  %v2488_v8 = vld [vmem:[#allocation18 + $0x60] sm:$0xff] }
 0x81f   :  { %5480 = vmatmul.mubr.msk.f32.vlgmr.msra.gmra.mrb[28].mxu0 %vm2402_vm13, %v2401_v43  ;;  %5494 = vmatmul.mubr.msk.f32.vlgmr.msra.gmra.mrb[36].mxu1 %vm2402_vm13, %v7342_v58  ;;  %v5778_v43 = vpack.c.bf16 %v2483_v60, %v2481_v7  ;;  %v2834_v7 = vld [vmem:[#allocation18 + $0x230] sm:$0xff]  ;;  %v2837_v60 = vld [vmem:[#allocation18 + $0x248] sm:$0xff] }
 0x820   :  { %5741 = vmatpush3.bf16.msra.mxu0 %v5737_v9  ;;  %5486 = vmatprep.mubr.msk.f32.mxu0 %vm6680_vm12, %v6678_v45 }
 0x821   :  { %5743 = vmatprep.subr.bf16.mxu0 %v5742_v0  ;;  %3078 = vmatprep.mubr.f32.mxu1 %v6678_v45  ;;  %v2480_v0 = vld [vmem:[#allocation18 + $0x20] sm:$0xff] }
 0x823   :  { %5487 = vmatmul.mubr.msk.f32.vlgmr.msra.gmra.mrb[30].mxu0 %vm2402_vm13, %v7291_v46 }
 0x824   :  { %5745 = vmatpush1.bf16.msra.mxu0 %v5744_v12  ;;  %2677 = vmatprep.mubr.f32.mxu0 %v6678_v45 }
 0x825   :  { %5747 = vmatprep.subr.bf16.mxu0 %v5746_v13  ;;  %v5780_v13 = vpack.c.bf16 %v2482_v5, %v2480_v0  ;;  %v2838_v0 = vld [vmem:[#allocation18 + $0x250] sm:$0xff]  ;;  %v2841_v5 = vld [vmem:[#allocation18 + $0x268] sm:$0xff] }
 0x828   :  { %5749 = vmatpush1.bf16.msra.mxu0 %v5748_v18  ;;  %v2491_v18 = vld [vmem:[#allocation18 + $0x78] sm:$0xff] }
 0x829   :  { %5751 = vmatprep.subr.bf16.mxu0 %v5750_v19  ;;  %v5784_v19 = vpack.c.bf16 %v2486_v16, %v2484_v15  ;;  %v5786_v20 = vpack.c.bf16 %v2491_v18, %v2489_v17  ;;  %v2847_v15 = vld [vmem:[#allocation18 + $0x298] sm:$0xff]  ;;  %v2844_v17 = vld [vmem:[#allocation18 + $0x280] sm:$0xff]  ;;  %v2846_v18 = vld [vmem:[#allocation18 + $0x290] sm:$0xff] }
 0x82c   :  { %5753 = vmatpush1.bf16.msra.mxu0 %v5752_v23  ;;  %v2495_v23 = vld [vmem:[#allocation18 + $0x98] sm:$0xff] }
 0x82d   :  { %5755 = vmatprep.subr.bf16.mxu0 %v5754_v24  ;;  %v5788_v24 = vpack.c.bf16 %v2490_v21, %v2488_v8  ;;  %v5790_v25 = vpack.c.bf16 %v2495_v23, %v2493_v22  ;;  %v5827_v8 = vpack.c.bf16 %v2846_v18, %v2844_v17  ;;  %v2848_v22 = vld [vmem:[#allocation18 + $0x2a0] sm:$0xff]  ;;  %v2850_v23 = vld [vmem:[#allocation18 + $0x2b0] sm:$0xff] }
 0x82e   :  { %v3337_v18 = vld [vmem:[#allocation22 + $0x590] sm:$0xff] }
 0x830   :  { %5757 = vmatpush1.bf16.msra.mxu0 %v5756_v30  ;;  %v2499_v30 = vld [vmem:[#allocation18 + $0xb8] sm:$0xff] }
 0x831   :  { %5759 = vmatprep.subr.bf16.mxu0 %v5758_v34  ;;  %v5792_v34 = vpack.c.bf16 %v2494_v27, %v2492_v26  ;;  %v5794_v35 = vpack.c.bf16 %v2499_v30, %v2497_v28  ;;  %v5831_v26 = vpack.c.bf16 %v2850_v23, %v2848_v22  ;;  %v2852_v28 = vld [vmem:[#allocation18 + $0x2c0] sm:$0xff]  ;;  %v2854_v30 = vld [vmem:[#allocation18 + $0x2d0] sm:$0xff] }
 0x832   :  { %v3345_v23 = vld [vmem:[#allocation22 + $0x5d0] sm:$0xff] }
 0x834   :  { %5761 = vmatpush1.bf16.msra.mxu0 %v5760_v41  ;;  %v2503_v41 = vld [vmem:[#allocation18 + $0xd8] sm:$0xff] }
 0x835   :  { %5763 = vmatprep.subr.bf16.mxu0 %v5762_v42  ;;  %v5796_v42 = vpack.c.bf16 %v2498_v38, %v2496_v36  ;;  %v5798_v32 = vpack.c.bf16 %v2503_v41, %v2501_v39  ;;  %v5835_v36 = vpack.c.bf16 %v2854_v30, %v2852_v28  ;;  %v2856_v39 = vld [vmem:[#allocation18 + $0x2e0] sm:$0xff]  ;;  %v2858_v41 = vld [vmem:[#allocation18 + $0x2f0] sm:$0xff] }
 0x836   :  { %v3353_v30 = vld [vmem:[#allocation22 + $0x610] sm:$0xff] }
 0x838   :  { %5765 = vmatpush1.bf16.msra.mxu0 %v5764_v29  ;;  %v2507_v29 = vld [vmem:[#allocation18 + $0xf8] sm:$0xff] }
 0x839   :  { %5767 = vmatprep.subr.bf16.mxu0 %v5766_v33  ;;  %v5800_v33 = vpack.c.bf16 %v2502_v47, %v2500_v44  ;;  %v5802_v50 = vpack.c.bf16 %v2507_v29, %v2505_v48  ;;  %v3294_v44 = vld [vmem:[#allocation22 + $0x438] sm:$0xff]  ;;  %v3289_v48 = vld [vmem:[#allocation22 + $0x410] sm:$0xff] }
 0x83a   :  { %v3293_v29 = vld [vmem:[#allocation22 + $0x430] sm:$0xff] }
 0x83c   :  { %5769 = vmatpush1.bf16.msra.mxu0 %v5768_v55  ;;  %v2506_v55 = vld [vmem:[#allocation18 + $0xf0] sm:$0xff] }
 0x83d   :  { %5771 = vmatprep.subr.bf16.mxu0 %v5770_v51  ;;  %v5804_v51 = vpack.c.bf16 %v2506_v55, %v2504_v54  ;;  %v3302_v54 = vld [vmem:[#allocation22 + $0x478] sm:$0xff] }
 0x840   :  { %5773 = vmatpush1.bf16.msra.mxu0 %v5772_v37  ;;  %v2830_v37 = vld [vmem:[#allocation18 + $0x210] sm:$0xff] }
 0x841   :  { %5775 = vmatprep.subr.bf16.mxu0 %v5774_v40  ;;  %v5811_v40 = vpack.c.bf16 %v2830_v37, %v2828_v56  ;;  %v3310_v56 = vld [vmem:[#allocation22 + $0x4b8] sm:$0xff] }
 0x8f2   :  { %v7429_v3 = vpop.f32.mrb[28].mxu0  ;;  %v7431_v61 = vpop.f32.mrb[36].mxu1 }
 0x8f3   :  { %v5481_v9 = vpop.f32.mrb[29].mxu0  ;;  %v5495_v62 = vpop.f32.mrb[37].mxu1 }
 0x8f4   :  { %v2839_v9 = vld [vmem:[#allocation18 + $0x258] sm:$0xff]  ;;  %v5815_v62 = vpack.c.bf16 %v2834_v7, %v2832_v53 }
 0x8f5   :  { %v3313_v7 = vld [vmem:[#allocation22 + $0x4d0] sm:$0xff] }
 0x8f6   :  { %v2576_v6 = vpop.f32.mrb[30].mxu0 }
 0x8f7   :  { %v5488_v12 = vpop.f32.mrb[31].mxu0  ;;  %2678 = vmatmul.mubr.f32.vlgmr.msra.gmra.mrb[32].mxu0 %v2576_v6  ;;  %v2843_v6 = vld [vmem:[#allocation18 + $0x278] sm:$0xff] }
 0x8f8   :  { %5777 = vmatpush1.bf16.msra.mxu0 %v5776_v63  ;;  %2748 = vmatprep.mubr.f32.mxu0 %v6678_v45  ;;  %v5817_v63 = vpack.c.bf16 %v2839_v9, %v2837_v60  ;;  %v5821_v10 = vpack.c.bf16 %v2843_v6, %v2841_v5  ;;  %v2840_v12 = vld [vmem:[#allocation18 + $0x260] sm:$0xff]  ;;  %v3317_v60 = vld [vmem:[#allocation22 + $0x4f0] sm:$0xff] }
 0x8f9   :  { %5779 = vmatprep.subr.bf16.mxu0 %v5778_v43  ;;  %v2836_v43 = vld [vmem:[#allocation18 + $0x240] sm:$0xff]  ;;  %v5919_v9 = vpack.c.bf16 %v3317_v60, %v3313_v7  ;;  %v3325_v5 = vld [vmem:[#allocation22 + $0x530] sm:$0xff] }
 0x8fa   :  { %v5819_v11 = vpack.c.bf16 %v2838_v0, %v2836_v43  ;;  %v3321_v0 = vld [vmem:[#allocation22 + $0x510] sm:$0xff] }
 0x8fb   :  { %v5923_v6 = vpack.c.bf16 %v3325_v5, %v3321_v0  ;;  %v3393_v60 = vld [vmem:[#allocation22 + $0x750] sm:$0xff] }
 0x8fc   :  { %5781 = vmatpush1.bf16.msra.mxu0 %v5780_v13  ;;  %v2842_v13 = vld [vmem:[#allocation18 + $0x270] sm:$0xff] }
 0x8fd   :  { %5783 = vmatprep.subr.bf16.mxu0 %v5782_v14  ;;  %v2845_v14 = vld [vmem:[#allocation18 + $0x288] sm:$0xff]  ;;  %v3401_v5 = vld [vmem:[#allocation22 + $0x790] sm:$0xff] }
 0x8fe   :  { %v5825_v16 = vpack.c.bf16 %v2847_v15, %v2845_v14  ;;  %v3333_v14 = vld [vmem:[#allocation22 + $0x570] sm:$0xff] }
 0x900   :  { %5785 = vmatpush1.bf16.msra.mxu0 %v5784_v19  ;;  %v2849_v19 = vld [vmem:[#allocation18 + $0x2a8] sm:$0xff] }
 0x901   :  { %5787 = vmatprep.subr.bf16.mxu0 %v5786_v20  ;;  %v2851_v20 = vld [vmem:[#allocation18 + $0x2b8] sm:$0xff] }
 0x902   :  { %v5829_v21 = vpack.c.bf16 %v2851_v20, %v2849_v19  ;;  %v3341_v19 = vld [vmem:[#allocation22 + $0x5b0] sm:$0xff] }
 0x903   :  { %v5931_v20 = vpack.c.bf16 %v3341_v19, %v3337_v18 }
 0x904   :  { %5789 = vmatpush1.bf16.msra.mxu0 %v5788_v24  ;;  %v2853_v24 = vld [vmem:[#allocation18 + $0x2c8] sm:$0xff] }
 0x905   :  { %5791 = vmatprep.subr.bf16.mxu0 %v5790_v25  ;;  %v2855_v25 = vld [vmem:[#allocation18 + $0x2d8] sm:$0xff] }
 0x906   :  { %v5833_v27 = vpack.c.bf16 %v2855_v25, %v2853_v24  ;;  %v3349_v24 = vld [vmem:[#allocation22 + $0x5f0] sm:$0xff] }
 0x907   :  { %v5935_v25 = vpack.c.bf16 %v3349_v24, %v3345_v23 }
 0x908   :  { %5793 = vmatpush1.bf16.msra.mxu0 %v5792_v34  ;;  %v2857_v34 = vld [vmem:[#allocation18 + $0x2e8] sm:$0xff] }
 0x909   :  { %5795 = vmatprep.subr.bf16.mxu0 %v5794_v35  ;;  %v2859_v35 = vld [vmem:[#allocation18 + $0x2f8] sm:$0xff] }
 0x90a   :  { %v5837_v38 = vpack.c.bf16 %v2859_v35, %v2857_v34  ;;  %v3357_v34 = vld [vmem:[#allocation22 + $0x630] sm:$0xff] }
 0x90b   :  { %v5939_v35 = vpack.c.bf16 %v3357_v34, %v3353_v30 }
 0x90c   :  { %5797 = vmatpush1.bf16.msra.mxu0 %v5796_v42  ;;  %v5839_v42 = vpack.c.bf16 %v2858_v41, %v2856_v39  ;;  %v3361_v41 = vld [vmem:[#allocation22 + $0x650] sm:$0xff] }
 0x90d   :  { %5799 = vmatprep.subr.bf16.mxu0 %v5798_v32  ;;  %v3290_v32 = vld [vmem:[#allocation22 + $0x418] sm:$0xff] }
 0x90e   :  { %v5905_v47 = vpack.c.bf16 %v3294_v44, %v3290_v32  ;;  %v3370_v44 = vld [vmem:[#allocation22 + $0x698] sm:$0xff] }
 0x910   :  { %5801 = vmatpush1.bf16.msra.mxu0 %v5800_v33  ;;  %v5907_v33 = vpack.c.bf16 %v3293_v29, %v3289_v48  ;;  %v3369_v29 = vld [vmem:[#allocation22 + $0x690] sm:$0xff] }
 0x911   :  { %5803 = vmatprep.subr.bf16.mxu0 %v5802_v50  ;;  %v3298_v50 = vld [vmem:[#allocation22 + $0x458] sm:$0xff] }
 0x912   :  { %v5909_v55 = vpack.c.bf16 %v3302_v54, %v3298_v50  ;;  %v3378_v54 = vld [vmem:[#allocation22 + $0x6d8] sm:$0xff] }
 0x914   :  { %5805 = vmatpush1.bf16.msra.mxu0 %v5804_v51  ;;  %v5911_v51 = vpack.c.bf16 %v3301_v2, %v3297_v4  ;;  %v3377_v2 = vld [vmem:[#allocation22 + $0x6d0] sm:$0xff] }
 0x915   :  { %5810 = vmatprep.subr.bf16.mxu0 %v5809_v52  ;;  %v3306_v52 = vld [vmem:[#allocation22 + $0x498] sm:$0xff] }
 0x916   :  { %v5913_v37 = vpack.c.bf16 %v3310_v56, %v3306_v52  ;;  %v3386_v56 = vld [vmem:[#allocation22 + $0x718] sm:$0xff] }
 0x917   :  { %2749 = vmatmul.mubr.f32.vlgmr.msra.gmra.mrb[32].mxu0 %v7429_v3  ;;  %v5823_v3 = vpack.c.bf16 %v2842_v13, %v2840_v12  ;;  %v3329_v13 = vld [vmem:[#allocation22 + $0x550] sm:$0xff] }
 0x918   :  { %5812 = vmatpush1.bf16.msra.mxu0 %v5811_v40  ;;  %2924 = vmatprep.mubr.f32.mxu0 %v6678_v45  ;;  %v3314_v40 = vld [vmem:[#allocation22 + $0x4d8] sm:$0xff]  ;;  %v5927_v15 = vpack.c.bf16 %v3333_v14, %v3329_v13 }
 0x919   :  { %5814 = vmatprep.subr.bf16.mxu0 %v5813_v59  ;;  %v3318_v59 = vld [vmem:[#allocation22 + $0x4f8] sm:$0xff] }
 0x91a   :  { %v5917_v53 = vpack.c.bf16 %v3318_v59, %v3314_v40  ;;  %v3394_v59 = vld [vmem:[#allocation22 + $0x758] sm:$0xff] }
 0x91c   :  { %5816 = vmatpush1.bf16.msra.mxu0 %v5815_v62  ;;  %v3322_v62 = vld [vmem:[#allocation22 + $0x518] sm:$0xff] }
 0x91d   :  { %5818 = vmatprep.subr.bf16.mxu0 %v5817_v63  ;;  %v3326_v63 = vld [vmem:[#allocation22 + $0x538] sm:$0xff] }
 0x91e   :  { %v5921_v43 = vpack.c.bf16 %v3326_v63, %v3322_v62  ;;  %v3402_v63 = vld [vmem:[#allocation22 + $0x798] sm:$0xff] }
 0x920   :  { %5820 = vmatpush1.bf16.msra.mxu0 %v5819_v11  ;;  %v3330_v11 = vld [vmem:[#allocation22 + $0x558] sm:$0xff] }
 0x921   :  { %5822 = vmatprep.subr.bf16.mxu0 %v5821_v10  ;;  %v3334_v10 = vld [vmem:[#allocation22 + $0x578] sm:$0xff] }
 0x922   :  { %v5925_v12 = vpack.c.bf16 %v3334_v10, %v3330_v11 }
 0x924   :  { %5824 = vmatpush1.bf16.msra.mxu0 %v5823_v3  ;;  %v3338_v3 = vld [vmem:[#allocation22 + $0x598] sm:$0xff] }
 0x925   :  { %5826 = vmatprep.subr.bf16.mxu0 %v5825_v16  ;;  %v3342_v16 = vld [vmem:[#allocation22 + $0x5b8] sm:$0xff] }
 0x926   :  { %v5929_v17 = vpack.c.bf16 %v3342_v16, %v3338_v3 }
 0x928   :  { %5828 = vmatpush1.bf16.msra.mxu0 %v5827_v8  ;;  %v3346_v8 = vld [vmem:[#allocation22 + $0x5d8] sm:$0xff] }
 0x929   :  { %5830 = vmatprep.subr.bf16.mxu0 %v5829_v21  ;;  %v3350_v21 = vld [vmem:[#allocation22 + $0x5f8] sm:$0xff] }
 0x92a   :  { %v5933_v22 = vpack.c.bf16 %v3350_v21, %v3346_v8 }
 0x92c   :  { %5832 = vmatpush1.bf16.msra.mxu0 %v5831_v26  ;;  %v3354_v26 = vld [vmem:[#allocation22 + $0x618] sm:$0xff] }
 0x92d   :  { %5834 = vmatprep.subr.bf16.mxu0 %v5833_v27  ;;  %v3358_v27 = vld [vmem:[#allocation22 + $0x638] sm:$0xff] }
 0x92e   :  { %v5937_v28 = vpack.c.bf16 %v3358_v27, %v3354_v26 }
 0x930   :  { %5836 = vmatpush1.bf16.msra.mxu0 %v5835_v36  ;;  %v3362_v36 = vld [vmem:[#allocation22 + $0x658] sm:$0xff] }
 0x931   :  { %5838 = vmatprep.subr.bf16.mxu0 %v5837_v38  ;;  %v3366_v38 = vld [vmem:[#allocation22 + $0x678] sm:$0xff] }
 0x932   :  { %v5941_v39 = vpack.c.bf16 %v3366_v38, %v3362_v36 }
 0x934   :  { %5840 = vmatpush1.bf16.msra.mxu0 %v5839_v42  ;;  %v3365_v42 = vld [vmem:[#allocation22 + $0x670] sm:$0xff] }
 0x935   :  { %5906 = vmatprep.subr.bf16.mxu0 %v5905_v47  ;;  %v5943_v32 = vpack.c.bf16 %v3365_v42, %v3361_v41  ;;  %v3374_v47 = vld [vmem:[#allocation22 + $0x6b8] sm:$0xff] }
 0x936   :  { %v5945_v48 = vpack.c.bf16 %v3374_v47, %v3370_v44 }
 0x937   :  { %2925 = vmatmul.mubr.f32.vlgmr.msra.gmra.mrb[32].mxu0 %v7431_v61  ;;  %v3305_v61 = vld [vmem:[#allocation22 + $0x490] sm:$0xff] }
 0x938   :  { %5908 = vmatpush1.bf16.msra.mxu0 %v5907_v33  ;;  %v5915_v57 = vpack.c.bf16 %v3309_v31, %v3305_v61  ;;  %v3373_v33 = vld [vmem:[#allocation22 + $0x6b0] sm:$0xff] }
 0x939   :  { %5910 = vmatprep.subr.bf16.mxu0 %v5909_v55  ;;  %v5947_v50 = vpack.c.bf16 %v3373_v33, %v3369_v29  ;;  %v3382_v55 = vld [vmem:[#allocation22 + $0x6f8] sm:$0xff]  ;;  %v3385_v31 = vld [vmem:[#allocation22 + $0x710] sm:$0xff] }
 0x93a   :  { %v5949_v4 = vpack.c.bf16 %v3382_v55, %v3378_v54  ;;  %v7438_v55 = vsub.s32 0, %v6996_v1 }
 0x93c   :  { %5912 = vmatpush1.bf16.msra.mxu0 %v5911_v51  ;;  %v3381_v51 = vld [vmem:[#allocation22 + $0x6f0] sm:$0xff] }
 0x93d   :  { %5914 = vmatprep.subr.bf16.mxu0 %v5913_v37  ;;  %v5951_v52 = vpack.c.bf16 %v3381_v51, %v3377_v2  ;;  %v3390_v37 = vld [vmem:[#allocation22 + $0x738] sm:$0xff]  ;;  %v7441_v2 = vsub.s32 1, %v6996_v1 }
 0x93e   :  { %v5953_v61 = vpack.c.bf16 %v3390_v37, %v3386_v56  ;;  %v2986_v51 = vld [vmem:[#allocation21] sm:$0x3] }
 0x940   :  { %5916 = vmatpush1.bf16.msra.mxu0 %v5915_v57  ;;  %v3389_v57 = vld [vmem:[#allocation22 + $0x730] sm:$0xff] }
 0x941   :  { %5918 = vmatprep.subr.bf16.mxu0 %v5917_v53  ;;  %v5955_v40 = vpack.c.bf16 %v3389_v57, %v3385_v31  ;;  %v3398_v53 = vld [vmem:[#allocation22 + $0x778] sm:$0xff] }
 0x942   :  { %v5957_v7 = vpack.c.bf16 %v3398_v53, %v3394_v59  ;;  %v2995_v53 = vrot.slane %v2986_v51, %v7441_v2 }
 0x944   :  { %5920 = vmatpush1.bf16.msra.mxu0 %v5919_v9  ;;  %v3397_v9 = vld [vmem:[#allocation22 + $0x770] sm:$0xff] }
 0x945   :  { %5922 = vmatprep.subr.bf16.mxu0 %v5921_v43  ;;  %v5959_v62 = vpack.c.bf16 %v3397_v9, %v3393_v60  ;;  %v3406_v43 = vld [vmem:[#allocation22 + $0x7b8] sm:$0xff] }
 0x946   :  { %v5961_v0 = vpack.c.bf16 %v3406_v43, %v3402_v63 }
 0x948   :  { %5924 = vmatpush1.bf16.msra.mxu0 %v5923_v6  ;;  %v3405_v6 = vld [vmem:[#allocation22 + $0x7b0] sm:$0xff] }
 0x949   :  { %5926 = vmatprep.subr.bf16.mxu0 %v5925_v12  ;;  %v5963_v11 = vpack.c.bf16 %v3405_v6, %v3401_v5  ;;  %v3292_v5 = vld [vmem:[#allocation22 + $0x428] sm:$0xff] }
 0x94c   :  { %5928 = vmatpush1.bf16.msra.mxu0 %v5927_v15 }
 0x94d   :  { %5930 = vmatprep.subr.bf16.mxu0 %v5929_v17 }
 0x950   :  { %5932 = vmatpush1.bf16.msra.mxu0 %v5931_v20 }
 0x951   :  { %5934 = vmatprep.subr.bf16.mxu0 %v5933_v22 }
 0x954   :  { %5936 = vmatpush1.bf16.msra.mxu0 %v5935_v25 }
 0x955   :  { %5938 = vmatprep.subr.bf16.mxu0 %v5937_v28 }
 0x958   :  { %5940 = vmatpush1.bf16.msra.mxu0 %v5939_v35 }
 0x959   :  { %5942 = vmatprep.subr.bf16.mxu0 %v5941_v39 }
 0x95c   :  { %5944 = vmatpush1.bf16.msra.mxu0 %v5943_v32 }
 0x95d   :  { %5946 = vmatprep.subr.bf16.mxu0 %v5945_v48 }
 0x960   :  { %5948 = vmatpush1.bf16.msra.mxu0 %v5947_v50 }
 0x961   :  { %5950 = vmatprep.subr.bf16.mxu0 %v5949_v4  ;;  %v2972_v4 = vld [vmem:[#allocation19] sm:$0x3] }
 0x962   :  { %v2981_v37 = vrot.slane %v2972_v4, %v7441_v2 }
 0x964   :  { %5952 = vmatpush1.bf16.msra.mxu0 %v5951_v52  ;;  %v2977_v52 = vrot.slane %v2972_v4, %v7438_v55 }
 0x965   :  { %5954 = vmatprep.subr.bf16.mxu0 %v5953_v61  ;;  %v3006_v61 = vand.u32 1, %v6996_v1 }
 0x967   :  { %vm3007_vm14 = vcmp.ne.s32.totalorder %v3006_v61, 0 }
 0x968   :  { %5956 = vmatpush1.bf16.msra.mxu0 %v5955_v40  ;;  %v2991_v40 = vrot.slane %v2986_v51, %v7438_v55  ;;  %vm3008_vm15 = vmand %vm7158_vm9, %vm3007_vm14  ;;  %v3335_v51 = vld [vmem:[#allocation22 + $0x580] sm:$0xff] }
 0x969   :  { %5958 = vmatprep.subr.bf16.mxu0 %v5957_v7 }
 0x96c   :  { %5960 = vmatpush1.bf16.msra.mxu0 %v5959_v62 }
 0x96d   :  { %5962 = vmatprep.subr.bf16.mxu0 %v5961_v0  ;;  %v3288_v0 = vld [vmem:[#allocation22 + $0x408] sm:$0xff] }
 0x970   :  { %5964 = vmatpush1.bf16.msra.mxu0 %v5963_v11  ;;  %v3009_v11 = vsel %vm3008_vm15, 1.0, %v6678_v45 }
 0xa0a   :  { %v2926_v10 = vpop.f32.mrb[32].mxu0 }
 0xa0b   :  { %v2933_v12 = vrot.slane %v2926_v10, 4  ;;  %v2928_v13 = vpop.f32.mrb[33].mxu0 }
 0xa0c   :  { %v2939_v14 = vrot.slane %v2928_v13, 4 }
 0xa0d   :  { %v2934_v15 = vadd.f32 %v2933_v12, %v2926_v10  ;;  %v5841_v12 = vpack.c.bf16 %v3292_v5, %v3288_v0 }
 0xa0e   :  { %v2940_v3 = vadd.f32 %v2939_v14, %v2928_v13  ;;  %v3291_v14 = vld [vmem:[#allocation22 + $0x420] sm:$0xff] }
 0xa0f   :  { %v2935_v16 = vrot.slane %v2934_v15, 2 }
 0xa10   :  { %v2941_v17 = vrot.slane %v2940_v3, 2 }
 0xa11   :  { %v2936_v18 = vadd.f32 %v2935_v16, %v2934_v15  ;;  %v3300_v15 = vld [vmem:[#allocation22 + $0x468] sm:$0xff] }
 0xa12   :  { %v2942_v19 = vadd.f32 %v2941_v17, %v2940_v3  ;;  %v5845_v16 = vpack.c.bf16 %v3300_v15, %v3296_v49  ;;  %v3295_v17 = vld [vmem:[#allocation22 + $0x440] sm:$0xff] }
 0xa13   :  { %v2937_v20 = vrot.slane %v2936_v18, 1 }
 0xa14   :  { %v2943_v8 = vrot.slane %v2942_v19, 1 }
 0xa15   :  { %v2938_v21 = vadd.f32 %v2937_v20, %v2936_v18  ;;  %v3299_v18 = vld [vmem:[#allocation22 + $0x460] sm:$0xff]  ;;  %v3308_v20 = vld [vmem:[#allocation22 + $0x4a8] sm:$0xff] }
 0xa16   :  { %v2944_v22 = vadd.f32 %v2943_v8, %v2942_v19  ;;  %v3304_v19 = vld [vmem:[#allocation22 + $0x488] sm:$0xff]  ;;  %v5847_v8 = vpack.c.bf16 %v3299_v18, %v3295_v17 }
 0xa17   :  { %v2946_v23 = vmul.f32 0.125, %v2938_v21  ;;  %v5849_v21 = vpack.c.bf16 %v3308_v20, %v3304_v19  ;;  %v3376_v17 = vld [vmem:[#allocation22 + $0x6c8] sm:$0xff] }
 0xa18   :  { %v2947_v24 = vmul.f32 0.125, %v2944_v22  ;;  %v3303_v22 = vld [vmem:[#allocation22 + $0x480] sm:$0xff]  ;;  %v3380_v18 = vld [vmem:[#allocation22 + $0x6e8] sm:$0xff] }
 0xa19   :  { %v2948_v25 = vsub.f32 %v2926_v10, %v2946_v23  ;;  %v3307_v23 = vld [vmem:[#allocation22 + $0x4a0] sm:$0xff]  ;;  %v5885_v20 = vpack.c.bf16 %v3380_v18, %v3376_v17 }
 0xa1a   :  { %v2949_v26 = vsub.f32 %v2928_v13, %v2947_v24  ;;  %v3287_v13 = vld [vmem:[#allocation22 + $0x400] sm:$0xff]  ;;  %v3312_v24 = vld [vmem:[#allocation22 + $0x4c8] sm:$0xff] }
 0xa1b   :  { %v2950_v27 = vmul.f32 %v2948_v25, %v2948_v25  ;;  %v5843_v3 = vpack.c.bf16 %v3291_v14, %v3287_v13  ;;  %v3368_v13 = vld [vmem:[#allocation22 + $0x688] sm:$0xff]  ;;  %v3093_v17 = vld [vmem:[#allocation22 + $0x40] sm:$0xff] }
 0xa1c   :  { %v2951_v28 = vmul.f32 %v2949_v26, %v2949_v26  ;;  %v3372_v14 = vld [vmem:[#allocation22 + $0x6a8] sm:$0xff]  ;;  %v3097_v18 = vld [vmem:[#allocation22 + $0x60] sm:$0xff] }
 0xa1d   :  { %v2952_v30 = vrot.slane %v2950_v27, 4  ;;  %v5881_v15 = vpack.c.bf16 %v3372_v14, %v3368_v13  ;;  %v3098_v13 = vld [vmem:[#allocation22 + $0x68] sm:$0xff]  ;;  %v3096_v14 = vld [vmem:[#allocation22 + $0x58] sm:$0xff] }
 0xa1e   :  { %v2958_v34 = vrot.slane %v2951_v28, 4 }
 0xa1f   :  { %v2953_v35 = vadd.f32 %v2952_v30, %v2950_v27  ;;  %v3315_v30 = vld [vmem:[#allocation22 + $0x4e0] sm:$0xff] }
 0xa20   :  { %v2959_v36 = vadd.f32 %v2958_v34, %v2951_v28  ;;  %v3311_v28 = vld [vmem:[#allocation22 + $0x4c0] sm:$0xff]  ;;  %v3320_v34 = vld [vmem:[#allocation22 + $0x508] sm:$0xff] }
 0xa21   :  { %v2954_v38 = vrot.slane %v2953_v35, 2 }
 0xa22   :  { %v2960_v39 = vrot.slane %v2959_v36, 2 }
 0xa23   :  { %v2955_v41 = vadd.f32 %v2954_v38, %v2953_v35  ;;  %v3324_v35 = vld [vmem:[#allocation22 + $0x528] sm:$0xff] }
 0xa24   :  { %v2961_v42 = vadd.f32 %v2960_v39, %v2959_v36  ;;  %v5855_v36 = vpack.c.bf16 %v3315_v30, %v3311_v28  ;;  %v5857_v38 = vpack.c.bf16 %v3324_v35, %v3320_v34  ;;  %v3319_v39 = vld [vmem:[#allocation22 + $0x500] sm:$0xff]  ;;  %v3392_v28 = vld [vmem:[#allocation22 + $0x748] sm:$0xff] }
 0xa25   :  { %v2956_v32 = vrot.slane %v2955_v41, 1  ;;  %v3396_v30 = vld [vmem:[#allocation22 + $0x768] sm:$0xff] }
 0xa26   :  { %v2962_v44 = vrot.slane %v2961_v42, 1  ;;  %v5893_v35 = vpack.c.bf16 %v3396_v30, %v3392_v28  ;;  %v3101_v30 = vld [vmem:[#allocation22 + $0x80] sm:$0xff] }
 0xa27   :  { %v2957_v47 = vadd.f32 %v2956_v32, %v2955_v41  ;;  %v3323_v41 = vld [vmem:[#allocation22 + $0x520] sm:$0xff]  ;;  %v3332_v32 = vld [vmem:[#allocation22 + $0x568] sm:$0xff] }
 0xa28   :  { %v2963_v48 = vadd.f32 %v2962_v44, %v2961_v42  ;;  %v3328_v42 = vld [vmem:[#allocation22 + $0x548] sm:$0xff]  ;;  %v5859_v44 = vpack.c.bf16 %v3323_v41, %v3319_v39 }
 0xa29   :  { %v2964_v29 = vmul.f32 0.125, %v2957_v47  ;;  %v5861_v47 = vpack.c.bf16 %v3332_v32, %v3328_v42  ;;  %v3400_v39 = vld [vmem:[#allocation22 + $0x788] sm:$0xff] }
 0xa2a   :  { %v2965_v33 = vmul.f32 0.125, %v2963_v48  ;;  %v3327_v48 = vld [vmem:[#allocation22 + $0x540] sm:$0xff]  ;;  %v3404_v41 = vld [vmem:[#allocation22 + $0x7a8] sm:$0xff] }
 0xa2b   :  { %v2966_v50 = vadd.f32 0.8, %v2964_v29  ;;  %v3331_v29 = vld [vmem:[#allocation22 + $0x560] sm:$0xff]  ;;  %v5897_v32 = vpack.c.bf16 %v3404_v41, %v3400_v39  ;;  %v3107_v39 = vld [vmem:[#allocation22 + $0xb0] sm:$0xff]  ;;  %v3110_v41 = vld [vmem:[#allocation22 + $0xc8] sm:$0xff] }
 0xa2c   :  { %v2967_v54 = vadd.f32 0.8, %v2965_v33  ;;  %v3336_v33 = vld [vmem:[#allocation22 + $0x588] sm:$0xff] }
 0xa2d   :  { %6296 = vrsqrt.f32 %v2966_v50  ;;  %v3340_v50 = vld [vmem:[#allocation22 + $0x5a8] sm:$0xff] }
 0xa2e   :  { %6298 = vrsqrt.f32 %v2967_v54  ;;  %v5863_v54 = vpack.c.bf16 %v3331_v29, %v3327_v48  ;;  %v5865_v4 = vpack.c.bf16 %v3340_v50, %v3336_v33  ;;  %v3408_v29 = vld [vmem:[#allocation22 + $0x7c8] sm:$0xff]  ;;  %v3410_v50 = vld [vmem:[#allocation22 + $0x7d8] sm:$0xff] }
 0xa2f   :  { %v3412_v33 = vld [vmem:[#allocation22 + $0x7e8] sm:$0xff] }
 0xa37   :  { %v6297_v56 = vpop.eup %6296 }
 0xa38   :  { %v6299_v31 = vpop.eup %6298  ;;  %v2970_v57 = vmul.f32 %v6297_v56, %v2948_v25  ;;  %v3316_v25 = vld [vmem:[#allocation22 + $0x4e8] sm:$0xff] }
 0xa39   :  { %v2971_v59 = vmul.f32 %v6299_v31, %v2949_v26  ;;  %v5851_v26 = vpack.c.bf16 %v3307_v23, %v3303_v22  ;;  %v5853_v27 = vpack.c.bf16 %v3316_v25, %v3312_v24  ;;  %v3344_v56 = vld [vmem:[#allocation22 + $0x5c8] sm:$0xff] }
 0xa3a   :  { %v2984_v7 = vmul.f32 %v2977_v52, %v2970_v57  ;;  %v3339_v52 = vld [vmem:[#allocation22 + $0x5a0] sm:$0xff]  ;;  %v3384_v22 = vld [vmem:[#allocation22 + $0x708] sm:$0xff] }
 0xa3b   :  { %v2985_v60 = vmul.f32 %v2981_v37, %v2971_v59  ;;  %v3348_v37 = vld [vmem:[#allocation22 + $0x5e8] sm:$0xff]  ;;  %v5867_v61 = vpack.c.bf16 %v3339_v52, %v3335_v51  ;;  %v3343_v57 = vld [vmem:[#allocation22 + $0x5c0] sm:$0xff] }
 0xa3c   :  { %v2998_v9 = vadd.f32 %v2991_v40, %v2984_v7  ;;  %v5869_v31 = vpack.c.bf16 %v3348_v37, %v3344_v56  ;;  %v3347_v40 = vld [vmem:[#allocation22 + $0x5e0] sm:$0xff]  ;;  %v3352_v59 = vld [vmem:[#allocation22 + $0x608] sm:$0xff] }
 0xa3d   :  { %v2999_v62 = vadd.f32 %v2995_v53, %v2985_v60  ;;  %v3356_v53 = vld [vmem:[#allocation22 + $0x628] sm:$0xff]  ;;  %v5871_v7 = vpack.c.bf16 %v3347_v40, %v3343_v57  ;;  %v3407_v51 = vld [vmem:[#allocation22 + $0x7c0] sm:$0xff] }
 0xa3e   :  { %v3002_v63 = vmul.f32 0.2, %v2998_v9  ;;  %vm3000_vm6 = vcmp.gt.f32.partialorder %v2998_v9, 0.0  ;;  %v5873_v60 = vpack.c.bf16 %v3356_v53, %v3352_v59  ;;  %v3388_v23 = vld [vmem:[#allocation22 + $0x728] sm:$0xff]  ;;  %v3411_v52 = vld [vmem:[#allocation22 + $0x7e0] sm:$0xff]  ;;  %v3088_v53 = vld [vmem:[#allocation22 + $0x18] sm:$0xff] }
 0xa3f   :  { %vm3001_vm7 = vcmp.gt.f32.partialorder %v2999_v62, 0.0  ;;  %v3003_v43 = vmul.f32 0.2, %v2999_v62  ;;  %v5889_v25 = vpack.c.bf16 %v3388_v23, %v3384_v22  ;;  %v5903_v37 = vpack.c.bf16 %v3411_v52, %v3407_v51  ;;  %v3086_v40 = vld [vmem:[#allocation22 + $0x8] sm:$0xff]  ;;  %v3115_v51 = vld [vmem:[#allocation22 + $0xf0] sm:$0xff] }
 0xa40   :  { %v7454_v10 = vsel %vm3000_vm6, %v2998_v9, %v3002_v63  ;;  %v3351_v9 = vld [vmem:[#allocation22 + $0x600] sm:$0xff]  ;;  %v3360_v63 = vld [vmem:[#allocation22 + $0x648] sm:$0xff] }
 0xa41   :  { %v7450_v6 = vsel %vm3001_vm7, %v2999_v62, %v3003_v43  ;;  %v3355_v62 = vld [vmem:[#allocation22 + $0x620] sm:$0xff]  ;;  %v3364_v43 = vld [vmem:[#allocation22 + $0x668] sm:$0xff] }
 0xa42   :  { %3014 = vmatprep.subr.mxu1 %v7450_v6  ;;  %v5875_v0 = vpack.c.bf16 %v3355_v62, %v3351_v9  ;;  %v5877_v5 = vpack.c.bf16 %v3364_v43, %v3360_v63  ;;  %v3090_v59 = vld [vmem:[#allocation22 + $0x28] sm:$0xff]  ;;  %v3085_v63 = vld [vmem:[#allocation22] sm:$0xff] }
 0xa43   :  { %3015 = vmatpush1.msra.mxu1 %v7454_v10  ;;  %v3118_v52 = vld [vmem:[#allocation22 + $0x108] sm:$0xff] }
 0xa44   :  { %4868 = vmatmul.mubr.msk.f32.vlgmr.msra.gmra.mrb[38].mxu1 %vm3010_vm8, %v3009_v11  ;;  %3215 = vmatprep.subr.mxu1 %v7450_v6  ;;  %v3359_v11 = vld [vmem:[#allocation22 + $0x640] sm:$0xff] }
 0xa45   :  { %3216 = vmatpush1.msra.mxu1 %v7454_v10  ;;  %3279 = vmatprep.mubr.f32.mxu1 %v6678_v45 }
 0xa46   :  { %5842 = vmatprep.subr.bf16.mxu1 %v5841_v12  ;;  %v3363_v12 = vld [vmem:[#allocation22 + $0x660] sm:$0xff] }
 0xa47   :  { %v5879_v49 = vpack.c.bf16 %v3363_v12, %v3359_v11  ;;  %v3091_v11 = vld [vmem:[#allocation22 + $0x30] sm:$0xff]  ;;  %v3094_v12 = vld [vmem:[#allocation22 + $0x48] sm:$0xff] }
 0xa48   :  { %4869 = vmatmul.mubr.msk.f32.vlgmr.msra.gmra.mrb[40].mxu1 %vm3010_vm8, %v7291_v46  ;;  %v5973_v22 = vpack.c.bf16 %v3098_v13, %v3094_v12  ;;  %v3125_v13 = vld [vmem:[#allocation22 + $0x140] sm:$0xff] }
 0xa49   :  { %5844 = vmatpush1.bf16.msra.mxu1 %v5843_v3  ;;  %v3367_v3 = vld [vmem:[#allocation22 + $0x680] sm:$0xff] }
 0xa4a   :  { %5846 = vmatprep.subr.bf16.mxu1 %v5845_v16  ;;  %v3371_v16 = vld [vmem:[#allocation22 + $0x6a0] sm:$0xff] }
 0xa4b   :  { %v5883_v19 = vpack.c.bf16 %v3371_v16, %v3367_v3 }
 0xa4d   :  { %5848 = vmatpush1.bf16.msra.mxu1 %v5847_v8  ;;  %v3375_v8 = vld [vmem:[#allocation22 + $0x6c0] sm:$0xff] }
 0xa4e   :  { %5850 = vmatprep.subr.bf16.mxu1 %v5849_v21  ;;  %v3379_v21 = vld [vmem:[#allocation22 + $0x6e0] sm:$0xff] }
 0xa4f   :  { %v5887_v24 = vpack.c.bf16 %v3379_v21, %v3375_v8  ;;  %v3099_v8 = vld [vmem:[#allocation22 + $0x70] sm:$0xff]  ;;  %v3102_v21 = vld [vmem:[#allocation22 + $0x88] sm:$0xff] }
 0xa51   :  { %5852 = vmatpush1.bf16.msra.mxu1 %v5851_v26  ;;  %v3383_v26 = vld [vmem:[#allocation22 + $0x700] sm:$0xff] }
 0xa52   :  { %5854 = vmatprep.subr.bf16.mxu1 %v5853_v27  ;;  %v3387_v27 = vld [vmem:[#allocation22 + $0x720] sm:$0xff] }
 0xa53   :  { %v5891_v34 = vpack.c.bf16 %v3387_v27, %v3383_v26  ;;  %v3108_v26 = vld [vmem:[#allocation22 + $0xb8] sm:$0xff]  ;;  %v5975_v27 = vpack.c.bf16 %v3097_v18, %v3093_v17  ;;  %v3134_v17 = vld [vmem:[#allocation22 + $0x188] sm:$0xff] }
 0xa54   :  { %v3138_v18 = vld [vmem:[#allocation22 + $0x1a8] sm:$0xff] }
 0xa55   :  { %5856 = vmatpush1.bf16.msra.mxu1 %v5855_v36  ;;  %v3391_v36 = vld [vmem:[#allocation22 + $0x740] sm:$0xff] }
 0xa56   :  { %5858 = vmatprep.subr.bf16.mxu1 %v5857_v38  ;;  %v3395_v38 = vld [vmem:[#allocation22 + $0x760] sm:$0xff] }
 0xa57   :  { %v5895_v42 = vpack.c.bf16 %v3395_v38, %v3391_v36  ;;  %v3103_v38 = vld [vmem:[#allocation22 + $0x90] sm:$0xff] }
 0xa59   :  { %5860 = vmatpush1.bf16.msra.mxu1 %v5859_v44  ;;  %v3399_v44 = vld [vmem:[#allocation22 + $0x780] sm:$0xff] }
 0xa5a   :  { %5862 = vmatprep.subr.bf16.mxu1 %v5861_v47  ;;  %v3403_v47 = vld [vmem:[#allocation22 + $0x7a0] sm:$0xff] }
 0xa5b   :  { %v5899_v48 = vpack.c.bf16 %v3403_v47, %v3399_v44  ;;  %v3116_v44 = vld [vmem:[#allocation22 + $0xf8] sm:$0xff] }
 0xa5d   :  { %5864 = vmatpush1.bf16.msra.mxu1 %v5863_v54  ;;  %v5901_v54 = vpack.c.bf16 %v3412_v33, %v3408_v29  ;;  %v3109_v29 = vld [vmem:[#allocation22 + $0xc0] sm:$0xff] }
 0xa5e   :  { %5866 = vmatprep.subr.bf16.mxu1 %v5865_v4  ;;  %v3414_v4 = vld [vmem:[#allocation22 + $0x7f8] sm:$0xff]  ;;  %v3113_v33 = vld [vmem:[#allocation22 + $0xe0] sm:$0xff] }
 0xa5f   :  { %v5965_v56 = vpack.c.bf16 %v3414_v4, %v3410_v50  ;;  %v3111_v4 = vld [vmem:[#allocation22 + $0xd0] sm:$0xff] }
 0xa61   :  { %5868 = vmatpush1.bf16.msra.mxu1 %v5867_v61  ;;  %v3409_v61 = vld [vmem:[#allocation22 + $0x7d0] sm:$0xff]  ;;  %5966 = vmatprep.subr.bf16.mxu0 %v5965_v56  ;;  %v3122_v56 = vld [vmem:[#allocation22 + $0x128] sm:$0xff] }
 0xa62   :  { %5870 = vmatprep.subr.bf16.mxu1 %v5869_v31  ;;  %v3413_v31 = vld [vmem:[#allocation22 + $0x7f0] sm:$0xff] }
 0xa63   :  { %v5967_v57 = vpack.c.bf16 %v3413_v31, %v3409_v61  ;;  %v3124_v61 = vld [vmem:[#allocation22 + $0x138] sm:$0xff]  ;;  %v5983_v31 = vpack.c.bf16 %v3113_v33, %v3109_v29  ;;  %v3154_v29 = vld [vmem:[#allocation22 + $0x228] sm:$0xff] }
 0xa64   :  { %v3152_v33 = vld [vmem:[#allocation22 + $0x218] sm:$0xff] }
 0xa65   :  { %5872 = vmatpush1.bf16.msra.mxu1 %v5871_v7  ;;  %5968 = vmatpush1.bf16.msra.mxu0 %v5967_v57  ;;  %v5969_v7 = vpack.c.bf16 %v3090_v59, %v3086_v40  ;;  %v6047_v57 = vpack.c.bf16 %v3115_v51, %v3111_v4  ;;  %v3117_v40 = vld [vmem:[#allocation22 + $0x100] sm:$0xff] }
 0xa66   :  { %5874 = vmatprep.subr.bf16.mxu1 %v5873_v60  ;;  %v3092_v60 = vld [vmem:[#allocation22 + $0x38] sm:$0xff]  ;;  %v3121_v59 = vld [vmem:[#allocation22 + $0x120] sm:$0xff] }
 0xa67   :  { %v6033_v9 = vpack.c.bf16 %v3092_v60, %v3088_v53  ;;  %v5985_v53 = vpack.c.bf16 %v3122_v56, %v3118_v52  ;;  %v3119_v60 = vld [vmem:[#allocation22 + $0x110] sm:$0xff]  ;;  %v3149_v51 = vld [vmem:[#allocation22 + $0x200] sm:$0xff] }
 0xa68   :  { %v3153_v52 = vld [vmem:[#allocation22 + $0x220] sm:$0xff] }
 0xa69   :  { %5876 = vmatpush1.bf16.msra.mxu1 %v5875_v0  ;;  %6034 = vmatprep.subr.bf16.mxu0 %v6033_v9  ;;  %v3089_v0 = vld [vmem:[#allocation22 + $0x20] sm:$0xff]  ;;  %v3123_v9 = vld [vmem:[#allocation22 + $0x130] sm:$0xff] }
 0xa6a   :  { %5878 = vmatprep.subr.bf16.mxu1 %v5877_v5  ;;  %v3087_v5 = vld [vmem:[#allocation22 + $0x10] sm:$0xff]  ;;  %v5971_v3 = vpack.c.bf16 %v3089_v0, %v3085_v63  ;;  %v3126_v63 = vld [vmem:[#allocation22 + $0x148] sm:$0xff]  ;;  %v3128_v0 = vld [vmem:[#allocation22 + $0x158] sm:$0xff]  ;;  %v6051_v12 = vpack.c.bf16 %v3123_v9, %v3119_v60 }
 0xa6b   :  { %v6035_v16 = vpack.c.bf16 %v3091_v11, %v3087_v5  ;;  %v3132_v5 = vld [vmem:[#allocation22 + $0x178] sm:$0xff]  ;;  %v5987_v11 = vpack.c.bf16 %v3121_v59, %v3117_v40  ;;  %v3162_v40 = vld [vmem:[#allocation22 + $0x268] sm:$0xff]  ;;  %v3157_v9 = vld [vmem:[#allocation22 + $0x240] sm:$0xff] }
 0xa6c   :  { %v3160_v59 = vld [vmem:[#allocation22 + $0x258] sm:$0xff] }
 0xa6d   :  { %5880 = vmatpush1.bf16.msra.mxu1 %v5879_v49  ;;  %v3100_v49 = vld [vmem:[#allocation22 + $0x78] sm:$0xff] }
 0xa6e   :  { %5882 = vmatprep.subr.bf16.mxu1 %v5881_v15  ;;  %v6037_v23 = vpack.c.bf16 %v3100_v49, %v3096_v14  ;;  %v3129_v14 = vld [vmem:[#allocation22 + $0x160] sm:$0xff] }
 0xa71   :  { %5884 = vmatpush1.bf16.msra.mxu1 %v5883_v19 }
 0xa72   :  { %5886 = vmatprep.subr.bf16.mxu1 %v5885_v20  ;;  %v3095_v20 = vld [vmem:[#allocation22 + $0x50] sm:$0xff] }
 0xa73   :  { %v6039_v28 = vpack.c.bf16 %v3099_v8, %v3095_v20  ;;  %v3140_v20 = vld [vmem:[#allocation22 + $0x1b8] sm:$0xff]  ;;  %v5991_v8 = vpack.c.bf16 %v3129_v14, %v3125_v13  ;;  %v3170_v13 = vld [vmem:[#allocation22 + $0x2a8] sm:$0xff] }
 0xa74   :  { %v3168_v14 = vld [vmem:[#allocation22 + $0x298] sm:$0xff] }
 0xa75   :  { %5888 = vmatpush1.bf16.msra.mxu1 %v5887_v24  ;;  %v3106_v24 = vld [vmem:[#allocation22 + $0xa8] sm:$0xff] }
 0xa76   :  { %5890 = vmatprep.subr.bf16.mxu1 %v5889_v25  ;;  %v3104_v25 = vld [vmem:[#allocation22 + $0x98] sm:$0xff] }
 0xa77   :  { %v6041_v36 = vpack.c.bf16 %v3108_v26, %v3104_v25  ;;  %v3135_v26 = vld [vmem:[#allocation22 + $0x190] sm:$0xff] }
 0xa79   :  { %5892 = vmatpush1.bf16.msra.mxu1 %v5891_v34  ;;  %v3105_v34 = vld [vmem:[#allocation22 + $0xa0] sm:$0xff] }
 0xa7a   :  { %5894 = vmatprep.subr.bf16.mxu1 %v5893_v35  ;;  %v5977_v35 = vpack.c.bf16 %v3106_v24, %v3102_v21  ;;  %v5979_v47 = vpack.c.bf16 %v3105_v34, %v3101_v30  ;;  %v5993_v24 = vpack.c.bf16 %v3138_v18, %v3134_v17  ;;  %v3146_v30 = vld [vmem:[#allocation22 + $0x1e8] sm:$0xff]  ;;  %v3144_v34 = vld [vmem:[#allocation22 + $0x1d8] sm:$0xff]  ;;  %v3169_v17 = vld [vmem:[#allocation22 + $0x2a0] sm:$0xff] }
 0xa7d   :  { %5896 = vmatpush1.bf16.msra.mxu1 %v5895_v42  ;;  %v3114_v42 = vld [vmem:[#allocation22 + $0xe8] sm:$0xff] }
 0xa7e   :  { %5898 = vmatprep.subr.bf16.mxu1 %v5897_v32  ;;  %v3112_v32 = vld [vmem:[#allocation22 + $0xd8] sm:$0xff]  ;;  %v5981_v50 = vpack.c.bf16 %v3114_v42, %v3110_v41  ;;  %v3145_v41 = vld [vmem:[#allocation22 + $0x1e0] sm:$0xff] }
 0xa81   :  { %5900 = vmatpush1.bf16.msra.mxu1 %v5899_v48  ;;  %v6043_v48 = vpack.c.bf16 %v3107_v39, %v3103_v38  ;;  %v3141_v39 = vld [vmem:[#allocation22 + $0x1c0] sm:$0xff] }
 0xa82   :  { %5902 = vmatprep.subr.bf16.mxu1 %v5901_v54  ;;  %v6045_v54 = vpack.c.bf16 %v3116_v44, %v3112_v32  ;;  %v3143_v44 = vld [vmem:[#allocation22 + $0x1d0] sm:$0xff] }
 0xa85   :  { %5904 = vmatpush1.bf16.msra.mxu1 %v5903_v37  ;;  %v3120_v37 = vld [vmem:[#allocation22 + $0x118] sm:$0xff] }
 0xa86   :  { %5970 = vmatprep.subr.bf16.mxu1 %v5969_v7  ;;  %v6049_v7 = vpack.c.bf16 %v3124_v61, %v3120_v37  ;;  %v3151_v61 = vld [vmem:[#allocation22 + $0x210] sm:$0xff] }
 0xb17   :  { %v7463_v62 = vpop.f32.mrb[38].mxu1 }
 0xb18   :  { %v3082_v43 = vpop.f32.mrb[39].mxu1 }
 0xb1b   :  { %v3281_v15 = vpop.f32.mrb[40].mxu1 }
 0xb1c   :  { %v3283_v19 = vpop.f32.mrb[41].mxu1 }
 0xb1d   :  { %3479 = vmatprep.mubr.f32.mxu1 %v3283_v19  ;;  %3550 = vmatprep.mubr.f32.mxu0 %v3283_v19  ;;  %v3136_v19 = vld [vmem:[#allocation22 + $0x198] sm:$0xff] }
 0xb1e   :  { %3480 = vmatmul.mubr.f32.vlgmr.msra.gmra.mrb[42].mxu1 %v3281_v15  ;;  %3551 = vmatmul.mubr.f32.vlgmr.msra.gmra.mrb[34].mxu0 %v3281_v15  ;;  %v6053_v15 = vpack.c.bf16 %v3132_v5, %v3128_v0  ;;  %v6057_v25 = vpack.c.bf16 %v3140_v20, %v3136_v19  ;;  %v3159_v5 = vld [vmem:[#allocation22 + $0x250] sm:$0xff] }
 0xb1f   :  { %5972 = vmatpush1.bf16.msra.mxu1 %v5971_v3  ;;  %6036 = vmatpush1.bf16.msra.mxu0 %v6035_v16  ;;  %v3127_v3 = vld [vmem:[#allocation22 + $0x150] sm:$0xff] }
 0xb20   :  { %3621 = vmatprep.mubr.f32.mxu1 %v3082_v43  ;;  %3692 = vmatprep.mubr.f32.mxu0 %v3082_v43  ;;  %v3130_v43 = vld [vmem:[#allocation22 + $0x168] sm:$0xff]  ;;  %v3131_v16 = vld [vmem:[#allocation22 + $0x170] sm:$0xff] }
 0xb21   :  { %5974 = vmatprep.subr.bf16.mxu1 %v5973_v22  ;;  %6038 = vmatprep.subr.bf16.mxu0 %v6037_v23  ;;  %v5989_v49 = vpack.c.bf16 %v3130_v43, %v3126_v63  ;;  %v6055_v21 = vpack.c.bf16 %v3131_v16, %v3127_v3  ;;  %v3133_v22 = vld [vmem:[#allocation22 + $0x180] sm:$0xff]  ;;  %v3167_v20 = vld [vmem:[#allocation22 + $0x290] sm:$0xff] }
 0xb22   :  { %v3137_v23 = vld [vmem:[#allocation22 + $0x1a0] sm:$0xff] }
 0xb23   :  { %5976 = vmatpush1.bf16.msra.mxu1 %v5975_v27  ;;  %6040 = vmatpush1.bf16.msra.mxu0 %v6039_v28  ;;  %v3139_v27 = vld [vmem:[#allocation22 + $0x1b0] sm:$0xff]  ;;  %v3142_v28 = vld [vmem:[#allocation22 + $0x1c8] sm:$0xff]  ;;  %v3161_v63 = vld [vmem:[#allocation22 + $0x260] sm:$0xff] }
 0xb24   :  { %5978 = vmatprep.subr.bf16.mxu1 %v5977_v35  ;;  %6042 = vmatprep.subr.bf16.mxu0 %v6041_v36  ;;  %v3148_v35 = vld [vmem:[#allocation22 + $0x1f8] sm:$0xff]  ;;  %v5995_v36 = vpack.c.bf16 %v3137_v23, %v3133_v22  ;;  %v6059_v38 = vpack.c.bf16 %v3139_v27, %v3135_v26  ;;  %v5997_v42 = vpack.c.bf16 %v3146_v30, %v3142_v28  ;;  %v3165_v16 = vld [vmem:[#allocation22 + $0x280] sm:$0xff]  ;;  %v3178_v22 = vld [vmem:[#allocation22 + $0x2e8] sm:$0xff] }
 0xb25   :  { %v6061_v32 = vpack.c.bf16 %v3148_v35, %v3144_v34  ;;  %v3176_v23 = vld [vmem:[#allocation22 + $0x2d8] sm:$0xff]  ;;  %v3173_v27 = vld [vmem:[#allocation22 + $0x2c0] sm:$0xff]  ;;  %v3175_v35 = vld [vmem:[#allocation22 + $0x2d0] sm:$0xff] }
 0xb26   :  { %v3177_v28 = vld [vmem:[#allocation22 + $0x2e0] sm:$0xff] }
 0xb27   :  { %5980 = vmatpush1.bf16.msra.mxu1 %v5979_v47  ;;  %6044 = vmatpush1.bf16.msra.mxu0 %v6043_v48  ;;  %v3147_v47 = vld [vmem:[#allocation22 + $0x1f0] sm:$0xff]  ;;  %v3150_v48 = vld [vmem:[#allocation22 + $0x208] sm:$0xff] }
 0xb28   :  { %5982 = vmatprep.subr.bf16.mxu1 %v5981_v50  ;;  %6046 = vmatprep.subr.bf16.mxu0 %v6045_v54  ;;  %v3156_v50 = vld [vmem:[#allocation22 + $0x238] sm:$0xff]  ;;  %v5999_v54 = vpack.c.bf16 %v3145_v41, %v3141_v39  ;;  %v6063_v4 = vpack.c.bf16 %v3147_v47, %v3143_v44  ;;  %v6001_v56 = vpack.c.bf16 %v3154_v29, %v3150_v48  ;;  %v3186_v39 = vld [vmem:[#allocation22 + $0x328] sm:$0xff]  ;;  %v3181_v47 = vld [vmem:[#allocation22 + $0x300] sm:$0xff] }
 0xb29   :  { %v6065_v37 = vpack.c.bf16 %v3156_v50, %v3152_v33  ;;  %v3184_v41 = vld [vmem:[#allocation22 + $0x318] sm:$0xff]  ;;  %v3185_v48 = vld [vmem:[#allocation22 + $0x320] sm:$0xff]  ;;  %v3183_v50 = vld [vmem:[#allocation22 + $0x310] sm:$0xff] }
 0xb2b   :  { %5984 = vmatpush1.bf16.msra.mxu1 %v5983_v31  ;;  %6048 = vmatpush1.bf16.msra.mxu0 %v6047_v57  ;;  %v3155_v31 = vld [vmem:[#allocation22 + $0x230] sm:$0xff]  ;;  %v3158_v57 = vld [vmem:[#allocation22 + $0x248] sm:$0xff] }
 0xb2c   :  { %5986 = vmatprep.subr.bf16.mxu1 %v5985_v53  ;;  %6050 = vmatprep.subr.bf16.mxu0 %v6049_v7  ;;  %v3164_v53 = vld [vmem:[#allocation22 + $0x278] sm:$0xff]  ;;  %v6003_v7 = vpack.c.bf16 %v3153_v52, %v3149_v51  ;;  %v6067_v60 = vpack.c.bf16 %v3155_v31, %v3151_v61  ;;  %v6005_v43 = vpack.c.bf16 %v3162_v40, %v3158_v57  ;;  %v3194_v51 = vld [vmem:[#allocation22 + $0x368] sm:$0xff]  ;;  %v3189_v31 = vld [vmem:[#allocation22 + $0x340] sm:$0xff] }
 0xb2d   :  { %v6069_v0 = vpack.c.bf16 %v3164_v53, %v3160_v59  ;;  %v3192_v52 = vld [vmem:[#allocation22 + $0x358] sm:$0xff]  ;;  %v3193_v57 = vld [vmem:[#allocation22 + $0x360] sm:$0xff]  ;;  %v3191_v53 = vld [vmem:[#allocation22 + $0x350] sm:$0xff] }
 0xb2f   :  { %5988 = vmatpush1.bf16.msra.mxu1 %v5987_v11  ;;  %6052 = vmatpush1.bf16.msra.mxu0 %v6051_v12  ;;  %v3163_v11 = vld [vmem:[#allocation22 + $0x270] sm:$0xff]  ;;  %v3166_v12 = vld [vmem:[#allocation22 + $0x288] sm:$0xff] }
 0xb30   :  { %5990 = vmatprep.subr.bf16.mxu1 %v5989_v49  ;;  %6054 = vmatprep.subr.bf16.mxu0 %v6053_v15  ;;  %v3172_v49 = vld [vmem:[#allocation22 + $0x2b8] sm:$0xff]  ;;  %v6007_v15 = vpack.c.bf16 %v3161_v63, %v3157_v9  ;;  %v6071_v3 = vpack.c.bf16 %v3163_v11, %v3159_v5  ;;  %v6009_v18 = vpack.c.bf16 %v3170_v13, %v3166_v12  ;;  %v3202_v9 = vld [vmem:[#allocation22 + $0x3a8] sm:$0xff]  ;;  %v3197_v11 = vld [vmem:[#allocation22 + $0x380] sm:$0xff] }
 0xb31   :  { %v6073_v19 = vpack.c.bf16 %v3172_v49, %v3168_v14  ;;  %v3200_v63 = vld [vmem:[#allocation22 + $0x398] sm:$0xff]  ;;  %v3201_v12 = vld [vmem:[#allocation22 + $0x3a0] sm:$0xff]  ;;  %v3199_v49 = vld [vmem:[#allocation22 + $0x390] sm:$0xff] }
 0xb33   :  { %5992 = vmatpush1.bf16.msra.mxu1 %v5991_v8  ;;  %6056 = vmatpush1.bf16.msra.mxu0 %v6055_v21  ;;  %v3171_v8 = vld [vmem:[#allocation22 + $0x2b0] sm:$0xff]  ;;  %v3174_v21 = vld [vmem:[#allocation22 + $0x2c8] sm:$0xff] }
 0xb34   :  { %5994 = vmatprep.subr.bf16.mxu1 %v5993_v24  ;;  %6058 = vmatprep.subr.bf16.mxu0 %v6057_v25  ;;  %v3180_v24 = vld [vmem:[#allocation22 + $0x2f8] sm:$0xff]  ;;  %v6011_v25 = vpack.c.bf16 %v3169_v17, %v3165_v16  ;;  %v6075_v26 = vpack.c.bf16 %v3171_v8, %v3167_v20  ;;  %v6013_v30 = vpack.c.bf16 %v3178_v22, %v3174_v21  ;;  %v3210_v16 = vld [vmem:[#allocation22 + $0x3e8] sm:$0xff]  ;;  %v3205_v8 = vld [vmem:[#allocation22 + $0x3c0] sm:$0xff] }
 0xb35   :  { %v6077_v34 = vpack.c.bf16 %v3180_v24, %v3176_v23  ;;  %v3208_v17 = vld [vmem:[#allocation22 + $0x3d8] sm:$0xff]  ;;  %v3209_v23 = vld [vmem:[#allocation22 + $0x3e0] sm:$0xff]  ;;  %v3207_v24 = vld [vmem:[#allocation22 + $0x3d0] sm:$0xff] }
 0xb37   :  { %5996 = vmatpush1.bf16.msra.mxu1 %v5995_v36  ;;  %6060 = vmatpush1.bf16.msra.mxu0 %v6059_v38  ;;  %v3179_v36 = vld [vmem:[#allocation22 + $0x2f0] sm:$0xff]  ;;  %v3182_v38 = vld [vmem:[#allocation22 + $0x308] sm:$0xff] }
 0xb38   :  { %5998 = vmatprep.subr.bf16.mxu1 %v5997_v42  ;;  %6062 = vmatprep.subr.bf16.mxu0 %v6061_v32  ;;  %v3188_v42 = vld [vmem:[#allocation22 + $0x338] sm:$0xff]  ;;  %v6015_v32 = vpack.c.bf16 %v3177_v28, %v3173_v27  ;;  %v6079_v44 = vpack.c.bf16 %v3179_v36, %v3175_v35  ;;  %v6017_v29 = vpack.c.bf16 %v3186_v39, %v3182_v38  ;;  %v3778_v36 = vld [vmem:[#allocation22 + $0x828] sm:$0xff]  ;;  %v3775_v38 = vld [vmem:[#allocation22 + $0x810] sm:$0xff] }
 0xb39   :  { %v6081_v33 = vpack.c.bf16 %v3188_v42, %v3184_v41  ;;  %v3780_v27 = vld [vmem:[#allocation22 + $0x838] sm:$0xff]  ;;  %v6031_v28 = vpack.c.bf16 %v3209_v23, %v3205_v8  ;;  %v3779_v39 = vld [vmem:[#allocation22 + $0x830] sm:$0xff]  ;;  %v3810_v8 = vld [vmem:[#allocation22 + $0x928] sm:$0xff] }
 0xb3a   :  { %v3784_v41 = vld [vmem:[#allocation22 + $0x858] sm:$0xff]  ;;  %v3811_v23 = vld [vmem:[#allocation22 + $0x930] sm:$0xff] }
 0xb3b   :  { %6000 = vmatpush1.bf16.msra.mxu1 %v5999_v54  ;;  %6064 = vmatpush1.bf16.msra.mxu0 %v6063_v4  ;;  %v3187_v54 = vld [vmem:[#allocation22 + $0x330] sm:$0xff]  ;;  %v3190_v4 = vld [vmem:[#allocation22 + $0x348] sm:$0xff]  ;;  %v3788_v42 = vld [vmem:[#allocation22 + $0x878] sm:$0xff] }
 0xb3c   :  { %6002 = vmatprep.subr.bf16.mxu1 %v6001_v56  ;;  %6066 = vmatprep.subr.bf16.mxu0 %v6065_v37  ;;  %v3196_v56 = vld [vmem:[#allocation22 + $0x378] sm:$0xff]  ;;  %v6019_v37 = vpack.c.bf16 %v3185_v48, %v3181_v47  ;;  %v6083_v61 = vpack.c.bf16 %v3187_v54, %v3183_v50  ;;  %v6021_v40 = vpack.c.bf16 %v3194_v51, %v3190_v4  ;;  %v3777_v47 = vld [vmem:[#allocation22 + $0x820] sm:$0xff]  ;;  %v3783_v54 = vld [vmem:[#allocation22 + $0x850] sm:$0xff] }
 0xb3d   :  { %v6085_v59 = vpack.c.bf16 %v3196_v56, %v3192_v52  ;;  %v6163_v48 = vpack.c.bf16 %v3779_v39, %v3775_v38  ;;  %v6165_v50 = vpack.c.bf16 %v3788_v42, %v3784_v41  ;;  %v3787_v4 = vld [vmem:[#allocation22 + $0x870] sm:$0xff]  ;;  %v3792_v51 = vld [vmem:[#allocation22 + $0x898] sm:$0xff] }
 0xb3e   :  { %v3796_v52 = vld [vmem:[#allocation22 + $0x8b8] sm:$0xff]  ;;  %v3815_v39 = vld [vmem:[#allocation22 + $0x950] sm:$0xff] }
 0xb3f   :  { %6004 = vmatpush1.bf16.msra.mxu1 %v6003_v7  ;;  %6068 = vmatpush1.bf16.msra.mxu0 %v6067_v60  ;;  %v3195_v7 = vld [vmem:[#allocation22 + $0x370] sm:$0xff]  ;;  %v3198_v60 = vld [vmem:[#allocation22 + $0x388] sm:$0xff]  ;;  %v3824_v42 = vld [vmem:[#allocation22 + $0x998] sm:$0xff] }
 0xb40   :  { %6006 = vmatprep.subr.bf16.mxu1 %v6005_v43  ;;  %6070 = vmatprep.subr.bf16.mxu0 %v6069_v0  ;;  %v3204_v43 = vld [vmem:[#allocation22 + $0x3b8] sm:$0xff]  ;;  %v6023_v0 = vpack.c.bf16 %v3193_v57, %v3189_v31  ;;  %v6087_v5 = vpack.c.bf16 %v3195_v7, %v3191_v53  ;;  %v6025_v13 = vpack.c.bf16 %v3202_v9, %v3198_v60  ;;  %v3790_v57 = vld [vmem:[#allocation22 + $0x888] sm:$0xff]  ;;  %v3791_v53 = vld [vmem:[#allocation22 + $0x890] sm:$0xff] }
 0xb41   :  { %v6089_v14 = vpack.c.bf16 %v3204_v43, %v3200_v63  ;;  %v6167_v31 = vpack.c.bf16 %v3787_v4, %v3783_v54  ;;  %v3795_v7 = vld [vmem:[#allocation22 + $0x8b0] sm:$0xff]  ;;  %v3789_v63 = vld [vmem:[#allocation22 + $0x880] sm:$0xff]  ;;  %v3826_v54 = vld [vmem:[#allocation22 + $0x9a8] sm:$0xff] }
 0xb42   :  { %v3793_v43 = vld [vmem:[#allocation22 + $0x8a0] sm:$0xff]  ;;  %v3819_v41 = vld [vmem:[#allocation22 + $0x970] sm:$0xff] }
 0xb43   :  { %6008 = vmatpush1.bf16.msra.mxu1 %v6007_v15  ;;  %6072 = vmatpush1.bf16.msra.mxu0 %v6071_v3  ;;  %v3203_v15 = vld [vmem:[#allocation22 + $0x3b0] sm:$0xff]  ;;  %v3206_v3 = vld [vmem:[#allocation22 + $0x3c8] sm:$0xff] }
 0xb44   :  { %6010 = vmatprep.subr.bf16.mxu1 %v6009_v18  ;;  %6074 = vmatprep.subr.bf16.mxu0 %v6073_v19  ;;  %v3212_v18 = vld [vmem:[#allocation22 + $0x3f8] sm:$0xff]  ;;  %v6027_v19 = vpack.c.bf16 %v3201_v12, %v3197_v11  ;;  %v6091_v20 = vpack.c.bf16 %v3203_v15, %v3199_v49  ;;  %v6029_v21 = vpack.c.bf16 %v3210_v16, %v3206_v3  ;;  %v3802_v11 = vld [vmem:[#allocation22 + $0x8e8] sm:$0xff] }
 0xb45   :  { %v6093_v22 = vpack.c.bf16 %v3212_v18, %v3208_v17  ;;  %v3808_v49 = vld [vmem:[#allocation22 + $0x918] sm:$0xff]  ;;  %v6107_v3 = vpack.c.bf16 %v3793_v43, %v3789_v63  ;;  %v3797_v17 = vld [vmem:[#allocation22 + $0x8c0] sm:$0xff] }
 0xb46   :  { %v3812_v15 = vld [vmem:[#allocation22 + $0x938] sm:$0xff]  ;;  %v3801_v18 = vld [vmem:[#allocation22 + $0x8e0] sm:$0xff] }
 0xb47   :  { %6012 = vmatpush1.bf16.msra.mxu1 %v6011_v25  ;;  %6076 = vmatpush1.bf16.msra.mxu0 %v6075_v26  ;;  %v3211_v25 = vld [vmem:[#allocation22 + $0x3f0] sm:$0xff]  ;;  %v3776_v26 = vld [vmem:[#allocation22 + $0x818] sm:$0xff] }
 0xb48   :  { %6014 = vmatprep.subr.bf16.mxu1 %v6013_v30  ;;  %6078 = vmatprep.subr.bf16.mxu0 %v6077_v34  ;;  %v6095_v30 = vpack.c.bf16 %v3211_v25, %v3207_v24  ;;  %v3774_v34 = vld [vmem:[#allocation22 + $0x808] sm:$0xff]  ;;  %v6161_v35 = vpack.c.bf16 %v3780_v27, %v3776_v26  ;;  %v3816_v24 = vld [vmem:[#allocation22 + $0x958] sm:$0xff]  ;;  %v6111_v26 = vpack.c.bf16 %v3801_v18, %v3797_v17 }
 0xb49   :  { %v3820_v25 = vld [vmem:[#allocation22 + $0x978] sm:$0xff] }
 0xb4a   :  { %v6181_v38 = vpack.c.bf16 %v3820_v25, %v3816_v24  ;;  %v3847_v24 = vld [vmem:[#allocation22 + $0xa50] sm:$0xff] }
 0xb4b   :  { %6016 = vmatpush1.bf16.msra.mxu1 %v6015_v32  ;;  %6080 = vmatpush1.bf16.msra.mxu0 %v6079_v44  ;;  %v6097_v32 = vpack.c.bf16 %v3778_v36, %v3774_v34  ;;  %v3773_v44 = vld [vmem:[#allocation22 + $0x800] sm:$0xff]  ;;  %v3818_v36 = vld [vmem:[#allocation22 + $0x968] sm:$0xff]  ;;  %v3851_v25 = vld [vmem:[#allocation22 + $0xa70] sm:$0xff] }
 0xb4c   :  { %6018 = vmatprep.subr.bf16.mxu1 %v6017_v29  ;;  %6082 = vmatprep.subr.bf16.mxu0 %v6081_v33  ;;  %v3782_v29 = vld [vmem:[#allocation22 + $0x848] sm:$0xff] }
 0xb4d   :  { %v3786_v33 = vld [vmem:[#allocation22 + $0x868] sm:$0xff] }
 0xb4e   :  { %v6101_v56 = vpack.c.bf16 %v3786_v33, %v3782_v29  ;;  %v3817_v29 = vld [vmem:[#allocation22 + $0x960] sm:$0xff]  ;;  %v6183_v33 = vpack.c.bf16 %v3819_v41, %v3815_v39  ;;  %v3858_v39 = vld [vmem:[#allocation22 + $0xaa8] sm:$0xff] }
 0xb4f   :  { %6020 = vmatpush1.bf16.msra.mxu1 %v6019_v37  ;;  %6084 = vmatpush1.bf16.msra.mxu0 %v6083_v61  ;;  %v3781_v37 = vld [vmem:[#allocation22 + $0x840] sm:$0xff] }
 0xb50   :  { %6022 = vmatprep.subr.bf16.mxu1 %v6021_v40  ;;  %6086 = vmatprep.subr.bf16.mxu0 %v6085_v59  ;;  %v3785_v61 = vld [vmem:[#allocation22 + $0x860] sm:$0xff]  ;;  %v3794_v40 = vld [vmem:[#allocation22 + $0x8a8] sm:$0xff]  ;;  %v6169_v59 = vpack.c.bf16 %v3796_v52, %v3792_v51  ;;  %v3823_v51 = vld [vmem:[#allocation22 + $0x990] sm:$0xff] }
 0xb51   :  { %v6103_v60 = vpack.c.bf16 %v3785_v61, %v3781_v37  ;;  %v6105_v9 = vpack.c.bf16 %v3794_v40, %v3790_v57  ;;  %v3827_v52 = vld [vmem:[#allocation22 + $0x9b0] sm:$0xff]  ;;  %v3825_v57 = vld [vmem:[#allocation22 + $0x9a0] sm:$0xff] }
 0xb52   :  { %v6187_v40 = vpack.c.bf16 %v3827_v52, %v3823_v51  ;;  %v3866_v51 = vld [vmem:[#allocation22 + $0xae8] sm:$0xff] }
 0xb53   :  { %6024 = vmatpush1.bf16.msra.mxu1 %v6023_v0  ;;  %6088 = vmatpush1.bf16.msra.mxu0 %v6087_v5  ;;  %v6171_v0 = vpack.c.bf16 %v3795_v7, %v3791_v53  ;;  %v3798_v5 = vld [vmem:[#allocation22 + $0x8c8] sm:$0xff] }
 0xb54   :  { %6026 = vmatprep.subr.bf16.mxu1 %v6025_v13  ;;  %6090 = vmatprep.subr.bf16.mxu0 %v6089_v14  ;;  %v3799_v13 = vld [vmem:[#allocation22 + $0x8d0] sm:$0xff]  ;;  %v6109_v16 = vpack.c.bf16 %v3802_v11, %v3798_v5  ;;  %v3834_v53 = vld [vmem:[#allocation22 + $0x9e8] sm:$0xff]  ;;  %v3833_v5 = vld [vmem:[#allocation22 + $0x9e0] sm:$0xff] }
 0xb55   :  { %v3803_v14 = vld [vmem:[#allocation22 + $0x8f0] sm:$0xff] }
 0xb57   :  { %6028 = vmatpush1.bf16.msra.mxu1 %v6027_v19  ;;  %6092 = vmatpush1.bf16.msra.mxu0 %v6091_v20  ;;  %v6175_v19 = vpack.c.bf16 %v3803_v14, %v3799_v13  ;;  %v3806_v20 = vld [vmem:[#allocation22 + $0x908] sm:$0xff] }
 0xb58   :  { %6030 = vmatprep.subr.bf16.mxu1 %v6029_v21  ;;  %6094 = vmatprep.subr.bf16.mxu0 %v6093_v22  ;;  %v6177_v21 = vpack.c.bf16 %v3812_v15, %v3808_v49  ;;  %v3807_v22 = vld [vmem:[#allocation22 + $0x910] sm:$0xff]  ;;  %v6113_v27 = vpack.c.bf16 %v3810_v8, %v3806_v20  ;;  %v3842_v13 = vld [vmem:[#allocation22 + $0xa28] sm:$0xff]  ;;  %v3841_v20 = vld [vmem:[#allocation22 + $0xa20] sm:$0xff] }
 0xb59   :  { %v6179_v34 = vpack.c.bf16 %v3811_v23, %v3807_v22  ;;  %v3839_v49 = vld [vmem:[#allocation22 + $0xa10] sm:$0xff]  ;;  %v3850_v22 = vld [vmem:[#allocation22 + $0xa68] sm:$0xff] }
 0xb5a   :  { %v3843_v15 = vld [vmem:[#allocation22 + $0xa30] sm:$0xff] }
 0xb5b   :  { %6032 = vmatpush1.bf16.msra.mxu1 %v6031_v28  ;;  %6096 = vmatpush1.bf16.msra.mxu0 %v6095_v30  ;;  %v3805_v28 = vld [vmem:[#allocation22 + $0x900] sm:$0xff]  ;;  %v6195_v8 = vpack.c.bf16 %v3843_v15, %v3839_v49  ;;  %v3882_v49 = vld [vmem:[#allocation22 + $0xb68] sm:$0xff] }
 0xb5c   :  { %3701 = vmatprep.subr.mxu1 %v7450_v6  ;;  %6162 = vmatprep.subr.bf16.mxu0 %v6161_v35  ;;  %v6099_v6 = vpack.c.bf16 %v3777_v47, %v3773_v44  ;;  %v3809_v30 = vld [vmem:[#allocation22 + $0x920] sm:$0xff]  ;;  %v3814_v35 = vld [vmem:[#allocation22 + $0x948] sm:$0xff] }
 0xb5d   :  { %v6115_v44 = vpack.c.bf16 %v3809_v30, %v3805_v28  ;;  %v6117_v47 = vpack.c.bf16 %v3818_v36, %v3814_v35  ;;  %v3849_v35 = vld [vmem:[#allocation22 + $0xa60] sm:$0xff]  ;;  %v6199_v36 = vpack.c.bf16 %v3851_v25, %v3847_v24  ;;  %v3890_v24 = vld [vmem:[#allocation22 + $0xba8] sm:$0xff] }
 0xb5e   :  { %3622 = vmatmul.mubr.f32.vlgmr.msra.gmra.mrb[42].mxu1 %v7463_v62  ;;  %3693 = vmatmul.mubr.f32.vlgmr.msra.gmra.mrb[34].mxu0 %v7463_v62  ;;  %v3800_v62 = vld [vmem:[#allocation22 + $0x8d8] sm:$0xff] }
 0xb5f   :  { %3702 = vmatpush1.msra.mxu1 %v7454_v10  ;;  %3765 = vmatprep.mubr.f32.mxu1 %v6678_v45  ;;  %v3804_v10 = vld [vmem:[#allocation22 + $0x8f8] sm:$0xff] }
 0xb60   :  { %6098 = vmatprep.subr.bf16.mxu1 %v6097_v32  ;;  %6164 = vmatpush1.bf16.msra.mxu0 %v6163_v48  ;;  %v6173_v12 = vpack.c.bf16 %v3804_v10, %v3800_v62  ;;  %v3828_v32 = vld [vmem:[#allocation22 + $0x9b8] sm:$0xff]  ;;  %v3813_v48 = vld [vmem:[#allocation22 + $0x940] sm:$0xff]  ;;  %v3831_v62 = vld [vmem:[#allocation22 + $0x9d0] sm:$0xff] }
 0xb61   :  { %6166 = vmatprep.subr.bf16.mxu0 %v6165_v50  ;;  %v3822_v50 = vld [vmem:[#allocation22 + $0x988] sm:$0xff]  ;;  %v6185_v4 = vpack.c.bf16 %v3828_v32, %v3824_v42  ;;  %v6119_v37 = vpack.c.bf16 %v3817_v29, %v3813_v48  ;;  %v3835_v10 = vld [vmem:[#allocation22 + $0x9f0] sm:$0xff] }
 0xb62   :  { %4870 = vmatmul.mubr.msk.f32.vlgmr.msra.gmra.mrb[44].mxu1 %vm3010_vm8, %v7342_v58  ;;  %v6121_v61 = vpack.c.bf16 %v3826_v54, %v3822_v50  ;;  %v6191_v11 = vpack.c.bf16 %v3835_v10, %v3831_v62  ;;  %v3855_v42 = vld [vmem:[#allocation22 + $0xa90] sm:$0xff]  ;;  %v3857_v50 = vld [vmem:[#allocation22 + $0xaa0] sm:$0xff]  ;;  %v3874_v62 = vld [vmem:[#allocation22 + $0xb28] sm:$0xff] }
 0xb63   :  { %6100 = vmatpush1.bf16.msra.mxu1 %v6099_v6  ;;  %v3832_v6 = vld [vmem:[#allocation22 + $0x9d8] sm:$0xff]  ;;  %v3859_v32 = vld [vmem:[#allocation22 + $0xab0] sm:$0xff] }
 0xb64   :  { %6102 = vmatprep.subr.bf16.mxu1 %v6101_v56  ;;  %6168 = vmatpush1.bf16.msra.mxu0 %v6167_v31  ;;  %v3836_v56 = vld [vmem:[#allocation22 + $0x9f8] sm:$0xff]  ;;  %v3821_v31 = vld [vmem:[#allocation22 + $0x980] sm:$0xff]  ;;  %v6203_v54 = vpack.c.bf16 %v3859_v32, %v3855_v42  ;;  %v3898_v42 = vld [vmem:[#allocation22 + $0xbe8] sm:$0xff] }
 0xb65   :  { %6170 = vmatprep.subr.bf16.mxu0 %v6169_v59  ;;  %v3830_v59 = vld [vmem:[#allocation22 + $0x9c8] sm:$0xff]  ;;  %v6189_v7 = vpack.c.bf16 %v3836_v56, %v3832_v6  ;;  %v6123_v63 = vpack.c.bf16 %v3825_v57, %v3821_v31  ;;  %v3863_v6 = vld [vmem:[#allocation22 + $0xad0] sm:$0xff] }
 0xb66   :  { %v6125_v43 = vpack.c.bf16 %v3834_v53, %v3830_v59  ;;  %v3867_v56 = vld [vmem:[#allocation22 + $0xaf0] sm:$0xff]  ;;  %v3865_v59 = vld [vmem:[#allocation22 + $0xae0] sm:$0xff] }
 0xb67   :  { %6104 = vmatpush1.bf16.msra.mxu1 %v6103_v60  ;;  %v3840_v60 = vld [vmem:[#allocation22 + $0xa18] sm:$0xff]  ;;  %v6207_v53 = vpack.c.bf16 %v3867_v56, %v3863_v6 }
 0xb68   :  { %6106 = vmatprep.subr.bf16.mxu1 %v6105_v9  ;;  %6172 = vmatpush1.bf16.msra.mxu0 %v6171_v0  ;;  %v3844_v9 = vld [vmem:[#allocation22 + $0xa38] sm:$0xff]  ;;  %v3829_v0 = vld [vmem:[#allocation22 + $0x9c0] sm:$0xff] }
 0xb69   :  { %6174 = vmatprep.subr.bf16.mxu0 %v6173_v12  ;;  %v3838_v12 = vld [vmem:[#allocation22 + $0xa08] sm:$0xff]  ;;  %v6193_v14 = vpack.c.bf16 %v3844_v9, %v3840_v60  ;;  %v6127_v17 = vpack.c.bf16 %v3833_v5, %v3829_v0  ;;  %v3871_v60 = vld [vmem:[#allocation22 + $0xb10] sm:$0xff] }
 0xb6a   :  { %v6129_v18 = vpack.c.bf16 %v3842_v13, %v3838_v12  ;;  %v3875_v9 = vld [vmem:[#allocation22 + $0xb30] sm:$0xff]  ;;  %v3873_v12 = vld [vmem:[#allocation22 + $0xb20] sm:$0xff] }
 0xb6b   :  { %6108 = vmatpush1.bf16.msra.mxu1 %v6107_v3  ;;  %v3848_v3 = vld [vmem:[#allocation22 + $0xa58] sm:$0xff]  ;;  %v6211_v13 = vpack.c.bf16 %v3875_v9, %v3871_v60 }
 0xb6c   :  { %6110 = vmatprep.subr.bf16.mxu1 %v6109_v16  ;;  %6176 = vmatpush1.bf16.msra.mxu0 %v6175_v19  ;;  %v3852_v16 = vld [vmem:[#allocation22 + $0xa78] sm:$0xff]  ;;  %v3837_v19 = vld [vmem:[#allocation22 + $0xa00] sm:$0xff] }
 0xb6d   :  { %6178 = vmatprep.subr.bf16.mxu0 %v6177_v21  ;;  %v3846_v21 = vld [vmem:[#allocation22 + $0xa48] sm:$0xff]  ;;  %v6197_v23 = vpack.c.bf16 %v3852_v16, %v3848_v3  ;;  %v6131_v28 = vpack.c.bf16 %v3841_v20, %v3837_v19  ;;  %v3879_v3 = vld [vmem:[#allocation22 + $0xb50] sm:$0xff] }
 0xb6e   :  { %v6133_v30 = vpack.c.bf16 %v3850_v22, %v3846_v21  ;;  %v3883_v16 = vld [vmem:[#allocation22 + $0xb70] sm:$0xff]  ;;  %v3881_v21 = vld [vmem:[#allocation22 + $0xb60] sm:$0xff] }
 0xb6f   :  { %6112 = vmatpush1.bf16.msra.mxu1 %v6111_v26  ;;  %v3856_v26 = vld [vmem:[#allocation22 + $0xa98] sm:$0xff]  ;;  %v6215_v22 = vpack.c.bf16 %v3883_v16, %v3879_v3 }
 0xb70   :  { %6114 = vmatprep.subr.bf16.mxu1 %v6113_v27  ;;  %6180 = vmatpush1.bf16.msra.mxu0 %v6179_v34  ;;  %v3860_v27 = vld [vmem:[#allocation22 + $0xab8] sm:$0xff]  ;;  %v3845_v34 = vld [vmem:[#allocation22 + $0xa40] sm:$0xff] }
 0xb71   :  { %6182 = vmatprep.subr.bf16.mxu0 %v6181_v38  ;;  %v3854_v38 = vld [vmem:[#allocation22 + $0xa88] sm:$0xff]  ;;  %v6201_v41 = vpack.c.bf16 %v3860_v27, %v3856_v26  ;;  %v6135_v48 = vpack.c.bf16 %v3849_v35, %v3845_v34  ;;  %v3887_v26 = vld [vmem:[#allocation22 + $0xb90] sm:$0xff] }
 0xb72   :  { %v6137_v29 = vpack.c.bf16 %v3858_v39, %v3854_v38  ;;  %v3891_v27 = vld [vmem:[#allocation22 + $0xbb0] sm:$0xff]  ;;  %v3889_v38 = vld [vmem:[#allocation22 + $0xba0] sm:$0xff] }
 0xb73   :  { %6116 = vmatpush1.bf16.msra.mxu1 %v6115_v44  ;;  %v3864_v44 = vld [vmem:[#allocation22 + $0xad8] sm:$0xff]  ;;  %v6219_v39 = vpack.c.bf16 %v3891_v27, %v3887_v26 }
 0xb74   :  { %6118 = vmatprep.subr.bf16.mxu1 %v6117_v47  ;;  %6184 = vmatpush1.bf16.msra.mxu0 %v6183_v33  ;;  %v3868_v47 = vld [vmem:[#allocation22 + $0xaf8] sm:$0xff]  ;;  %v3853_v33 = vld [vmem:[#allocation22 + $0xa80] sm:$0xff] }
 0xb75   :  { %6186 = vmatprep.subr.bf16.mxu0 %v6185_v4  ;;  %v3862_v4 = vld [vmem:[#allocation22 + $0xac8] sm:$0xff]  ;;  %v6205_v52 = vpack.c.bf16 %v3868_v47, %v3864_v44  ;;  %v6139_v31 = vpack.c.bf16 %v3857_v50, %v3853_v33  ;;  %v3895_v33 = vld [vmem:[#allocation22 + $0xbd0] sm:$0xff] }
 0xb76   :  { %v6141_v57 = vpack.c.bf16 %v3866_v51, %v3862_v4 }
 0xb77   :  { %6120 = vmatpush1.bf16.msra.mxu1 %v6119_v37  ;;  %v3872_v37 = vld [vmem:[#allocation22 + $0xb18] sm:$0xff] }
 0xb78   :  { %6122 = vmatprep.subr.bf16.mxu1 %v6121_v61  ;;  %6188 = vmatpush1.bf16.msra.mxu0 %v6187_v40  ;;  %v3876_v61 = vld [vmem:[#allocation22 + $0xb38] sm:$0xff]  ;;  %v3861_v40 = vld [vmem:[#allocation22 + $0xac0] sm:$0xff] }
 0xb79   :  { %6190 = vmatprep.subr.bf16.mxu0 %v6189_v7  ;;  %v3870_v7 = vld [vmem:[#allocation22 + $0xb08] sm:$0xff]  ;;  %v6209_v10 = vpack.c.bf16 %v3876_v61, %v3872_v37  ;;  %v6143_v0 = vpack.c.bf16 %v3865_v59, %v3861_v40 }
 0xb7a   :  { %v6145_v5 = vpack.c.bf16 %v3874_v62, %v3870_v7 }
 0xb7b   :  { %6124 = vmatpush1.bf16.msra.mxu1 %v6123_v63  ;;  %v3880_v63 = vld [vmem:[#allocation22 + $0xb58] sm:$0xff] }
 0xb7c   :  { %6126 = vmatprep.subr.bf16.mxu1 %v6125_v43  ;;  %6192 = vmatpush1.bf16.msra.mxu0 %v6191_v11  ;;  %v3884_v43 = vld [vmem:[#allocation22 + $0xb78] sm:$0xff]  ;;  %v3869_v11 = vld [vmem:[#allocation22 + $0xb00] sm:$0xff] }
 0xb7d   :  { %6194 = vmatprep.subr.bf16.mxu0 %v6193_v14  ;;  %v3878_v14 = vld [vmem:[#allocation22 + $0xb48] sm:$0xff]  ;;  %v6213_v15 = vpack.c.bf16 %v3884_v43, %v3880_v63  ;;  %v6147_v19 = vpack.c.bf16 %v3873_v12, %v3869_v11 }
 0xb7e   :  { %v6149_v20 = vpack.c.bf16 %v3882_v49, %v3878_v14 }
 0xb7f   :  { %6128 = vmatpush1.bf16.msra.mxu1 %v6127_v17  ;;  %v3888_v17 = vld [vmem:[#allocation22 + $0xb98] sm:$0xff] }
 0xb80   :  { %6130 = vmatprep.subr.bf16.mxu1 %v6129_v18  ;;  %6196 = vmatpush1.bf16.msra.mxu0 %v6195_v8  ;;  %v3892_v18 = vld [vmem:[#allocation22 + $0xbb8] sm:$0xff]  ;;  %v3877_v8 = vld [vmem:[#allocation22 + $0xb40] sm:$0xff] }
 0xb81   :  { %6198 = vmatprep.subr.bf16.mxu0 %v6197_v23  ;;  %v3886_v23 = vld [vmem:[#allocation22 + $0xb88] sm:$0xff]  ;;  %v6217_v25 = vpack.c.bf16 %v3892_v18, %v3888_v17  ;;  %v6151_v34 = vpack.c.bf16 %v3881_v21, %v3877_v8 }
 0xb82   :  { %v6153_v35 = vpack.c.bf16 %v3890_v24, %v3886_v23 }
 0xb83   :  { %6132 = vmatpush1.bf16.msra.mxu1 %v6131_v28  ;;  %v3896_v28 = vld [vmem:[#allocation22 + $0xbd8] sm:$0xff] }
 0xb84   :  { %6134 = vmatprep.subr.bf16.mxu1 %v6133_v30  ;;  %6200 = vmatpush1.bf16.msra.mxu0 %v6199_v36  ;;  %v3900_v30 = vld [vmem:[#allocation22 + $0xbf8] sm:$0xff]  ;;  %v3885_v36 = vld [vmem:[#allocation22 + $0xb80] sm:$0xff] }
 0xb85   :  { %6202 = vmatprep.subr.bf16.mxu0 %v6201_v41  ;;  %v3894_v41 = vld [vmem:[#allocation22 + $0xbc8] sm:$0xff]  ;;  %v6221_v32 = vpack.c.bf16 %v3900_v30, %v3896_v28  ;;  %v6155_v44 = vpack.c.bf16 %v3889_v38, %v3885_v36 }
 0xb86   :  { %v6157_v47 = vpack.c.bf16 %v3898_v42, %v3894_v41 }
 0xb87   :  { %6136 = vmatpush1.bf16.msra.mxu1 %v6135_v48  ;;  %v3893_v48 = vld [vmem:[#allocation22 + $0xbc0] sm:$0xff] }
 0xb88   :  { %6138 = vmatprep.subr.bf16.mxu1 %v6137_v29  ;;  %6204 = vmatpush1.bf16.msra.mxu0 %v6203_v54  ;;  %v3897_v29 = vld [vmem:[#allocation22 + $0xbe0] sm:$0xff]  ;;  %v3899_v54 = vld [vmem:[#allocation22 + $0xbf0] sm:$0xff] }
 0xb89   :  { %6206 = vmatprep.subr.bf16.mxu0 %v6205_v52  ;;  %v6159_v50 = vpack.c.bf16 %v3897_v29, %v3893_v48  ;;  %v6223_v4 = vpack.c.bf16 %v3899_v54, %v3895_v33 }
 0xb8b   :  { %6140 = vmatpush1.bf16.msra.mxu1 %v6139_v31 }
 0xb8c   :  { %6142 = vmatprep.subr.bf16.mxu1 %v6141_v57  ;;  %6208 = vmatpush1.bf16.msra.mxu0 %v6207_v53 }
 0xb8d   :  { %6210 = vmatprep.subr.bf16.mxu0 %v6209_v10 }
 0xb8f   :  { %6144 = vmatpush1.bf16.msra.mxu1 %v6143_v0 }
 0xb90   :  { %6146 = vmatprep.subr.bf16.mxu1 %v6145_v5  ;;  %6212 = vmatpush1.bf16.msra.mxu0 %v6211_v13 }
 0xb91   :  { %6214 = vmatprep.subr.bf16.mxu0 %v6213_v15 }
 0xb93   :  { %6148 = vmatpush1.bf16.msra.mxu1 %v6147_v19 }
 0xb94   :  { %6150 = vmatprep.subr.bf16.mxu1 %v6149_v20  ;;  %6216 = vmatpush1.bf16.msra.mxu0 %v6215_v22 }
 0xb95   :  { %6218 = vmatprep.subr.bf16.mxu0 %v6217_v25 }
 0xb97   :  { %6152 = vmatpush1.bf16.msra.mxu1 %v6151_v34 }
 0xb98   :  { %6154 = vmatprep.subr.bf16.mxu1 %v6153_v35  ;;  %6220 = vmatpush1.bf16.msra.mxu0 %v6219_v39 }
 0xb99   :  { %6222 = vmatprep.subr.bf16.mxu0 %v6221_v32 }
 0xb9b   :  { %6156 = vmatpush1.bf16.msra.mxu1 %v6155_v44 }
 0xb9c   :  { %6158 = vmatprep.subr.bf16.mxu1 %v6157_v47  ;;  %6224 = vmatpush1.bf16.msra.mxu0 %v6223_v4 }
 0xb9f   :  { %6160 = vmatpush1.bf16.msra.mxu1 %v6159_v50 }
 0xc35   :  { %v3767_v51 = vpop.f32.mrb[44].mxu1 }
 0xc36   :  { %v3769_v52 = vpop.f32.mrb[45].mxu1 }
 0xc37   :  { %3965 = vmatprep.mubr.f32.mxu1 %v3769_v52  ;;  %4036 = vmatprep.mubr.f32.mxu0 %v3769_v52 }
 0xc38   :  { %3966 = vmatmul.mubr.f32.vlgmr.msra.gmra.mrb[42].mxu1 %v3767_v51  ;;  %4037 = vmatmul.mubr.f32.vlgmr.msra.gmra.mrb[34].mxu0 %v3767_v51 }
 0xc39   :  { %4275 = vmatprep.mubr.f32.mxu1 %v6678_v45 }
 0xd0b   :  { %v3967_v6 = vpop.f32.mrb[42].mxu1  ;;  %v4038_v56 = vpop.f32.mrb[34].mxu0 }
 0xd0c   :  { %v4047_v37 = vsel %vm585_vm1, %v3967_v6, 0.0  ;;  %v4061_v61 = vsel %vm585_vm1, %v4038_v56, 0.0  ;;  %v3969_v31 = vpop.f32.mrb[43].mxu1  ;;  %v4040_v57 = vpop.f32.mrb[35].mxu0 }
 0xd0d   :  { %v4048_v40 = vrot.slane %v4047_v37, 4  ;;  %v4062_v59 = vrot.slane %v4061_v61, 4  ;;  %v4054_v53 = vsel %vm585_vm1, %v3969_v31, 0.0  ;;  %v4068_v7 = vsel %vm585_vm1, %v4040_v57, 0.0 }
 0xd0e   :  { %v4055_v62 = vrot.slane %v4054_v53, 4  ;;  %v4069_v10 = vrot.slane %v4068_v7, 4 }
 0xd0f   :  { %v4049_v60 = vadd.f32 %v4048_v40, %v4047_v37  ;;  %v4063_v9 = vadd.f32 %v4062_v59, %v4061_v61 }
 0xd10   :  { %v4056_v63 = vadd.f32 %v4055_v62, %v4054_v53  ;;  %v4070_v43 = vadd.f32 %v4069_v10, %v4068_v7 }
 0xd11   :  { %v4050_v0 = vrot.slane %v4049_v60, 2  ;;  %v4064_v5 = vrot.slane %v4063_v9, 2 }
 0xd12   :  { %v4057_v11 = vrot.slane %v4056_v63, 2  ;;  %v4071_v12 = vrot.slane %v4070_v43, 2 }
 0xd13   :  { %v4051_v13 = vadd.f32 %v4050_v0, %v4049_v60  ;;  %v4065_v14 = vadd.f32 %v4064_v5, %v4063_v9 }
 0xd14   :  { %v4058_v49 = vadd.f32 %v4057_v11, %v4056_v63  ;;  %v4072_v15 = vadd.f32 %v4071_v12, %v4070_v43 }
 0xd15   :  { %v4052_v3 = vrot.slane %v4051_v13, 1  ;;  %v4066_v16 = vrot.slane %v4065_v14, 1 }
 0xd16   :  { %v4059_v17 = vrot.slane %v4058_v49, 1  ;;  %v4073_v18 = vrot.slane %v4072_v15, 1 }
 0xd17   :  { %v4053_v19 = vadd.f32 %v4052_v3, %v4051_v13  ;;  %v4067_v20 = vadd.f32 %v4066_v16, %v4065_v14  ;;  %v4158_v3 = vld [vmem:[#allocation25] sm:$0xf]  ;;  %v7493_v16 = vsub.s32 3, %v6996_v1 }
 0xd18   :  { %v4060_v8 = vadd.f32 %v4059_v17, %v4058_v49  ;;  %v4074_v21 = vadd.f32 %v4073_v18, %v4072_v15  ;;  %v4132_v49 = vld [vmem:[#allocation24] sm:$0xf]  ;;  %v7490_v15 = vsub.s32 2, %v6996_v1 }
 0xd19   :  { %v4076_v22 = vmul.f32 0.25, %v4053_v19  ;;  %v4078_v23 = vmul.f32 0.25, %v4067_v20  ;;  %v4137_v17 = vrot.slane %v4132_v49, %v7438_v55 }
 0xd1a   :  { %v4077_v24 = vmul.f32 0.25, %v4060_v8  ;;  %v4079_v25 = vmul.f32 0.25, %v4074_v21  ;;  %v4145_v19 = vrot.slane %v4132_v49, %v7490_v15  ;;  %v4163_v21 = vrot.slane %v4158_v3, %v7438_v55 }
 0xd1b   :  { %v4080_v26 = vsub.f32 %v3967_v6, %v4076_v22  ;;  %v4082_v27 = vsub.f32 %v4038_v56, %v4078_v23  ;;  %v4141_v22 = vrot.slane %v4132_v49, %v7441_v2 }
 0xd1c   :  { %v7477_v28 = vsub.f32 %v3969_v31, %v4077_v24  ;;  %v7479_v30 = vsub.f32 %v4040_v57, %v4079_v25  ;;  %v4171_v25 = vrot.slane %v4158_v3, %v7490_v15 }
 0xd1d   :  { %v4084_v34 = vmul.f32 %v4080_v26, %v4080_v26  ;;  %v4086_v35 = vmul.f32 %v4082_v27, %v4082_v27 }
 0xd1e   :  { %v4085_v36 = vmul.f32 %v7477_v28, %v7477_v28  ;;  %v4087_v38 = vmul.f32 %v7479_v30, %v7479_v30 }
 0xd1f   :  { %v4088_v39 = vsel %vm585_vm1, %v4084_v34, 0.0  ;;  %v4102_v41 = vsel %vm585_vm1, %v4086_v35, 0.0  ;;  %v4149_v34 = vrot.slane %v4132_v49, %v7493_v16 }
 0xd20   :  { %v4089_v42 = vrot.slane %v4088_v39, 4  ;;  %v4103_v32 = vrot.slane %v4102_v41, 4  ;;  %v4095_v44 = vsel %vm585_vm1, %v4085_v36, 0.0  ;;  %v4109_v47 = vsel %vm585_vm1, %v4087_v38, 0.0 }
 0xd21   :  { %v4096_v48 = vrot.slane %v4095_v44, 4  ;;  %v4110_v29 = vrot.slane %v4109_v47, 4  ;;  %v4167_v38 = vrot.slane %v4158_v3, %v7441_v2 }
 0xd22   :  { %v4090_v33 = vadd.f32 %v4089_v42, %v4088_v39  ;;  %v4104_v50 = vadd.f32 %v4103_v32, %v4102_v41 }
 0xd23   :  { %v4097_v54 = vadd.f32 %v4096_v48, %v4095_v44  ;;  %v4111_v4 = vadd.f32 %v4110_v29, %v4109_v47 }
 0xd24   :  { %v4091_v51 = vrot.slane %v4090_v33, 2  ;;  %v4105_v52 = vrot.slane %v4104_v50, 2 }
 0xd25   :  { %v4098_v6 = vrot.slane %v4097_v54, 2  ;;  %v4112_v56 = vrot.slane %v4111_v4, 2 }
 0xd26   :  { %v4092_v37 = vadd.f32 %v4091_v51, %v4090_v33  ;;  %v4106_v61 = vadd.f32 %v4105_v52, %v4104_v50 }
 0xd27   :  { %v4099_v31 = vadd.f32 %v4098_v6, %v4097_v54  ;;  %v4113_v57 = vadd.f32 %v4112_v56, %v4111_v4  ;;  %v4353_v56 = vld [vmem:[#allocation27] ss:$4 sm:$0xf] }
 0xd28   :  { %v4093_v40 = vrot.slane %v4092_v37, 1  ;;  %v4107_v59 = vrot.slane %v4106_v61, 1 }
 0xd29   :  { %v4100_v53 = vrot.slane %v4099_v31, 1  ;;  %v4114_v7 = vrot.slane %v4113_v57, 1 }
 0xd2a   :  { %v4094_v62 = vadd.f32 %v4093_v40, %v4092_v37  ;;  %v4108_v10 = vadd.f32 %v4107_v59, %v4106_v61  ;;  %v4358_v61 = vrot.slane %v4353_v56, %v7438_v55  ;;  %v4362_v40 = vrot.slane %v4353_v56, %v7441_v2 }
 0xd2b   :  { %v4101_v60 = vadd.f32 %v4100_v53, %v4099_v31  ;;  %v4115_v9 = vadd.f32 %v4114_v7, %v4113_v57 }
 0xd2c   :  { %v4116_v63 = vmul.f32 0.25, %v4094_v62  ;;  %v4118_v43 = vmul.f32 0.25, %v4108_v10 }
 0xd2d   :  { %v4117_v0 = vmul.f32 0.25, %v4101_v60  ;;  %v4119_v5 = vmul.f32 0.25, %v4115_v9  ;;  %v4370_v9 = vrot.slane %v4353_v56, %v7493_v16 }
 0xd2e   :  { %v4120_v11 = vadd.f32 0.8, %v4116_v63  ;;  %v4122_v12 = vadd.f32 0.8, %v4118_v43 }
 0xd2f   :  { %v4121_v13 = vadd.f32 0.8, %v4117_v0  ;;  %v4123_v14 = vadd.f32 0.8, %v4119_v5 }
 0xd30   :  { %6300 = vrsqrt.f32 %v4120_v11  ;;  %v4699_v0 = vld [vmem:[#allocation27 + $0x2] ss:$4 sm:$0xf] }
 0xd31   :  { %6302 = vrsqrt.f32 %v4122_v12 }
 0xd32   :  { %6304 = vrsqrt.f32 %v4121_v13 }
 0xd33   :  { %6306 = vrsqrt.f32 %v4123_v14 }
 0xd3a   :  { %v6301_v18 = vpop.eup %6300 }
 0xd3b   :  { %v6303_v20 = vpop.eup %6302  ;;  %v4128_v8 = vmul.f32 %v6301_v18, %v4080_v26  ;;  %v4175_v26 = vrot.slane %v4158_v3, %v7493_v16  ;;  %v4704_v3 = vrot.slane %v4699_v0, %v7438_v55 }
 0xd3c   :  { %v6305_v23 = vpop.eup %6304  ;;  %v4130_v24 = vmul.f32 %v6303_v20, %v4082_v27 }
 0xd3d   :  { %v6307_v35 = vpop.eup %6306  ;;  %v4154_v1 = vmul.f32 %v4137_v17, %v4128_v8  ;;  %v4129_v36 = vmul.f32 %v6305_v23, %v7477_v28 }
 0xd3e   :  { %v4156_v39 = vmul.f32 %v4145_v19, %v4130_v24  ;;  %v4131_v41 = vmul.f32 %v6307_v35, %v7479_v30  ;;  %v4708_v19 = vrot.slane %v4699_v0, %v7441_v2  ;;  %v4712_v24 = vrot.slane %v4699_v0, %v7490_v15 }
 0xd3f   :  { %v4180_v42 = vadd.f32 %v4163_v21, %v4154_v1  ;;  %v4155_v32 = vmul.f32 %v4141_v22, %v4129_v36 }
 0xd40   :  { %v4182_v44 = vadd.f32 %v4171_v25, %v4156_v39  ;;  %v4157_v47 = vmul.f32 %v4149_v34, %v4131_v41  ;;  %v4716_v34 = vrot.slane %v4699_v0, %v7493_v16 }
 0xd41   :  { %v4181_v27 = vadd.f32 %v4167_v38, %v4155_v32  ;;  %v4188_v29 = vmul.f32 0.2, %v4180_v42  ;;  %vm4184_vm0 = vcmp.gt.f32.partialorder %v4180_v42, 0.0 }
 0xd42   :  { %v4183_v48 = vadd.f32 %v4175_v26, %v4157_v47  ;;  %v4190_v28 = vmul.f32 0.2, %v4182_v44  ;;  %vm4186_vm12 = vcmp.gt.f32.partialorder %v4182_v44, 0.0 }
 0xd43   :  { %vm4185_vm9 = vcmp.gt.f32.partialorder %v4181_v27, 0.0  ;;  %v4189_v33 = vmul.f32 0.2, %v4181_v27  ;;  %v4192_v30 = vsel %vm4184_vm0, %v4180_v42, %v4188_v29 }
 0xd44   :  { %vm4187_vm10 = vcmp.gt.f32.partialorder %v4183_v48, 0.0  ;;  %v4191_v50 = vmul.f32 0.2, %v4183_v48  ;;  %v4194_v51 = vsel %vm4186_vm12, %v4182_v44, %v4190_v28 }
 0xd45   :  { %v4193_v54 = vsel %vm4185_vm9, %v4181_v27, %v4189_v33 }
 0xd46   :  { %4871 = vmatprep.subr.msk.mxu1 %vm585_vm1, %v4193_v54  ;;  %v4195_v4 = vsel %vm4187_vm10, %v4183_v48, %v4191_v50  ;;  %v4746_v50 = vstv %s7577_s17 }
 0xd47   :  { %4872 = vmatpush1.msk.msra.mxu1 %vm585_vm1, %v4192_v30 }
 0xd48   :  { %4276 = vmatmul.mubr.f32.vlgmr.msra.gmra.mrb[46].mxu1 %v6678_v45  ;;  %4873 = vmatprep.subr.msk.mxu1 %vm585_vm1, %v4195_v4 }
 0xd49   :  { %4874 = vmatpush1.msk.msra.mxu1 %vm585_vm1, %v4194_v51  ;;  %4346 = vmatprep.mubr.f32.mxu1 %v6678_v45 }
 0xd4a   :  { %4875 = vmatprep.subr.msk.mxu1 %vm585_vm1, %v4193_v54 }
 0xd4c   :  { %4347 = vmatmul.mubr.f32.vlgmr.msra.gmra.mrb[48].mxu1 %v6678_v45 }
 0xd4d   :  { %4876 = vmatpush1.msk.msra.mxu1 %vm585_vm1, %v4192_v30  ;;  %4445 = vmatprep.mubr.f32.mxu1 %v6678_v45 }
 0xd4e   :  { %4878 = vmatprep.subr.msk.mxu1 %vm585_vm1, %v4195_v4 }
 0xd50   :  { %4877 = vmatmul.mubr.msk.f32.vlgmr.msra.gmra.mrb[50].mxu1 %vm560_vm11, %v7291_v46 }
 0xd51   :  { %4879 = vmatpush1.msk.msra.mxu1 %vm585_vm1, %v4194_v51  ;;  %4516 = vmatprep.mubr.f32.mxu1 %v6678_v45 }
 0xd52   :  { %4881 = vmatprep.subr.msk.mxu1 %vm585_vm1, %v4193_v54  ;;  %v4749_v54 = vstv %s7578_s18 }
 0xd54   :  { %4880 = vmatmul.mubr.msk.f32.vlgmr.msra.gmra.mrb[52].mxu1 %vm560_vm11, %v7291_v46  ;;  %v4524_v46 = vld [vmem:[#allocation27 + $0x1] ss:$4 sm:$0xf] }
 0xd55   :  { %4882 = vmatpush1.msk.msra.mxu1 %vm585_vm1, %v4192_v30  ;;  %4620 = vmatprep.mubr.f32.mxu1 %v6678_v45  ;;  %v4529_v57 = vrot.slane %v4524_v46, %v7438_v55  ;;  %v4533_v59 = vrot.slane %v4524_v46, %v7441_v2  ;;  %v4537_v10 = vrot.slane %v4524_v46, %v7490_v15 }
 0xd56   :  { %4884 = vmatprep.subr.msk.mxu1 %vm585_vm1, %v4195_v4  ;;  %v4541_v43 = vrot.slane %v4524_v46, %v7493_v16  ;;  %v4740_v16 = vstv %s7576_s16 }
 0xd58   :  { %4883 = vmatmul.mubr.msk.f32.vlgmr.msra.gmra.mrb[54].mxu1 %vm560_vm11, %v7342_v58 }
 0xd59   :  { %4885 = vmatpush1.msk.msra.mxu1 %vm585_vm1, %v4194_v51  ;;  %4691 = vmatprep.mubr.f32.mxu1 %v6678_v45  ;;  %v4366_v45 = vrot.slane %v4353_v56, %v7490_v15  ;;  %vm4729_vm1 = vcmask 1041408  }
 0xd5c   :  { %4886 = vmatmul.mubr.msk.f32.vlgmr.msra.gmra.mrb[56].mxu1 %vm560_vm11, %v7342_v58 }
 0xe1b   :  { %v4277_v52 = vpop.f32.mrb[46].mxu1 }
 0xe1c   :  { %v4279_v6 = vpop.f32.mrb[47].mxu1  ;;  %v4375_v7 = vmul.f32 %v4358_v61, %v4277_v52 }
 0xe1d   :  { %v4376_v60 = vmul.f32 %v4362_v40, %v4279_v6 }
 0xe1f   :  { %v4348_v37 = vpop.f32.mrb[48].mxu1 }
 0xe20   :  { %v4350_v31 = vpop.f32.mrb[49].mxu1  ;;  %v4377_v13 = vmul.f32 %v4366_v45, %v4348_v37 }
 0xe21   :  { %v4378_v17 = vmul.f32 %v4370_v9, %v4350_v31 }
 0xe23   :  { %v4447_v53 = vpop.f32.mrb[50].mxu1 }
 0xe24   :  { %v4546_v62 = vmul.f32 %v4529_v57, %v4447_v53  ;;  %v4449_v58 = vpop.f32.mrb[51].mxu1 }
 0xe25   :  { %v4547_v63 = vmul.f32 %v4533_v59, %v4449_v58 }
 0xe26   :  { %v4550_v5 = vadd.f32 %v4546_v62, %v4375_v7 }
 0xe27   :  { %v4551_v11 = vadd.f32 %v4547_v63, %v4376_v60  ;;  %v4518_v12 = vpop.f32.mrb[52].mxu1 }
 0xe28   :  { %v4548_v14 = vmul.f32 %v4537_v10, %v4518_v12  ;;  %v4520_v49 = vpop.f32.mrb[53].mxu1 }
 0xe29   :  { %v4549_v18 = vmul.f32 %v4541_v43, %v4520_v49 }
 0xe2a   :  { %v4552_v20 = vadd.f32 %v4548_v14, %v4377_v13 }
 0xe2b   :  { %v4553_v8 = vadd.f32 %v4549_v18, %v4378_v17  ;;  %v4622_v21 = vpop.f32.mrb[54].mxu1 }
 0xe2c   :  { %v4721_v22 = vmul.f32 %v4704_v3, %v4622_v21  ;;  %v4624_v23 = vpop.f32.mrb[55].mxu1 }
 0xe2d   :  { %v4722_v25 = vmul.f32 %v4708_v19, %v4624_v23 }
 0xe2e   :  { %v4725_v35 = vadd.f32 %v4721_v22, %v4550_v5 }
 0xe2f   :  { %v4726_v1 = vadd.f32 %v4722_v25, %v4551_v11  ;;  %v4693_v36 = vpop.f32.mrb[56].mxu1 }
 0xe30   :  { %v4730_v55 = vsel %vm4729_vm1, %v4725_v35, 0.0  ;;  %v4723_v38 = vmul.f32 %v4712_v24, %v4693_v36  ;;  %v4695_v39 = vpop.f32.mrb[57].mxu1 }
 0xe31   :  { %v4731_v2 = vsel %vm4729_vm1, %v4726_v1, 0.0  ;;  %v4724_v41 = vmul.f32 %v4716_v34, %v4695_v39 }
 0xe32   :  { %v4727_v26 = vadd.f32 %v4723_v38, %v4552_v20  ;;  %v4732_v42 = vadd.f32 %v4731_v2, %v4730_v55 }
 0xe33   :  { %v4728_v32 = vadd.f32 %v4724_v41, %v4553_v8 }
 0xe34   :  { %v4733_v44 = vsel %vm4729_vm1, %v4727_v26, 0.0 }
 0xe35   :  { %v4734_v15 = vadd.f32 %v4733_v44, %v4732_v42  ;;  %v4735_v47 = vsel %vm4729_vm1, %v4728_v32, 0.0 }
 0xe37   :  { %v4736_v27 = vadd.f32 %v4735_v47, %v4734_v15 }
 0xe39   :  { %4737 = vadd.xlane.f32.xlu0 %v4736_v27 }
 0xec6   :  { %v4738_v48 = vpop.xlane.xlu0 %4737 }
 0xec7   :  { %v4741_v29 = vadd.f32 %v4740_v16, %v4738_v48 }
 0xec9   :  { %vm4742_vm11 = vcmp.gt.f32.partialorder %v4741_v29, 0.0  ;;  %v4743_v33 = vmul.f32 0.2, %v4741_v29 }
 0xecb   :  { %v4744_v28 = vsel %vm4742_vm11, %v4741_v29, %v4743_v33 }
 0xecc   :  { %v4747_v30 = vmul.f32 %v4746_v50, %v4744_v28 }
 0xece   :  { %v4750_v4 = vadd.f32 %v4749_v54, %v4747_v30 }
 0xed0   :  { %4752 = vst.msk [vmem:[%s7579_s19] sm:$0x3] %vm4751_vm5, %v4750_v4 }
 0xed1   :  { %4757 = vsyncpa [#allocation6], 1 }
 0xed2   :  { %4758 = vsyncpa [#allocation8], 1 }
 0xed3   :  { %4759 = vsyncpa [#allocation11], 1 }
 0xed4   :  { %4760 = vsyncpa [#allocation14], 1 }
 0xed5   :  { %4761 = vsyncpa [#allocation17], 1 }
 0xed6   :  { %4762 = vsyncpa [#allocation20], 1 }
 0xed7   :  { %4763 = vsyncpa [#allocation23], 1 }
 0xed8   :  { %4764 = vsyncpa [#allocation26], 1 }

</bundles_post_ra>
